<compile_context>
chip_gen: v5e
topology: v5e:2x2
jax: 0.10.0
libtpu: 0.0.40
codegen_flags: <defaults>
</compile_context>

<pallas_src>
import functools

import jax
import jax.numpy as jnp
from jax.experimental import pallas as pl
from jax.experimental.pallas import tpu as pltpu


def _round_up(a, b):
    return (a + b - 1) // b * b


def _vmem_capacity_bytes():
    try:
        info = pltpu.get_tpu_info()
        cap = getattr(info, "vmem_capacity_bytes", None)
        if cap:
            return int(cap)
    except Exception:
        pass
    return 64 << 20  # conservative fallback (v7x per-TC VMEM)


def _choose_tm(n_pad, d_pad, itemsize):
    """Largest MXU-friendly row block whose working set fits comfortably in VMEM."""
    budget = int(_vmem_capacity_bytes() * 0.5)
    resident = 2 * (n_pad * d_pad * itemsize + 3 * n_pad * 4)  # x + small vectors (x2 bufs)
    for tm in (512, 256, 128, 64, 32, 16, 8):
        if n_pad % tm:
            continue
        live = 6 * tm * n_pad * 4 + 2 * tm * d_pad * 4  # (TM,N) f32 temporaries + row block
        if resident + live <= budget:
            return tm
    return 8


def _vmem_limit_bytes(n_pad, d_pad, tm, itemsize):
    resident = 2 * (n_pad * d_pad * itemsize + 3 * n_pad * 4)
    live = 8 * tm * n_pad * 4 + 2 * tm * d_pad * 4
    need = resident + live
    return int(min(_vmem_capacity_bytes() * 9 // 10, max(32 << 20, 2 * need)))


def _wrt_kernel(x_ref, colsq_ref, trow_ref, tcol_ref, loss_ref, corr_ref, *, tm, n_real):
    step = pl.program_id(0)
    r0 = pl.multiple_of(step * tm, tm)

    x_row = x_ref[pl.ds(r0, tm), :]          # (TM, D_pad) native dtype
    x_all = x_ref[...]                       # (N_pad, D_pad) native dtype (resident)

    # Gram slice on the MXU: contract dim 1 of both operands (no x.T materialized),
    # f32 accumulation regardless of input dtype.
    gram = jax.lax.dot_general(
        x_row, x_all,
        dimension_numbers=(((1,), (1,)), ((), ())),
        preferred_element_type=jnp.float32)  # (TM, N_pad) f32

    xr = x_row.astype(jnp.float32)
    row_sq = jnp.sum(xr * xr, axis=1, keepdims=True)            # (TM, 1) f32
    dist = row_sq + colsq_ref[...] - 2.0 * gram                 # (TM, N_pad) f32
    dist = jnp.sqrt(jnp.maximum(dist, 1e-12))

    # Label / validity masks (padded columns are neither positives nor negatives).
    t_row = trow_ref[pl.ds(r0, tm), :]                          # (TM, 1) int32
    t_col = tcol_ref[...]                                       # (1, N_pad) int32
    col_valid = jax.lax.broadcasted_iota(jnp.int32, t_col.shape, 1) < n_real
    same = t_row == t_col                                       # (TM, N_pad) bool
    pos = jnp.logical_and(same, col_valid)
    neg = jnp.logical_and(jnp.logical_not(same), col_valid)

    # Weighted "furthest positive": softmax_weights(dist*is_pos, is_pos), fused.
    d_ap = jnp.where(pos, dist, 0.0)
    max_p = jnp.max(d_ap, axis=1, keepdims=True)
    e_p = jnp.where(pos, jnp.exp(d_ap - max_p), 0.0)            # single exp pass
    z_p = jnp.sum(e_p, axis=1, keepdims=True) + 1e-6
    fp = jnp.sum(d_ap * e_p, axis=1, keepdims=True) * pl.reciprocal(z_p)

    # Weighted "closest negative": softmax_weights(-dist*is_neg, is_neg), fused.
    d_an = jnp.where(neg, dist, 0.0)
    max_n = jnp.max(-d_an, axis=1, keepdims=True)
    e_n = jnp.where(neg, jnp.exp(-d_an - max_n), 0.0)           # single exp pass
    z_n = jnp.sum(e_n, axis=1, keepdims=True) + 1e-6
    cn = jnp.sum(d_an * e_n, axis=1, keepdims=True) * pl.reciprocal(z_n)

    # SoftMarginLoss with target 1 on (cn - fp): log(1 + exp(fp - cn)), masked to
    # real rows; "correct" counts rows where cn >= fp.
    row_valid = (jax.lax.broadcasted_iota(jnp.int32, (tm, 1), 0) + r0) < n_real
    v_row = row_valid.astype(jnp.float32)                       # (TM, 1)
    part_loss = jnp.sum(jnp.logaddexp(0.0, fp - cn) * v_row, axis=0, keepdims=True)
    part_corr = jnp.sum(jnp.where(cn >= fp, v_row, 0.0), axis=0, keepdims=True)

    @pl.when(step == 0)
    def _init():
        loss_ref[...] = jnp.zeros_like(loss_ref)
        corr_ref[...] = jnp.zeros_like(corr_ref)

    loss_ref[...] += part_loss
    corr_ref[...] += part_corr

    @pl.when(step == pl.num_programs(0) - 1)
    def _finalize():
        loss_ref[...] = loss_ref[...] * (1.0 / float(n_real))


def triplet_loss_wrt(inputs, targets, label_assign=None, true_targets=None,
                     prob=None, threshold=0.6, alpha=100,
                     normalize_feature=False):
    """Returns (loss, correct, N) — same semantics as TripletLoss_WRT.forward."""
    n, d = inputs.shape

    if normalize_feature:
        # x * rsqrt(sum(x^2) + eps): one rsqrt per row instead of sqrt + divides.
        x32 = inputs.astype(jnp.float32)
        inv = jax.lax.rsqrt(jnp.sum(x32 * x32, axis=-1, keepdims=True) + 1e-24)
        inputs = (x32 * inv).astype(inputs.dtype)

    n_pad = _round_up(n, 128)
    d_pad = _round_up(d, 128)
    itemsize = jnp.dtype(inputs.dtype).itemsize
    tm = _choose_tm(n_pad, d_pad, itemsize)

    # Zero-pad to MXU/lane-aligned shapes (padding is masked out inside the kernel).
    x_p = jnp.zeros((n_pad, d_pad), inputs.dtype).at[:n, :d].set(inputs)

    t = targets.reshape(n).astype(jnp.int32)
    t_rows = jnp.zeros((n_pad, 1), jnp.int32).at[:n, 0].set(t)
    t_cols = jnp.zeros((1, n_pad), jnp.int32).at[0, :n].set(t)

    # Column squared norms in f32 (keeps a2+b2-2ab in f32 even for bf16 embeddings).
    xf = x_p.astype(jnp.float32)
    col_sq = jnp.sum(xf * xf, axis=1).reshape(1, n_pad)

    kernel = functools.partial(_wrt_kernel, tm=tm, n_real=n)

    loss, correct = pl.pallas_call(
        kernel,
        grid=(n_pad // tm,),
        in_specs=[
            pl.BlockSpec((n_pad, d_pad), lambda i: (0, 0)),   # embeddings (resident)
            pl.BlockSpec((1, n_pad), lambda i: (0, 0)),       # column ||x||^2
            pl.BlockSpec((n_pad, 1), lambda i: (0, 0)),       # labels (column vector)
            pl.BlockSpec((1, n_pad), lambda i: (0, 0)),       # labels (row vector)
        ],
        out_specs=(
            pl.BlockSpec((1, 1), lambda i: (0, 0)),
            pl.BlockSpec((1, 1), lambda i: (0, 0)),
        ),
        out_shape=(
            jax.ShapeDtypeStruct((1, 1), jnp.float32),
            jax.ShapeDtypeStruct((1, 1), jnp.float32),
        ),
        compiler_params=pltpu.CompilerParams(
            dimension_semantics=("arbitrary",),
            vmem_limit_bytes=_vmem_limit_bytes(n_pad, d_pad, tm, itemsize),
        ),
    )(x_p, col_sq, t_rows, t_cols)

    return loss[0, 0], correct[0, 0].astype(jnp.int32), n


if __name__ == "__main__":
    key = jax.random.PRNGKey(0)
    N, D = 8, 32
    inputs = jax.random.normal(key, (N, D), dtype=jnp.float32)
    # deterministic labels: two identities, balanced
    targets = jnp.array([0, 0, 1, 1, 0, 1, 0, 1], dtype=jnp.int32)

    loss, correct, num = triplet_loss_wrt(inputs, targets)
    jax.block_until_ready((loss, correct))

    # pure-JAX reference check (same math as the PyTorch module, outside Pallas)
    def _softmax_weights(dist, mask):
        max_v = jnp.max(dist * mask, axis=1, keepdims=True)
        diff = dist - max_v
        z = jnp.sum(jnp.exp(diff) * mask, axis=1, keepdims=True) + 1e-6
        return jnp.exp(diff) * mask / z

    sq = jnp.sum(inputs * inputs, axis=1, keepdims=True)
    dist = jnp.sqrt(jnp.maximum(sq + sq.T - 2.0 * inputs @ inputs.T, 1e-12))
    is_pos = (targets[:, None] == targets[None, :]).astype(jnp.float32)
    is_neg = 1.0 - is_pos
    d_ap, d_an = dist * is_pos, dist * is_neg
    w_ap = _softmax_weights(d_ap, is_pos)
    w_an = _softmax_weights(-d_an, is_neg)
    fp = jnp.sum(d_ap * w_ap, axis=1)
    cn = jnp.sum(d_an * w_an, axis=1)
    ref_loss = jnp.mean(jnp.logaddexp(0.0, fp - cn))
    ref_correct = jnp.sum((cn >= fp).astype(jnp.int32))

    assert jnp.allclose(loss, ref_loss, rtol=1e-4, atol=1e-5), (loss, ref_loss)
    assert int(correct) == int(ref_correct), (correct, ref_correct)
    assert num == N

    print("KERNEL_OK")
</pallas_src>

<mosaic_0001>
module attributes {stable_mosaic.version = 11 : i64} {
  func.func @_wrt_kernel(%arg0: i32, %arg1: memref<128x128xf32, #tpu.memory_space<vmem>>, %arg2: memref<1x128xf32, #tpu.memory_space<vmem>>, %arg3: memref<128x1xi32, #tpu.memory_space<vmem>>, %arg4: memref<1x128xi32, #tpu.memory_space<vmem>>, %arg5: memref<1x1xf32, #tpu.memory_space<vmem>>, %arg6: memref<1x1xf32, #tpu.memory_space<vmem>>) attributes {dimension_semantics = [#tpu.dimension_semantics<arbitrary>], iteration_bounds = array<i64: 1>, scalar_prefetch = 0 : i64, scratch_operands = 0 : i64, tpu.core_type = #tpu.core_type<tc>, window_params = [{pipeline_mode = #tpu.pipeline_mode<synchronous>, transform_indices = @transform_0, window_bounds = array<i64: 128, 128>}, {pipeline_mode = #tpu.pipeline_mode<synchronous>, transform_indices = @transform_1, window_bounds = array<i64: 1, 128>}, {pipeline_mode = #tpu.pipeline_mode<synchronous>, transform_indices = @transform_2, window_bounds = array<i64: 128, 1>}, {pipeline_mode = #tpu.pipeline_mode<synchronous>, transform_indices = @transform_3, window_bounds = array<i64: 1, 128>}, {pipeline_mode = #tpu.pipeline_mode<synchronous>, transform_indices = @transform_4, window_bounds = array<i64: 1, 1>}, {pipeline_mode = #tpu.pipeline_mode<synchronous>, transform_indices = @transform_5, window_bounds = array<i64: 1, 1>}]} {
    %c128_i32 = arith.constant 128 : i32
    %0 = arith.muli %arg0, %c128_i32 : i32
    %1 = tpu.assume_multiple %0, 128 : i32
    %2 = arith.index_cast %1 : i32 to index
    %c0 = arith.constant 0 : index
    %3 = vector.load %arg1[%2, %c0] : memref<128x128xf32, #tpu.memory_space<vmem>>, vector<128x128xf32>
    %c0_0 = arith.constant 0 : index
    %c0_1 = arith.constant 0 : index
    %4 = vector.load %arg1[%c0_0, %c0_1] : memref<128x128xf32, #tpu.memory_space<vmem>>, vector<128x128xf32>
    %cst = arith.constant dense<0.000000e+00> : vector<128x128xf32>
    %5 = tpu.matmul %3, %4, %cst {dimension_numbers = #tpu.dot_dimension_numbers<[1], [1], [0], [0], [0, 0, 1, 0], [], []>} : vector<128x128xf32>, vector<128x128xf32>, vector<128x128xf32> -> vector<128x128xf32>
    %6 = arith.mulf %3, %3 : vector<128x128xf32>
    %cst_2 = arith.constant dense<0.000000e+00> : vector<128xf32>
    %7 = vector.multi_reduction <add>, %6, %cst_2 [1] : vector<128x128xf32> to vector<128xf32>
    %8 = vector.shape_cast %7 : vector<128xf32> to vector<128x1xf32>
    %c0_3 = arith.constant 0 : index
    %c0_4 = arith.constant 0 : index
    %9 = vector.load %arg2[%c0_3, %c0_4] : memref<1x128xf32, #tpu.memory_space<vmem>>, vector<1x128xf32>
    %10 = vector.broadcast %8 : vector<128x1xf32> to vector<128x128xf32>
    %11 = vector.broadcast %9 : vector<1x128xf32> to vector<128x128xf32>
    %12 = arith.addf %10, %11 : vector<128x128xf32>
    %cst_5 = arith.constant 2.000000e+00 : f32
    %13 = vector.broadcast %cst_5 : f32 to vector<128x128xf32>
    %14 = arith.mulf %13, %5 : vector<128x128xf32>
    %15 = arith.subf %12, %14 : vector<128x128xf32>
    %cst_6 = arith.constant 9.99999996E-13 : f32
    %16 = vector.broadcast %cst_6 : f32 to vector<128x128xf32>
    %17 = arith.maximumf %15, %16 : vector<128x128xf32>
    %18 = math.sqrt %17 : vector<128x128xf32>
    %19 = arith.index_cast %1 : i32 to index
    %c0_7 = arith.constant 0 : index
    %20 = vector.load %arg3[%19, %c0_7] : memref<128x1xi32, #tpu.memory_space<vmem>>, vector<128x1xi32>
    %c0_8 = arith.constant 0 : index
    %c0_9 = arith.constant 0 : index
    %21 = vector.load %arg4[%c0_8, %c0_9] : memref<1x128xi32, #tpu.memory_space<vmem>>, vector<1x128xi32>
    %22 = tpu.iota {dimensions = array<i32: 1>} : vector<1x128xi32>
    %c8_i32 = arith.constant 8 : i32
    %23 = vector.broadcast %c8_i32 : i32 to vector<1x128xi32>
    %24 = arith.cmpi slt, %22, %23 : vector<1x128xi32>
    %25 = vector.broadcast %20 : vector<128x1xi32> to vector<128x128xi32>
    %26 = vector.broadcast %21 : vector<1x128xi32> to vector<128x128xi32>
    %27 = arith.cmpi eq, %25, %26 : vector<128x128xi32>
    %28 = vector.broadcast %24 : vector<1x128xi1> to vector<128x128xi1>
    %29 = arith.andi %27, %28 : vector<128x128xi1>
    %cst_10 = arith.constant dense<true> : vector<128x128xi1>
    %30 = arith.xori %27, %cst_10 : vector<128x128xi1>
    %31 = vector.broadcast %24 : vector<1x128xi1> to vector<128x128xi1>
    %32 = arith.andi %30, %31 : vector<128x128xi1>
    %cst_11 = arith.constant 0.000000e+00 : f32
    %33 = vector.broadcast %cst_11 : f32 to vector<128x128xf32>
    %34 = arith.select %29, %18, %33 : vector<128x128xi1>, vector<128x128xf32>
    %cst_12 = arith.constant dense<0xFF800000> : vector<128xf32>
    %35 = vector.multi_reduction <maximumf>, %34, %cst_12 [1] : vector<128x128xf32> to vector<128xf32>
    %36 = vector.shape_cast %35 : vector<128xf32> to vector<128x1xf32>
    %37 = vector.broadcast %36 : vector<128x1xf32> to vector<128x128xf32>
    %38 = arith.subf %34, %37 : vector<128x128xf32>
    %39 = math.exp %38 : vector<128x128xf32>
    %cst_13 = arith.constant 0.000000e+00 : f32
    %40 = vector.broadcast %cst_13 : f32 to vector<128x128xf32>
    %41 = arith.select %29, %39, %40 : vector<128x128xi1>, vector<128x128xf32>
    %cst_14 = arith.constant dense<0.000000e+00> : vector<128xf32>
    %42 = vector.multi_reduction <add>, %41, %cst_14 [1] : vector<128x128xf32> to vector<128xf32>
    %43 = vector.shape_cast %42 : vector<128xf32> to vector<128x1xf32>
    %cst_15 = arith.constant 9.99999997E-7 : f32
    %44 = vector.broadcast %cst_15 : f32 to vector<128x1xf32>
    %45 = arith.addf %43, %44 : vector<128x1xf32>
    %46 = arith.mulf %34, %41 : vector<128x128xf32>
    %cst_16 = arith.constant dense<0.000000e+00> : vector<128xf32>
    %47 = vector.multi_reduction <add>, %46, %cst_16 [1] : vector<128x128xf32> to vector<128xf32>
    %48 = vector.shape_cast %47 : vector<128xf32> to vector<128x1xf32>
    %49 = tpu.reciprocal %45 : vector<128x1xf32> -> vector<128x1xf32>
    %50 = arith.mulf %48, %49 : vector<128x1xf32>
    %cst_17 = arith.constant 0.000000e+00 : f32
    %51 = vector.broadcast %cst_17 : f32 to vector<128x128xf32>
    %52 = arith.select %32, %18, %51 : vector<128x128xi1>, vector<128x128xf32>
    %cst_18 = arith.constant 0.000000e+00 : f32
    %53 = vector.broadcast %cst_18 : f32 to vector<128x128xf32>
    %54 = arith.subf %53, %52 : vector<128x128xf32>
    %cst_19 = arith.constant dense<0xFF800000> : vector<128xf32>
    %55 = vector.multi_reduction <maximumf>, %54, %cst_19 [1] : vector<128x128xf32> to vector<128xf32>
    %56 = vector.shape_cast %55 : vector<128xf32> to vector<128x1xf32>
    %cst_20 = arith.constant 0.000000e+00 : f32
    %57 = vector.broadcast %cst_20 : f32 to vector<128x128xf32>
    %58 = arith.subf %57, %52 : vector<128x128xf32>
    %59 = vector.broadcast %56 : vector<128x1xf32> to vector<128x128xf32>
    %60 = arith.subf %58, %59 : vector<128x128xf32>
    %61 = math.exp %60 : vector<128x128xf32>
    %cst_21 = arith.constant 0.000000e+00 : f32
    %62 = vector.broadcast %cst_21 : f32 to vector<128x128xf32>
    %63 = arith.select %32, %61, %62 : vector<128x128xi1>, vector<128x128xf32>
    %cst_22 = arith.constant dense<0.000000e+00> : vector<128xf32>
    %64 = vector.multi_reduction <add>, %63, %cst_22 [1] : vector<128x128xf32> to vector<128xf32>
    %65 = vector.shape_cast %64 : vector<128xf32> to vector<128x1xf32>
    %cst_23 = arith.constant 9.99999997E-7 : f32
    %66 = vector.broadcast %cst_23 : f32 to vector<128x1xf32>
    %67 = arith.addf %65, %66 : vector<128x1xf32>
    %68 = arith.mulf %52, %63 : vector<128x128xf32>
    %cst_24 = arith.constant dense<0.000000e+00> : vector<128xf32>
    %69 = vector.multi_reduction <add>, %68, %cst_24 [1] : vector<128x128xf32> to vector<128xf32>
    %70 = vector.shape_cast %69 : vector<128xf32> to vector<128x1xf32>
    %71 = tpu.reciprocal %67 : vector<128x1xf32> -> vector<128x1xf32>
    %72 = arith.mulf %70, %71 : vector<128x1xf32>
    %73 = tpu.iota {dimensions = array<i32: 0>} : vector<128x1xi32>
    %74 = vector.broadcast %1 : i32 to vector<128x1xi32>
    %75 = arith.addi %73, %74 : vector<128x1xi32>
    %c8_i32_25 = arith.constant 8 : i32
    %76 = vector.broadcast %c8_i32_25 : i32 to vector<128x1xi32>
    %77 = arith.cmpi slt, %75, %76 : vector<128x1xi32>
    %78 = arith.extui %77 : vector<128x1xi1> to vector<128x1xi32>
    %79 = arith.sitofp %78 : vector<128x1xi32> to vector<128x1xf32>
    %80 = arith.subf %50, %72 : vector<128x1xf32>
    %cst_26 = arith.constant 0.000000e+00 : f32
    %81 = vector.broadcast %cst_26 : f32 to vector<128x1xf32>
    %82 = arith.maximumf %81, %80 : vector<128x1xf32>
    %83 = vector.broadcast %cst_26 : f32 to vector<128x1xf32>
    %84 = arith.subf %83, %80 : vector<128x1xf32>
    %85 = arith.cmpf one, %84, %84 : vector<128x1xf32>
    %86 = vector.broadcast %cst_26 : f32 to vector<128x1xf32>
    %87 = arith.addf %86, %80 : vector<128x1xf32>
    %88 = math.absf %84 : vector<128x1xf32>
    %cst_27 = arith.constant 0.000000e+00 : f32
    %89 = vector.broadcast %cst_27 : f32 to vector<128x1xf32>
    %90 = arith.subf %89, %88 : vector<128x1xf32>
    %91 = math.exp %90 : vector<128x1xf32>
    %92 = math.log1p %91 : vector<128x1xf32>
    %93 = arith.addf %82, %92 : vector<128x1xf32>
    %94 = arith.select %85, %87, %93 : vector<128x1xi1>, vector<128x1xf32>
    %95 = arith.mulf %94, %79 : vector<128x1xf32>
    %cst_28 = arith.constant dense<0.000000e+00> : vector<1xf32>
    %96 = vector.multi_reduction <add>, %95, %cst_28 [0] : vector<128x1xf32> to vector<1xf32>
    %97 = vector.shape_cast %96 : vector<1xf32> to vector<1x1xf32>
    %98 = arith.cmpf oge, %72, %50 : vector<128x1xf32>
    %cst_29 = arith.constant 0.000000e+00 : f32
    %99 = vector.broadcast %cst_29 : f32 to vector<128x1xf32>
    %100 = arith.select %98, %79, %99 : vector<128x1xi1>, vector<128x1xf32>
    %cst_30 = arith.constant dense<0.000000e+00> : vector<1xf32>
    %101 = vector.multi_reduction <add>, %100, %cst_30 [0] : vector<128x1xf32> to vector<1xf32>
    %102 = vector.shape_cast %101 : vector<1xf32> to vector<1x1xf32>
    %c0_i32 = arith.constant 0 : i32
    %103 = arith.cmpi eq, %arg0, %c0_i32 : i32
    %104 = arith.extui %103 : i1 to i32
    %c0_i32_31 = arith.constant 0 : i32
    %105 = arith.cmpi ne, %104, %c0_i32_31 : i32
    scf.if %105 {
      %cst_42 = arith.constant 0.000000e+00 : f32
      %115 = vector.broadcast %cst_42 : f32 to vector<1x1xf32>
      %c0_43 = arith.constant 0 : index
      %c0_44 = arith.constant 0 : index
      %116 = vector.load %arg5[%c0_43, %c0_44] : memref<1x1xf32, #tpu.memory_space<vmem>>, vector<1x1xf32>
      tpu.vector_store %arg5[%c0_43, %c0_44], %115 {strides = array<i32>} : memref<1x1xf32, #tpu.memory_space<vmem>>, vector<1x1xf32>,
      %cst_45 = arith.constant 0.000000e+00 : f32
      %117 = vector.broadcast %cst_45 : f32 to vector<1x1xf32>
      %c0_46 = arith.constant 0 : index
      %c0_47 = arith.constant 0 : index
      %118 = vector.load %arg6[%c0_46, %c0_47] : memref<1x1xf32, #tpu.memory_space<vmem>>, vector<1x1xf32>
      tpu.vector_store %arg6[%c0_46, %c0_47], %117 {strides = array<i32>} : memref<1x1xf32, #tpu.memory_space<vmem>>, vector<1x1xf32>,
    } else {
    }
    %c0_32 = arith.constant 0 : index
    %c0_33 = arith.constant 0 : index
    %106 = vector.load %arg5[%c0_32, %c0_33] : memref<1x1xf32, #tpu.memory_space<vmem>>, vector<1x1xf32>
    %107 = arith.addf %106, %97 : vector<1x1xf32>
    %c0_34 = arith.constant 0 : index
    %c0_35 = arith.constant 0 : index
    %108 = vector.load %arg5[%c0_34, %c0_35] : memref<1x1xf32, #tpu.memory_space<vmem>>, vector<1x1xf32>
    tpu.vector_store %arg5[%c0_34, %c0_35], %107 {strides = array<i32>} : memref<1x1xf32, #tpu.memory_space<vmem>>, vector<1x1xf32>,
    %c0_36 = arith.constant 0 : index
    %c0_37 = arith.constant 0 : index
    %109 = vector.load %arg6[%c0_36, %c0_37] : memref<1x1xf32, #tpu.memory_space<vmem>>, vector<1x1xf32>
    %110 = arith.addf %109, %102 : vector<1x1xf32>
    %c0_38 = arith.constant 0 : index
    %c0_39 = arith.constant 0 : index
    %111 = vector.load %arg6[%c0_38, %c0_39] : memref<1x1xf32, #tpu.memory_space<vmem>>, vector<1x1xf32>
    tpu.vector_store %arg6[%c0_38, %c0_39], %110 {strides = array<i32>} : memref<1x1xf32, #tpu.memory_space<vmem>>, vector<1x1xf32>,
    %c0_i32_40 = arith.constant 0 : i32
    %112 = arith.cmpi eq, %arg0, %c0_i32_40 : i32
    %113 = arith.extui %112 : i1 to i32
    %c0_i32_41 = arith.constant 0 : i32
    %114 = arith.cmpi ne, %113, %c0_i32_41 : i32
    scf.if %114 {
      %c0_42 = arith.constant 0 : index
      %c0_43 = arith.constant 0 : index
      %115 = vector.load %arg5[%c0_42, %c0_43] : memref<1x1xf32, #tpu.memory_space<vmem>>, vector<1x1xf32>
      %cst_44 = arith.constant 1.250000e-01 : f32
      %116 = vector.broadcast %cst_44 : f32 to vector<1x1xf32>
      %117 = arith.mulf %115, %116 : vector<1x1xf32>
      %c0_45 = arith.constant 0 : index
      %c0_46 = arith.constant 0 : index
      %118 = vector.load %arg5[%c0_45, %c0_46] : memref<1x1xf32, #tpu.memory_space<vmem>>, vector<1x1xf32>
      tpu.vector_store %arg5[%c0_45, %c0_46], %117 {strides = array<i32>} : memref<1x1xf32, #tpu.memory_space<vmem>>, vector<1x1xf32>,
    } else {
    }
    return
  }
  func.func @transform_0(%arg0: i32) -> (i32, i32) {
    %c0_i32 = arith.constant 0 : i32
    %c0_i32_0 = arith.constant 0 : i32
    %c0_i32_1 = arith.constant 0 : i32
    return %c0_i32, %c0_i32_0 : i32, i32
  }
  func.func @transform_1(%arg0: i32) -> (i32, i32) {
    %c0_i32 = arith.constant 0 : i32
    %c0_i32_0 = arith.constant 0 : i32
    %c0_i32_1 = arith.constant 0 : i32
    return %c0_i32, %c0_i32_0 : i32, i32
  }
  func.func @transform_2(%arg0: i32) -> (i32, i32) {
    %c0_i32 = arith.constant 0 : i32
    %c0_i32_0 = arith.constant 0 : i32
    %c0_i32_1 = arith.constant 0 : i32
    return %c0_i32, %c0_i32_0 : i32, i32
  }
  func.func @transform_3(%arg0: i32) -> (i32, i32) {
    %c0_i32 = arith.constant 0 : i32
    %c0_i32_0 = arith.constant 0 : i32
    %c0_i32_1 = arith.constant 0 : i32
    return %c0_i32, %c0_i32_0 : i32, i32
  }
  func.func @transform_4(%arg0: i32) -> (i32, i32) {
    %c0_i32 = arith.constant 0 : i32
    %c0_i32_0 = arith.constant 0 : i32
    %c0_i32_1 = arith.constant 0 : i32
    return %c0_i32, %c0_i32_0 : i32, i32
  }
  func.func @transform_5(%arg0: i32) -> (i32, i32) {
    %c0_i32 = arith.constant 0 : i32
    %c0_i32_0 = arith.constant 0 : i32
    %c0_i32_1 = arith.constant 0 : i32
    return %c0_i32, %c0_i32_0 : i32, i32
  }
}

</mosaic_0001>

<bundles_post_ra>
// kernel: tpu_custom_call.1
= control target key start
LH: loop header
LB: loop body
LE: loop exit
PB: predicated region body
PF: predicated region fallthrough
CT: control target
= control target key end

     0   :  { %11 = vsyncpa [#allocation3], 0  ;;  %s4885_s0 = inlined_call_operand.vmem [shape: f32[128,128], index: 0, kind: input, shape index: {}]   ;;  %s4886_s1 = inlined_call_operand.vmem [shape: f32[1,128], index: 1, kind: input, shape index: {}]   ;;  %s4887_s2 = inlined_call_operand.vmem [shape: s32[128,1], index: 2, kind: input, shape index: {}]   ;;  %s4888_s3 = inlined_call_operand.hbm [shape: s32[1,128], index: 3, kind: input, shape index: {}]   ;;  %s4889_s4 = inlined_call_operand.hbm [shape: f32[1,1], index: 4, kind: output, shape index: {0}]   ;;  %s4890_s5 = inlined_call_operand.hbm [shape: f32[1,1], index: 5, kind: output, shape index: {1}]  }
   0x1   :  { %12 = vsyncpa [#allocation4], 0 }
   0x2   :  { %13 = vsyncpa [#allocation7], 0  ;;  %s25_s20 = sshll.u32 %s4888_s3, 4  ;;  %s2396_s21 = smov [#allocation2]   ;;  %s26_s20 = int_to_ptr.hbm [resolvable:$true] %s25_s20 }
   0x3   :  { %s27_s22 = sshll.u32 %s2396_s21, 4  ;;  %s28_s22 = int_to_ptr.vmem [resolvable:$true] %s27_s22 }
   0x4   :  { %30 = dma.hbm_to_vmem [thread:$0]  %s26_s20, 16, %s28_s22, [#allocation3]  }
   0x5   :  { %2390 = dma.done.wait [#allocation3], 16  }
   0x6   :  { %2391 = vsyncadd [#allocation3], 4294967280  ;;  %v2438_v0 = vld [vmem:[%s4885_s0 + $0x78] sm:$0xff]  ;;  %v2443_v1 = vld [vmem:[%s4885_s0 + $0x10] sm:$0xff]  ;;  %v2397_v28 = vmov 0   ;;  %vm4895_vm3 = vmmov 1  }
   0x7   :  { %69 = vmatpush.xpose.msra.mxu0 %v2438_v0  ;;  %2035 = vmatpush.xpose.msra.mxu1 %v2438_v0  ;;  %v136_v2 = vmul.f32 %v2443_v1, %v2443_v1  ;;  %v2454_v3 = vld [vmem:[%s4885_s0 + $0x70] sm:$0xff]  ;;  %v2459_v4 = vld [vmem:[%s4885_s0] sm:$0xff]  ;;  %v2471_v7 = vld [vmem:[%s4885_s0 + $0x18] sm:$0xff]  ;;  %v149_v32 = vmul.f32 %v2438_v0, %v2438_v0  ;;  %s2020_s11 = sshll.u32 %s4890_s5, 4  ;;  %s2401_s5 = smov [#allocation5]   ;;  %s2021_s11 = int_to_ptr.hbm [resolvable:$true] %s2020_s11 }
   0x8   :  { %2036 = vmatpush.xpose.msra.mxu2 %v2438_v0  ;;  %2037 = vmatpush.xpose.msra.mxu3 %v2438_v0  ;;  %v134_v5 = vmul.f32 %v2459_v4, %v2459_v4  ;;  %v2466_v6 = vld [vmem:[%s4885_s0 + $0x20] sm:$0xff]  ;;  %v2482_v9 = vld [vmem:[%s4885_s0 + $0x68] sm:$0xff]  ;;  %v137_v10 = vmul.f32 %v2471_v7, %v2471_v7  ;;  %v2512_v16 = vld [vmem:[%s4885_s0 + $0x38] sm:$0xff]  ;;  %v148_v31 = vmul.f32 %v2454_v3, %v2454_v3  ;;  %s2007_s12 = sshll.u32 %s2401_s5, 4  ;;  %s2009_s15 = sshll.u32 %s4889_s4, 4  ;;  %s2008_s12 = int_to_ptr.vmem [resolvable:$true] %s2007_s12  ;;  %s2010_s15 = int_to_ptr.hbm [resolvable:$true] %s2009_s15 }
   0x9   :  { %154 = vadd.xlane.f32.xlu1 %v136_v2  ;;  %v138_v8 = vmul.f32 %v2466_v6, %v2466_v6  ;;  %v2489_v11 = vld [vmem:[%s4885_s0 + $0x8] sm:$0xff]  ;;  %v2503_v13 = vld [vmem:[%s4885_s0 + $0x60] sm:$0xff]  ;;  %v2521_v17 = vld [vmem:[%s4885_s0 + $0x58] sm:$0xff]  ;;  %v141_v18 = vmul.f32 %v2512_v16, %v2512_v16  ;;  %2091 = vset.pattern.permute.xlu0 %v2397_v28  ;;  %v147_v29 = vmul.f32 %v2482_v9, %v2482_v9 }
   0xa   :  { %150 = vadd.xlane.f32.xlu0 %v134_v5  ;;  %v2494_v12 = vld [vmem:[%s4885_s0 + $0x28] sm:$0xff]  ;;  %v135_v14 = vmul.f32 %v2489_v11, %v2489_v11  ;;  %v2528_v19 = vld [vmem:[%s4885_s0 + $0x30] sm:$0xff]  ;;  %v2542_v21 = vld [vmem:[%s4885_s0 + $0x40] sm:$0xff]  ;;  %v145_v27 = vmul.f32 %v2521_v17, %v2521_v17  ;;  %2089 = vset.pattern.permute.xlu1 %v2397_v28  ;;  %v146_v30 = vmul.f32 %v2503_v13, %v2503_v13 }
   0xb   :  { %70 = vmatpush.xpose.msra.mxu0 %v2454_v3  ;;  %2038 = vmatpush.xpose.msra.mxu1 %v2454_v3  ;;  %v139_v15 = vmul.f32 %v2494_v12, %v2494_v12  ;;  %v2537_v20 = vld [vmem:[%s4885_s0 + $0x50] sm:$0xff]  ;;  %v140_v22 = vmul.f32 %v2528_v19, %v2528_v19  ;;  %v142_v23 = vmul.f32 %v2542_v21, %v2542_v21  ;;  %v2555_v24 = vld [vmem:[%s4885_s0 + $0x48] sm:$0xff]  ;;  %v443_v33 = vld [vmem:[%s4887_s2] sm:$0xff] }
   0xc   :  { %2039 = vmatpush.xpose.msra.mxu2 %v2454_v3  ;;  %2040 = vmatpush.xpose.msra.mxu3 %v2454_v3  ;;  %v144_v25 = vmul.f32 %v2537_v20, %v2537_v20  ;;  %v143_v26 = vmul.f32 %v2555_v24, %v2555_v24  ;;  %v444_v34 = vld [vmem:[%s4887_s2 + $0x8] sm:$0xff]  ;;  %v445_v35 = vld [vmem:[%s4887_s2 + $0x10] sm:$0xff]  ;;  %v447_v36 = vld [vmem:[%s4887_s2 + $0x20] sm:$0xff] }
   0xd   :  { %158 = vadd.xlane.f32.xlu2 %v138_v8  ;;  %v446_v37 = vld [vmem:[%s4887_s2 + $0x18] sm:$0xff]  ;;  %v452_v38 = vld [vmem:[%s4887_s2 + $0x48] sm:$0xff]  ;;  %v449_v39 = vld [vmem:[%s4887_s2 + $0x30] sm:$0xff] }
   0xe   :  { %2090 = vset.pattern.permute.xlu2 %v2397_v28  ;;  %v448_v40 = vld [vmem:[%s4887_s2 + $0x28] sm:$0xff]  ;;  %v455_v41 = vld [vmem:[%s4887_s2 + $0x60] sm:$0xff]  ;;  %v450_v43 = vld [vmem:[%s4887_s2 + $0x38] sm:$0xff] }
   0xf   :  { %71 = vmatpush.xpose.msra.mxu0 %v2482_v9  ;;  %2041 = vmatpush.xpose.msra.mxu1 %v2482_v9  ;;  %v451_v42 = vld [vmem:[%s4887_s2 + $0x40] sm:$0xff]  ;;  %v458_v44 = vld [vmem:[%s4887_s2 + $0x78] sm:$0xff]  ;;  %v453_v46 = vld [vmem:[%s4887_s2 + $0x50] sm:$0xff] }
  0x10   :  { %2042 = vmatpush.xpose.msra.mxu2 %v2482_v9  ;;  %2043 = vmatpush.xpose.msra.mxu3 %v2482_v9  ;;  %v454_v45 = vld [vmem:[%s4887_s2 + $0x58] sm:$0xff]  ;;  %v457_v47 = vld [vmem:[%s4887_s2 + $0x70] sm:$0xff]  ;;  %v456_v48 = vld [vmem:[%s4887_s2 + $0x68] sm:$0xff] }
  0x11   :  { %156 = vadd.xlane.f32.xlu1 %v137_v10  ;;  %v2680_v52 = vld [vmem:[%s4886_s1] ss:$0 sm:$0xff]  ;;  %s2400_s1 = smov [#allocation6]  }
  0x12   :  { %152 = vadd.xlane.f32.xlu0 %v135_v14  ;;  %s2018_s2 = sshll.u32 %s2400_s1, 4  ;;  %s2019_s2 = int_to_ptr.vmem [resolvable:$true] %s2018_s2 }
  0x13   :  { %72 = vmatpush.xpose.msra.mxu0 %v2503_v13  ;;  %2044 = vmatpush.xpose.msra.mxu1 %v2503_v13 }
  0x14   :  { %2045 = vmatpush.xpose.msra.mxu2 %v2503_v13  ;;  %2046 = vmatpush.xpose.msra.mxu3 %v2503_v13 }
  0x15   :  { %160 = vadd.xlane.f32.xlu2 %v139_v15 }
  0x17   :  { %73 = vmatpush.xpose.msra.mxu0 %v2521_v17  ;;  %2047 = vmatpush.xpose.msra.mxu1 %v2521_v17 }
  0x18   :  { %2048 = vmatpush.xpose.msra.mxu2 %v2521_v17  ;;  %2049 = vmatpush.xpose.msra.mxu3 %v2521_v17 }
  0x19   :  { %164 = vadd.xlane.f32.xlu1 %v141_v18 }
  0x1a   :  { %162 = vadd.xlane.f32.xlu0 %v140_v22 }
  0x1b   :  { %74 = vmatpush.xpose.msra.mxu0 %v2537_v20  ;;  %2050 = vmatpush.xpose.msra.mxu1 %v2537_v20 }
  0x1c   :  { %2051 = vmatpush.xpose.msra.mxu2 %v2537_v20  ;;  %2052 = vmatpush.xpose.msra.mxu3 %v2537_v20 }
  0x1d   :  { %166 = vadd.xlane.f32.xlu2 %v142_v23 }
  0x1f   :  { %75 = vmatpush.xpose.msra.mxu0 %v2555_v24  ;;  %2053 = vmatpush.xpose.msra.mxu1 %v2555_v24 }
  0x20   :  { %2054 = vmatpush.xpose.msra.mxu2 %v2555_v24  ;;  %2055 = vmatpush.xpose.msra.mxu3 %v2555_v24 }
  0x21   :  { %170 = vadd.xlane.f32.xlu1 %v144_v25 }
  0x22   :  { %168 = vadd.xlane.f32.xlu0 %v143_v26 }
  0x23   :  { %76 = vmatpush.xpose.msra.mxu0 %v2542_v21  ;;  %2056 = vmatpush.xpose.msra.mxu1 %v2542_v21 }
  0x24   :  { %2057 = vmatpush.xpose.msra.mxu2 %v2542_v21  ;;  %2058 = vmatpush.xpose.msra.mxu3 %v2542_v21 }
  0x25   :  { %172 = vadd.xlane.f32.xlu2 %v145_v27 }
  0x27   :  { %77 = vmatpush.xpose.msra.mxu0 %v2512_v16  ;;  %2059 = vmatpush.xpose.msra.mxu1 %v2512_v16 }
  0x28   :  { %2060 = vmatpush.xpose.msra.mxu2 %v2512_v16  ;;  %2061 = vmatpush.xpose.msra.mxu3 %v2512_v16 }
  0x29   :  { %176 = vadd.xlane.f32.xlu1 %v147_v29 }
  0x2a   :  { %174 = vadd.xlane.f32.xlu0 %v146_v30 }
  0x2b   :  { %78 = vmatpush.xpose.msra.mxu0 %v2528_v19  ;;  %2062 = vmatpush.xpose.msra.mxu1 %v2528_v19 }
  0x2c   :  { %2063 = vmatpush.xpose.msra.mxu2 %v2528_v19  ;;  %2064 = vmatpush.xpose.msra.mxu3 %v2528_v19 }
  0x2d   :  { %178 = vadd.xlane.f32.xlu2 %v148_v31 }
  0x2f   :  { %79 = vmatpush.xpose.msra.mxu0 %v2494_v12  ;;  %2065 = vmatpush.xpose.msra.mxu1 %v2494_v12 }
  0x30   :  { %2066 = vmatpush.xpose.msra.mxu2 %v2494_v12  ;;  %2067 = vmatpush.xpose.msra.mxu3 %v2494_v12 }
  0x32   :  { %180 = vadd.xlane.f32.xlu0 %v149_v32 }
  0x33   :  { %80 = vmatpush.xpose.msra.mxu0 %v2466_v6  ;;  %2068 = vmatpush.xpose.msra.mxu1 %v2466_v6 }
  0x34   :  { %2069 = vmatpush.xpose.msra.mxu2 %v2466_v6  ;;  %2070 = vmatpush.xpose.msra.mxu3 %v2466_v6 }
  0x37   :  { %81 = vmatpush.xpose.msra.mxu0 %v2471_v7  ;;  %2071 = vmatpush.xpose.msra.mxu1 %v2471_v7 }
  0x38   :  { %2072 = vmatpush.xpose.msra.mxu2 %v2471_v7  ;;  %2073 = vmatpush.xpose.msra.mxu3 %v2471_v7 }
  0x3b   :  { %82 = vmatpush.xpose.msra.mxu0 %v2443_v1  ;;  %2074 = vmatpush.xpose.msra.mxu1 %v2443_v1 }
  0x3c   :  { %2075 = vmatpush.xpose.msra.mxu2 %v2443_v1  ;;  %2076 = vmatpush.xpose.msra.mxu3 %v2443_v1 }
  0x3f   :  { %83 = vmatpush.xpose.msra.mxu0 %v2489_v11  ;;  %2077 = vmatpush.xpose.msra.mxu1 %v2489_v11 }
  0x40   :  { %2078 = vmatpush.xpose.msra.mxu2 %v2489_v11  ;;  %2079 = vmatpush.xpose.msra.mxu3 %v2489_v11 }
  0x42   :  { %464 = vperm.xlu1 %2089, %v443_v33  }
  0x43   :  { %84 = vmatpush.xpose.msra.mxu0 %v2459_v4  ;;  %2080 = vmatpush.xpose.msra.mxu1 %v2459_v4 }
  0x44   :  { %2081 = vmatpush.xpose.msra.mxu2 %v2459_v4  ;;  %2082 = vmatpush.xpose.msra.mxu3 %v2459_v4 }
  0x45   :  { %467 = vperm.xlu2 %2090, %v444_v34  }
  0x46   :  { %85 = vmatmul.f32.vlgmr.msra.gmra.mxu0 %v2459_v4  ;;  %97 = vmatmul.f32.vlgmr.msra.gmra.mxu1 %v2466_v6  ;;  %v2704_v6 = vld [vmem:[#allocation2] ss:$0 sm:$0xff] }
  0x47   :  { %109 = vmatmul.f32.vlgmr.msra.gmra.mxu2 %v2542_v21  ;;  %121 = vmatmul.f32.vlgmr.msra.gmra.mxu3 %v2503_v13 }
  0x48   :  { %470 = vperm.xlu0 %2091, %v445_v35  }
  0x4a   :  { %476 = vperm.xlu1 %2089, %v447_v36  }
  0x4d   :  { %473 = vperm.xlu2 %2090, %v446_v37  }
  0x4e   :  { %88 = vmatmul.f32.gmra.mxu0 %v2489_v11  ;;  %100 = vmatmul.f32.gmra.mxu1 %v2494_v12 }
  0x4f   :  { %112 = vmatmul.f32.gmra.mxu2 %v2555_v24  ;;  %124 = vmatmul.f32.gmra.mxu3 %v2482_v9 }
  0x50   :  { %491 = vperm.xlu0 %2091, %v452_v38  }
  0x52   :  { %482 = vperm.xlu1 %2089, %v449_v39  }
  0x55   :  { %479 = vperm.xlu2 %2090, %v448_v40  }
  0x56   :  { %91 = vmatmul.f32.gmra.mxu0 %v2443_v1  ;;  %103 = vmatmul.f32.gmra.mxu1 %v2528_v19 }
  0x57   :  { %115 = vmatmul.f32.gmra.mxu2 %v2537_v20  ;;  %127 = vmatmul.f32.gmra.mxu3 %v2454_v3  ;;  %v460_v3 = vlaneseq }
  0x58   :  { %500 = vperm.xlu0 %2091, %v455_v41  }
  0x59   :  { %v2702_v5 = vand.u32 127, %v460_v3 }
  0x5a   :  { %488 = vperm.xlu1 %2089, %v451_v42  }
  0x5b   :  { %vm4892_vm0 = vcmp.lt.s32.totalorder %v2702_v5, 8 }
  0x5d   :  { %485 = vperm.xlu2 %2090, %v450_v43  }
  0x5e   :  { %94 = vmatmul.f32.gmra.mxu0 %v2471_v7  ;;  %106 = vmatmul.f32.gmra.mxu1 %v2512_v16 }
  0x5f   :  { %118 = vmatmul.f32.gmra.mxu2 %v2521_v17  ;;  %130 = vmatmul.f32.gmra.mxu3 %v2438_v0 }
  0x60   :  { %509 = vperm.xlu0 %2091, %v458_v44  }
  0x62   :  { %497 = vperm.xlu1 %2089, %v454_v45  }
  0x65   :  { %494 = vperm.xlu2 %2090, %v453_v46  }
  0x6a   :  { %506 = vperm.xlu1 %2089, %v457_v47  }
  0x6d   :  { %503 = vperm.xlu2 %2090, %v456_v48  }
  0x7c   :  { %v2675_v49 = vpop.xlane.xlu1 %154 }
  0x7d   :  { %v151_v51 = vpop.xlane.xlu0 %150 }
  0x7e   :  { %v186_v19 = vadd.f32 %v2680_v52, %v151_v51 }
  0x80   :  { %v159_v50 = vpop.xlane.xlu2 %158 }
  0x81   :  { %v190_v18 = vadd.f32 %v2680_v52, %v159_v50 }
  0x84   :  { %v157_v53 = vpop.xlane.xlu1 %156 }
  0x85   :  { %v2683_v54 = vadd.f32 %v2680_v52, %v157_v53  ;;  %v153_v56 = vpop.xlane.xlu0 %152 }
  0x86   :  { %v187_v35 = vadd.f32 %v2680_v52, %v153_v56 }
  0x88   :  { %v161_v55 = vpop.xlane.xlu2 %160 }
  0x89   :  { %v191_v42 = vadd.f32 %v2680_v52, %v161_v55 }
  0x8c   :  { %v2687_v59 = vpop.xlane.xlu1 %164 }
  0x8d   :  { %v2685_v58 = vpop.xlane.xlu0 %162  ;;  %v2781_v3 = vadd.f32 %v2680_v52, %v2687_v59 }
  0x90   :  { %v167_v57 = vpop.xlane.xlu2 %166 }
  0x91   :  { %v194_v31 = vadd.f32 %v2680_v52, %v167_v57  ;;  %v2777_v57 = vadd.f32 %v2680_v52, %v2675_v49 }
  0x94   :  { %v2694_v63 = vpop.xlane.xlu1 %170 }
  0x95   :  { %v2692_v62 = vpop.xlane.xlu0 %168  ;;  %v2800_v59 = vadd.f32 %v2680_v52, %v2694_v63 }
  0x98   :  { %v173_v60 = vpop.xlane.xlu2 %172 }
  0x99   :  { %v2690_v61 = vadd.f32 %v2680_v52, %v173_v60 }
  0x9c   :  { %v2700_v4 = vpop.xlane.xlu1 %176 }
  0x9d   :  { %v175_v1 = vpop.xlane.xlu0 %174 }
  0x9e   :  { %v198_v48 = vadd.f32 %v2680_v52, %v175_v1 }
  0xa0   :  { %v2696_v0 = vpop.xlane.xlu2 %178 }
  0xa1   :  { %v2820_v63 = vadd.f32 %v2680_v52, %v2696_v0 }
  0xa5   :  { %v2708_v8 = vpop.xlane.xlu0 %180 }
  0xa8   :  { %v2698_v2 = vpop.permute.xlu2 %467 }
  0xb0   :  { %v474_v7 = vpop.permute.xlu2 %473 }
  0xb1   :  { %vm515_vm1 = vcmp.eq.s32.totalorder %v474_v7, %v2704_v6  ;;  %v2785_v7 = vadd.f32 %v2680_v52, %v2685_v58  ;;  %v2804_v58 = vadd.f32 %v2680_v52, %v2692_v62 }
  0xb2   :  { %vm2712_vm2 = vmand %vm515_vm1, %vm4892_vm0 }
  0xb3   :  { %vm549_vm4 = vmxor %vm515_vm1, %vm4895_vm3 }
  0xb4   :  { %v2717_v10 = vpop.permute.xlu1 %464  ;;  %vm2721_vm5 = vmand %vm549_vm4, %vm4892_vm0  ;;  %vm4980_vm4 = vcmp.lt.s32.totalorder %v2702_v5, 8 }
  0xb5   :  { %vm512_vm9 = vcmp.eq.s32.totalorder %v2717_v10, %v2704_v6  ;;  %v4965_v10 = vmov 0 }
  0xb6   :  { %vm2791_vm10 = vmxor %vm512_vm9, %vm4895_vm3 }
  0xb8   :  { %v2725_v12 = vpop.permute.xlu2 %479 }
  0xba   :  { %v2727_v13 = vpop.permute.xlu0 %470 }
  0xbc   :  { %v2729_v14 = vpop.permute.xlu1 %476 }
  0xc0   :  { %v2731_v15 = vpop.permute.xlu2 %485 }
  0xc1   :  { %vm4891_vm6 = vcmp.eq.s32.totalorder %v2731_v15, %v2704_v6 }
  0xc2   :  { %vm553_vm7 = vmxor %vm4891_vm6, %vm4895_vm3  ;;  %v2743_v23 = vpop.permute.xlu0 %491 }
  0xc3   :  { %v86_v16 = vpop.f32.mrf.mxu0  ;;  %v98_v17 = vpop.f32.mrf.mxu1  ;;  %vm2747_vm8 = vmand %vm553_vm7, %vm4892_vm0 }
  0xc4   :  { %v202_v20 = vmul.f32 2.0, %v86_v16  ;;  %v206_v21 = vmul.f32 2.0, %v98_v17  ;;  %v2737_v22 = vpop.permute.xlu1 %482  ;;  %vm2842_vm7 = vmand %vm512_vm9, %vm4892_vm0 }
  0xc6   :  { %v218_v25 = vsub.f32 %v186_v19, %v202_v20  ;;  %v222_v26 = vsub.f32 %v190_v18, %v206_v21  ;;  %v4957_v18 = vmov 0 }
  0xc8   :  { %v2751_v27 = vmax.f32 %v218_v25, 1e-12  ;;  %v2753_v28 = vmax.f32 %v222_v26, 1e-12  ;;  %v2816_v25 = vadd.f32 %v2680_v52, %v2700_v4  ;;  %v4960_v4 = vmov 0 }
  0xca   :  { %v110_v29 = vpop.f32.mrf.mxu2  ;;  %v122_v30 = vpop.f32.mrf.mxu3  ;;  %2094 = vrsqrt.f32 %v2753_v28  ;;  %vm4975_vm9 = vcmp.eq.f32.partialorder %v2753_v28, inf }
  0xcb   :  { %v210_v32 = vmul.f32 2.0, %v110_v29  ;;  %v89_v33 = vpop.f32.mrf.mxu0  ;;  %v101_v34 = vpop.f32.mrf.mxu1  ;;  %2096 = vrsqrt.f32 %v2751_v27  ;;  %v214_v44 = vmul.f32 2.0, %v122_v30 }
  0xcc   :  { %v203_v36 = vmul.f32 2.0, %v89_v33  ;;  %v2759_v37 = vpop.permute.xlu1 %488  ;;  %v2761_v38 = vpop.permute.xlu0 %500  ;;  %v207_v40 = vmul.f32 2.0, %v101_v34 }
  0xcd   :  { %v226_v39 = vsub.f32 %v194_v31, %v210_v32  ;;  %v230_v55 = vsub.f32 %v198_v48, %v214_v44  ;;  %v4963_v32 = vmov 0 }
  0xce   :  { %v219_v41 = vsub.f32 %v187_v35, %v203_v36  ;;  %v223_v50 = vsub.f32 %v191_v42, %v207_v40  ;;  %v4964_v32 = vsel %vm2842_vm7, 4294967295, %v4963_v32  ;;  %v308_v40 = vand.u32 2147483648, %v2753_v28 }
  0xcf   :  { %v2764_v43 = vmax.f32 %v226_v39, 1e-12  ;;  %v2824_v62 = vmax.f32 %v230_v55, 1e-12 }
  0xd0   :  { %v2095_v45 = vpop.eup %2094  ;;  %v2766_v46 = vmax.f32 %v219_v41, 1e-12  ;;  %v2795_v49 = vmax.f32 %v223_v50, 1e-12 }
  0xd1   :  { %v2097_v47 = vpop.eup %2096  ;;  %v299_v51 = vmul.f32 %v2095_v45, %v2753_v28  ;;  %2098 = vrsqrt.f32 %v2764_v43 }
  0xd2   :  { %v251_v53 = vmul.f32 %v2097_v47, %v2751_v27  ;;  %2100 = vrsqrt.f32 %v2766_v46  ;;  %v113_v26 = vpop.f32.mrf.mxu2  ;;  %v125_v30 = vpop.f32.mrf.mxu3 }
  0xd3   :  { %v300_v56 = vmul.f32 %v2095_v45, %v299_v51  ;;  %v92_v33 = vpop.f32.mrf.mxu0  ;;  %2102 = vrsqrt.f32 %v2795_v49  ;;  %v104_v36 = vpop.f32.mrf.mxu1  ;;  %v211_v42 = vmul.f32 2.0, %v113_v26  ;;  %v215_v44 = vmul.f32 2.0, %v125_v30 }
  0xd4   :  { %v498_v60 = vpop.permute.xlu1 %497  ;;  %v252_v1 = vmul.f32 %v2097_v47, %v251_v53  ;;  %v510_v17 = vpop.permute.xlu0 %509  ;;  %2104 = vrsqrt.f32 %v2824_v62  ;;  %v260_v53 = vand.u32 2147483648, %v2751_v27  ;;  %v204_v55 = vmul.f32 2.0, %v92_v33 }
  0xd5   :  { %vm523_vm11 = vcmp.eq.s32.totalorder %v498_v60, %v2704_v6  ;;  %v301_v19 = vmul.f32 0.5, %v300_v56  ;;  %vm527_vm1 = vcmp.eq.s32.totalorder %v510_v17, %v2704_v6  ;;  %v4969_v56 = vmov 0 }
  0xd6   :  { %vm2808_vm12 = vmand %vm523_vm11, %vm4892_vm0  ;;  %v253_v20 = vmul.f32 0.5, %v252_v1  ;;  %v208_v17 = vmul.f32 2.0, %v104_v36  ;;  %v227_v30 = vsub.f32 %v2804_v58, %v211_v42 }
  0xd7   :  { %v4958_v18 = vsel %vm2808_vm12, 4294967295, %v4957_v18  ;;  %v2812_v21 = vpop.eup %2098  ;;  %vm557_vm14 = vmxor %vm523_vm11, %vm4895_vm3  ;;  %v302_v0 = vsub.f32 1.5, %v301_v19 }
  0xd8   :  { %4959 = vst [vmem:[#allocation11_spill] sm:$0xff] %v4958_v18  ;;  %v2827_v29 = vpop.eup %2100  ;;  %vm2831_vm15 = vmand %vm557_vm14, %vm4892_vm0  ;;  %v254_v31 = vsub.f32 1.5, %v253_v20  ;;  %v347_v34 = vmul.f32 %v2812_v21, %v2764_v43 }
  0xd9   :  { %v4961_v4 = vsel %vm2831_vm15, 4294967295, %v4960_v4  ;;  %v263_v35 = vmul.f32 %v2827_v29, %v2766_v46  ;;  %vm2856_vm14 = vmand %vm2791_vm10, %vm4892_vm0  ;;  %v303_v39 = vmul.f32 %v2095_v45, %v302_v0  ;;  %v2908_v26 = vpop.eup %2102  ;;  %v231_v0 = vsub.f32 %v2816_v25, %v215_v44 }
  0xda   :  { %4962 = vst [vmem:[#allocation12_spill] sm:$0xff] %v4961_v4  ;;  %v4966_v10 = vsel %vm2856_vm14, 4294967295, %v4965_v10  ;;  %v255_v41 = vmul.f32 %v2097_v47, %v254_v31  ;;  %vm2866_vm6 = vmand %vm527_vm1, %vm4892_vm0  ;;  %v348_v50 = vmul.f32 %v2812_v21, %v347_v34  ;;  %v2938_v34 = vpop.eup %2104  ;;  %v116_v36 = vpop.f32.mrf.mxu2 }
  0xdb   :  { %vm561_vm10 = vmxor %vm527_vm1, %vm4895_vm3  ;;  %v304_v47 = vmul.f32 %v303_v39, %v2753_v28  ;;  %v264_v1 = vmul.f32 %v2827_v29, %v263_v35  ;;  %vm4972_vm1 = vcmp.eq.s32.totalorder %v2729_v14, %v2704_v6  ;;  %v220_v35 = vsub.f32 %v2777_v57, %v204_v55  ;;  %v128_v42 = vpop.f32.mrf.mxu3  ;;  %v95_v55 = vpop.f32.mrf.mxu0 }
  0xdc   :  { %v2872_v45 = vpop.permute.xlu1 %506  ;;  %v256_v51 = vmul.f32 %v255_v41, %v2751_v27  ;;  %vm2887_vm13 = vmand %vm561_vm10, %vm4892_vm0  ;;  %v349_v60 = vmul.f32 0.5, %v348_v50  ;;  %vm4976_vm10 = vcmp.eq.f32.partialorder %v2751_v27, inf  ;;  %v311_v57 = vmul.f32 %v2908_v26, %v2795_v49 }
  0xdd   :  { %v4970_v56 = vsel %vm2887_vm13, 4294967295, %v4969_v56  ;;  %vm2897_vm11 = vmand %vm4972_vm1, %vm4892_vm0  ;;  %v306_v19 = vsel %vm4975_vm9, %v2753_v28, %v304_v47  ;;  %vm4977_vm1 = vcmp.eq.s32.totalorder %v2872_v45, %v2704_v6  ;;  %vm4978_vm13 = vcmp.eq.f32.partialorder %v2753_v28, 0.0 }
  0xde   :  { %4971 = vst [vmem:[#allocation13_spill] sm:$0xff] %v4970_v56  ;;  %v258_v20 = vsel %vm4976_vm10, %v2751_v27, %v256_v51  ;;  %vm560_vm0 = vmxor %vm4977_vm1, %vm4895_vm3  ;;  %v309_v31 = vsel %vm4978_vm13, %v308_v40, %v306_v19  ;;  %vm4979_vm9 = vcmp.eq.f32.partialorder %v2751_v27, 0.0  ;;  %vm355_vm13 = vcmp.eq.f32.partialorder %v2764_v43, 0.0 }
  0xdf   :  { %v261_v33 = vsel %vm4979_vm9, %v260_v53, %v258_v20  ;;  %vm2924_vm12 = vmand %vm560_vm0, %vm4980_vm4  ;;  %v2930_v25 = vsel %vm2897_vm11, %v309_v31, 0.0  ;;  %v356_v27 = vand.u32 2147483648, %v2764_v43  ;;  %v350_v40 = vsub.f32 1.5, %v349_v60 }
  0xe0   :  { %v2934_v28 = vsel %vm2842_vm7, %v261_v33, 0.0  ;;  %602 = vmax.xlane.f32.xlu1 %v2930_v25  ;;  %v2945_v39 = vsel %vm2856_vm14, %v261_v33, 0.0  ;;  %v265_v41 = vmul.f32 0.5, %v264_v1  ;;  %vm269_vm0 = vcmp.eq.f32.partialorder %v2766_v46, inf  ;;  %v107_v1 = vpop.f32.mrf.mxu1 }
  0xe1   :  { %594 = vmax.xlane.f32.xlu2 %v2934_v28  ;;  %v4906_v44 = vsub.f32 0.0, %v2945_v39  ;;  %vm4983_vm1 = vcmp.eq.s32.totalorder %v2729_v14, %v2704_v6  ;;  %v2960_v47 = vmax.f32 %v227_v30, 1e-12  ;;  %v2962_v51 = vmax.f32 %v231_v0, 1e-12 }
  0xe2   :  { %vm2956_vm9 = vmxor %vm4983_vm1, %vm4895_vm3  ;;  %v224_v53 = vsub.f32 %v2785_v7, %v208_v17  ;;  %v351_v60 = vmul.f32 %v2812_v21, %v350_v40  ;;  %v266_v19 = vsub.f32 1.5, %v265_v41  ;;  %v272_v14 = vand.u32 2147483648, %v2766_v46 }
  0xe3   :  { %1058 = vmax.xlane.f32.xlu0 %v4906_v44  ;;  %v312_v20 = vmul.f32 %v2908_v26, %v311_v57  ;;  %v395_v30 = vmul.f32 %v2938_v34, %v2824_v62  ;;  %v2974_v0 = vmax.f32 %v220_v35, 1e-12  ;;  %v212_v7 = vmul.f32 2.0, %v116_v36  ;;  %vm4986_vm3 = vmmov %vm4980_vm4 }
  0xe4   :  { %v216_v17 = vmul.f32 2.0, %v128_v42  ;;  %v352_v21 = vmul.f32 %v351_v60, %v2764_v43  ;;  %vm2981_vm4 = vmand %vm2956_vm9, %vm4986_vm3  ;;  %v4987_v33 = vmov 0  ;;  %v205_v40 = vmul.f32 2.0, %v95_v55 }
  0xe5   :  { %v4988_v33 = vsel %vm2981_vm4, 4294967295, %v4987_v33  ;;  %v267_v41 = vmul.f32 %v2827_v29, %v266_v19  ;;  %v313_v35 = vmul.f32 0.5, %v312_v20  ;;  %v396_v36 = vmul.f32 %v2938_v34, %v395_v30 }
  0xe6   :  { %v209_v42 = vmul.f32 2.0, %v107_v1  ;;  %vm4989_vm1 = vcmp.eq.f32.partialorder %v2764_v43, inf  ;;  %v2994_v50 = vsel %vm2981_vm4, %v309_v31, 0.0  ;;  %2106 = vrsqrt.f32 %v2960_v47 }
  0xe7   :  { %v354_v57 = vsel %vm4989_vm1, %v2764_v43, %v352_v21  ;;  %vm4990_vm9 = vcmp.eq.s32.totalorder %v2759_v37, %v2704_v6  ;;  %v4991_v29 = vmov 0  ;;  %v268_v60 = vmul.f32 %v267_v41, %v2766_v46  ;;  %vm4994_vm1 = vmmov %vm4986_vm3 }
  0xe8   :  { %vm3002_vm10 = vmand %vm4990_vm9, %vm4986_vm3  ;;  %v357_v55 = vsel %vm355_vm13, %v356_v27, %v354_v57  ;;  %v314_v1 = vsub.f32 1.5, %v313_v35  ;;  %v397_v19 = vmul.f32 0.5, %v396_v36  ;;  %v3009_v31 = vmax.f32 %v224_v53, 1e-12 }
  0xe9   :  { %v4992_v29 = vsel %vm3002_vm10, 4294967295, %v4991_v29  ;;  %v228_v20 = vsub.f32 %v2800_v59, %v212_v7  ;;  %v232_v30 = vsub.f32 %v2820_v63, %v216_v17  ;;  %v3015_v21 = vsel %vm3002_vm10, %v357_v55, 0.0  ;;  %v3033_v63 = vpop.permute.xlu2 %494  ;;  %v119_v17 = vpop.f32.mrf.mxu2 }
  0xea   :  { %4993 = vst [vmem:[#allocation14_spill] sm:$0xff] %v4992_v29  ;;  %610 = vmax.xlane.f32.xlu2 %v3015_v21  ;;  %v270_v43 = vsel %vm269_vm0, %v2766_v46, %v268_v60  ;;  %v4903_v27 = vsub.f32 0.0, %v2994_v50  ;;  %v315_v41 = vmul.f32 %v2908_v26, %v314_v1  ;;  %vm4995_vm3 = vcmp.eq.s32.totalorder %v2698_v2, %v2704_v6 }
  0xeb   :  { %vm3029_vm9 = vmand %vm4995_vm3, %vm4994_vm1  ;;  %v4996_v59 = vmov 0  ;;  %v221_v53 = vsub.f32 %v2683_v54, %v205_v40  ;;  %v225_v7 = vsub.f32 %v2781_v3, %v209_v42  ;;  %vm4999_vm0 = vcmp.eq.f32.partialorder %v2766_v46, 0.0 }
  0xec   :  { %v4997_v59 = vsel %vm3029_vm9, 4294967295, %v4996_v59  ;;  %v3039_v26 = vsel %vm4999_vm0, %v272_v14, %v270_v43  ;;  %v398_v35 = vsub.f32 1.5, %v397_v19  ;;  %vm5000_vm13 = vmmov 1   ;;  %1066 = vmax.xlane.f32.xlu0 %v4903_v27  ;;  %v2107_v3 = vpop.eup %2106 }
  0xed   :  { %4998 = vst [vmem:[#allocation15_spill] sm:$0xff] %v4997_v59  ;;  %vm5001_vm10 = vcmp.eq.s32.totalorder %v2759_v37, %v2704_v6  ;;  %v3052_v54 = vsel %vm3029_vm9, %v3039_v26, 0.0  ;;  %v316_v46 = vmul.f32 %v315_v41, %v2795_v49  ;;  %2108 = vrsqrt.f32 %v2962_v51 }
  0xee   :  { %vm3045_vm1 = vmxor %vm5001_vm10, %vm5000_vm13  ;;  %5004 = vst [vmem:[#allocation16_spill] sm:$0xff] %v3052_v54  ;;  %v3059_v37 = vmax.f32 %v228_v20, 1e-12  ;;  %v3061_v14 = vmax.f32 %v232_v30, 1e-12  ;;  %596 = vmax.xlane.f32.xlu1 %v3052_v54  ;;  %v320_v40 = vand.u32 2147483648, %v2795_v49  ;;  %v399_v42 = vmul.f32 %v2938_v34, %v398_v35  ;;  %v131_v30 = vpop.f32.mrf.mxu3 }
  0xef   :  { %v213_v57 = vmul.f32 2.0, %v119_v17  ;;  %vm5005_vm10 = vcmp.eq.f32.partialorder %v2795_v49, inf  ;;  %v359_v1 = vmul.f32 %v2107_v3, %v2960_v47  ;;  %2110 = vrsqrt.f32 %v2974_v0 }
  0xf0   :  { %v318_v60 = vsel %vm5005_vm10, %v2795_v49, %v316_v46  ;;  %vm5006_vm0 = vcmp.lt.s32.totalorder %v2702_v5, 8  ;;  %v5007_v19 = vmov 0  ;;  %v3079_v20 = vmax.f32 %v221_v53, 1e-12 }
  0xf1   :  { %vm3075_vm3 = vmand %vm3045_vm1, %vm5006_vm0  ;;  %v3081_v34 = vmax.f32 %v225_v7, 1e-12  ;;  %vm5010_vm9 = vcmp.eq.f32.partialorder %v2795_v49, 0.0  ;;  %v400_v41 = vmul.f32 %v399_v42, %v2824_v62  ;;  %vm5012_vm4 = vcmp.eq.s32.totalorder %v2725_v12, %v2704_v6 }
  0xf2   :  { %v5008_v19 = vsel %vm3075_vm3, 4294967295, %v5007_v19  ;;  %v321_v43 = vsel %vm5010_vm9, %v320_v40, %v318_v60  ;;  %vm5011_vm10 = vmmov %vm5006_vm0  ;;  %v5013_v17 = vmov 0  ;;  %v3097_v53 = vsel %vm3075_vm3, %v357_v55, 0.0 }
  0xf3   :  { %5009 = vst [vmem:[#allocation17_spill] sm:$0xff] %v5008_v19  ;;  %vm3091_vm14 = vmand %vm5012_vm4, %vm5011_vm10  ;;  %vm401_vm1 = vcmp.eq.f32.partialorder %v2824_v62, inf  ;;  %v404_v49 = vand.u32 2147483648, %v2824_v62  ;;  %v360_v7 = vmul.f32 %v2107_v3, %v359_v1  ;;  %vm5016_vm9 = vcmp.eq.s32.totalorder %v2761_v38, %v2704_v6  ;;  %v2109_v46 = vpop.eup %2108 }
  0xf4   :  { %v5014_v17 = vsel %vm3091_vm14, 4294967295, %v5013_v17  ;;  %vm3105_vm0 = vmxor %vm5016_vm9, %vm5000_vm13  ;;  %v3111_v36 = vsel %vm3091_vm14, %v321_v43, 0.0  ;;  %v402_v55 = vsel %vm401_vm1, %v2824_v62, %v400_v41  ;;  %vm403_vm4 = vcmp.eq.f32.partialorder %v2824_v62, 0.0 }
  0xf5   :  { %5015 = vst [vmem:[#allocation18_spill] sm:$0xff] %v5014_v17  ;;  %2112 = vrsqrt.f32 %v3009_v31  ;;  %vm5019_vm3 = vmmov %vm5016_vm9  ;;  %v5020_v40 = vmov 0  ;;  %v229_v42 = vsub.f32 %v2690_v61, %v213_v57  ;;  %v217_v60 = vmul.f32 2.0, %v131_v30  ;;  %604 = vmax.xlane.f32.xlu2 %v3111_v36  ;;  %v2111_v57 = vpop.eup %2110 }
  0xf6   :  { %vm3121_vm9 = vmand %vm5019_vm3, %vm5011_vm10  ;;  %v405_v1 = vsel %vm403_vm4, %v404_v49, %v402_v55  ;;  %v361_v41 = vmul.f32 0.5, %v360_v7  ;;  %vm5022_vm1 = vcmp.eq.s32.totalorder %v2725_v12, %v2704_v6  ;;  %v4905_v38 = vsub.f32 0.0, %v3097_v53  ;;  %v3156_v7 = vpop.permute.xlu2 %503 }
  0xf7   :  { %v5021_v40 = vsel %vm3121_vm9, 4294967295, %v5020_v40  ;;  %vm3131_vm14 = vmxor %vm5022_vm1, %vm5000_vm13  ;;  %v3138_v27 = vsel %vm3121_vm9, %v405_v1, 0.0  ;;  %v407_v61 = vmul.f32 %v2109_v46, %v2962_v51  ;;  %2114 = vrsqrt.f32 %v3059_v37 }
  0xf8   :  { %5025 = vst [vmem:[#allocation19_spill] sm:$0xff] %v3138_v27  ;;  %v201_v30 = vadd.f32 %v2680_v52, %v2708_v8  ;;  %vm5026_vm3 = vmmov %vm5011_vm10  ;;  %v5027_v12 = vmov 0  ;;  %2116 = vrsqrt.f32 %v3081_v34  ;;  %618 = vmax.xlane.f32.xlu0 %v3138_v27  ;;  %v362_v49 = vsub.f32 1.5, %v361_v41  ;;  %1074 = vmax.xlane.f32.xlu1 %v4905_v38 }
  0xf9   :  { %vm3148_vm4 = vmand %vm3105_vm0, %vm5026_vm3  ;;  %v408_v8 = vmul.f32 %v2109_v46, %v407_v61  ;;  %v275_v35 = vmul.f32 %v2111_v57, %v2974_v0  ;;  %2118 = vrsqrt.f32 %v3061_v14  ;;  %vm5030_vm0 = vcmp.eq.s32.totalorder %v2698_v2, %v2704_v6 }
  0xfa   :  { %v5028_v12 = vsel %vm3148_vm4, 4294967295, %v5027_v12  ;;  %v3162_v52 = vsel %vm3148_vm4, %v405_v1, 0.0  ;;  %vm3170_vm1 = vmxor %vm5030_vm0, %vm5000_vm13  ;;  %2120 = vrsqrt.f32 %v3079_v20  ;;  %v233_v1 = vsub.f32 %v201_v30, %v217_v60 }
  0xfb   :  { %5029 = vst [vmem:[#allocation20_spill] sm:$0xff] %v5028_v12  ;;  %v363_v41 = vmul.f32 %v2107_v3, %v362_v49  ;;  %v2113_v61 = vpop.eup %2112  ;;  %vm5033_vm10 = vmmov %vm5026_vm3  ;;  %v5034_v38 = vmov 0  ;;  %v3185_v2 = vmax.f32 %v229_v42, 1e-12  ;;  %vm365_vm0 = vcmp.eq.f32.partialorder %v2960_v47, inf }
  0xfc   :  { %vm3181_vm4 = vmand %vm3131_vm14, %vm5033_vm10  ;;  %v409_v44 = vmul.f32 0.5, %v408_v8  ;;  %v276_v59 = vmul.f32 %v2111_v57, %v275_v35  ;;  %v323_v30 = vmul.f32 %v2113_v61, %v3009_v31  ;;  %v5038_v42 = vmov 0 }
  0xfd   :  { %v5035_v38 = vsel %vm3181_vm4, 4294967295, %v5034_v38  ;;  %v3193_v60 = vsel %vm3181_vm4, %v321_v43, 0.0  ;;  %v364_v62 = vmul.f32 %v363_v41, %v2960_v47  ;;  %v3197_v49 = vpop.eup %2114  ;;  %vm5037_vm14 = vmmov %vm5026_vm3  ;;  %vm367_vm3 = vcmp.eq.f32.partialorder %v2960_v47, 0.0 }
  0xfe   :  { %5036 = vst [vmem:[#allocation21_spill] sm:$0xff] %v5035_v38  ;;  %vm3203_vm10 = vmand %vm3170_vm1, %vm5037_vm14  ;;  %v368_v8 = vand.u32 2147483648, %v2960_v47  ;;  %v410_v43 = vsub.f32 1.5, %v409_v44  ;;  %v277_v35 = vmul.f32 0.5, %v276_v59  ;;  %v3209_v3 = vpop.eup %2116  ;;  %v5041_v41 = vsub.f32 0.0, %v3162_v52 }
  0xff   :  { %v5039_v42 = vsel %vm3203_vm10, 4294967295, %v5038_v42  ;;  %v366_v38 = vsel %vm365_vm0, %v2960_v47, %v364_v62  ;;  %v3219_v55 = vsel %vm3203_vm10, %v3039_v26, 0.0  ;;  %v324_v19 = vmul.f32 %v2113_v61, %v323_v30  ;;  %v3223_v44 = vpop.eup %2118  ;;  %vm5042_vm1 = vmmov %vm5037_vm14 }
 0x100   :  { %5040 = vst [vmem:[#allocation22_spill] sm:$0xff] %v5039_v42  ;;  %1082 = vmax.xlane.f32.xlu2 %v5041_v41  ;;  %v371_v17 = vmul.f32 %v3197_v49, %v3059_v37  ;;  %vm5043_vm14 = vcmp.eq.s32.totalorder %v2743_v23, %v2704_v6  ;;  %v5044_v59 = vmov 0  ;;  %v4917_v47 = vsub.f32 0.0, %v3193_v60  ;;  %v3235_v30 = vpop.eup %2120  ;;  %vm5047_vm0 = vmmov %vm5042_vm1 }
 0x101   :  { %vm3230_vm4 = vmand %vm5043_vm14, %vm5042_vm1  ;;  %v369_v62 = vsel %vm367_vm3, %v368_v8, %v366_v38  ;;  %v411_v26 = vmul.f32 %v2109_v46, %v410_v43  ;;  %v278_v41 = vsub.f32 1.5, %v277_v35  ;;  %v3237_v42 = vmax.f32 %v233_v1, 1e-12 }
 0x102   :  { %v5045_v59 = vsel %vm3230_vm4, 4294967295, %v5044_v59  ;;  %v3241_v12 = vsel %vm3230_vm4, %v369_v62, 0.0  ;;  %v325_v54 = vmul.f32 0.5, %v324_v19  ;;  %v372_v29 = vmul.f32 %v3197_v49, %v371_v17  ;;  %1068 = vmax.xlane.f32.xlu1 %v4917_v47 }
 0x103   :  { %5046 = vst [vmem:[#allocation23_spill] sm:$0xff] %v5045_v59  ;;  %612 = vmax.xlane.f32.xlu0 %v3241_v12  ;;  %v412_v46 = vmul.f32 %v411_v26, %v2962_v51  ;;  %v279_v8 = vmul.f32 %v2111_v57, %v278_v41  ;;  %v419_v1 = vmul.f32 %v3223_v44, %v3061_v14  ;;  %vm413_vm3 = vcmp.eq.f32.partialorder %v2962_v51, inf }
 0x104   :  { %v326_v43 = vsub.f32 1.5, %v325_v54  ;;  %v373_v35 = vmul.f32 0.5, %v372_v29  ;;  %v335_v19 = vmul.f32 %v3209_v3, %v3081_v34  ;;  %v416_v47 = vand.u32 2147483648, %v2962_v51 }
 0x105   :  { %v414_v17 = vsel %vm413_vm3, %v2962_v51, %v412_v46  ;;  %v280_v59 = vmul.f32 %v279_v8, %v2974_v0  ;;  %v420_v38 = vmul.f32 %v3223_v44, %v419_v1  ;;  %vm5048_vm1 = vcmp.eq.s32.totalorder %v2727_v13, %v2704_v6 }
 0x106   :  { %vm3263_vm14 = vmand %vm5048_vm1, %vm5047_vm0  ;;  %v5049_v57 = vmov 0  ;;  %vm415_vm4 = vcmp.eq.f32.partialorder %v2962_v51, 0.0  ;;  %vm281_vm10 = vcmp.eq.f32.partialorder %v2974_v0, inf  ;;  %v284_v29 = vand.u32 2147483648, %v2974_v0 }
 0x107   :  { %v5050_v57 = vsel %vm3263_vm14, 4294967295, %v5049_v57  ;;  %v327_v54 = vmul.f32 %v2113_v61, %v326_v43  ;;  %vm5052_vm3 = vcmp.eq.s32.totalorder %v2743_v23, %v2704_v6  ;;  %2122 = vrsqrt.f32 %v3185_v2  ;;  %vm3281_vm7 = vmxor %vm5048_vm1, %vm5000_vm13 }
 0x108   :  { %5051 = vst [vmem:[#allocation24_spill] sm:$0xff] %v5050_v57  ;;  %vm555_vm9 = vmxor %vm5052_vm3, %vm5000_vm13  ;;  %v417_v26 = vsel %vm415_vm4, %v416_v47, %v414_v17  ;;  %v282_v41 = vsel %vm281_vm10, %v2974_v0, %v280_v59  ;;  %vm283_vm0 = vcmp.eq.f32.partialorder %v2974_v0, 0.0  ;;  %v5055_v61 = vsub.f32 0.0, %v3219_v55 }
 0x109   :  { %v285_v23 = vsel %vm283_vm0, %v284_v29, %v282_v41  ;;  %v328_v46 = vmul.f32 %v327_v54, %v3009_v31  ;;  %v374_v8 = vsub.f32 1.5, %v373_v35  ;;  %v336_v47 = vmul.f32 %v3209_v3, %v335_v19 }
 0x10a   :  { %1060 = vmax.xlane.f32.xlu2 %v5055_v61  ;;  %vm5056_vm4 = vcmp.lt.s32.totalorder %v2702_v5, 8  ;;  %vm5057_vm10 = vcmp.eq.s32.totalorder %v3156_v7, %v2704_v6  ;;  %v5058_v13 = vmov 0  ;;  %v421_v0 = vmul.f32 0.5, %v420_v38 }
 0x10b   :  { %vm3294_vm3 = vmand %vm5057_vm10, %vm5056_vm4  ;;  %v287_v59 = vmul.f32 %v3235_v30, %v3079_v20  ;;  %v5061_v1 = vmov 0  ;;  %v3312_v35 = vsel %vm3263_vm14, %v285_v23, 0.0  ;;  %2124 = vrsqrt.f32 %v3237_v42 }
 0x10c   :  { %v5059_v13 = vsel %vm3294_vm3, 4294967295, %v5058_v13  ;;  %vm5060_vm0 = vmmov %vm5056_vm4  ;;  %v3308_v43 = vsel %vm3294_vm3, %v417_v26, 0.0  ;;  %vm518_vm4 = vcmp.eq.s32.totalorder %v2737_v22, %v2704_v6  ;;  %598 = vmax.xlane.f32.xlu0 %v3312_v35  ;;  %v375_v17 = vmul.f32 %v3197_v49, %v374_v8 }
 0x10d   :  { %vm3302_vm1 = vmand %vm555_vm9, %vm5060_vm0  ;;  %620 = vmax.xlane.f32.xlu1 %v3308_v43  ;;  %vm329_vm9 = vcmp.eq.f32.partialorder %v3009_v31, inf  ;;  %v337_v29 = vmul.f32 0.5, %v336_v47  ;;  %v3326_v54 = vpop.eup %2122  ;;  %v5064_v41 = vmov 0  ;;  %v422_v61 = vsub.f32 1.5, %v421_v0 }
 0x10e   :  { %v5062_v1 = vsel %vm3302_vm1, 4294967295, %v5061_v1  ;;  %v3321_v38 = vsel %vm3302_vm1, %v369_v62, 0.0  ;;  %v330_v19 = vsel %vm329_vm9, %v3009_v31, %v328_v46  ;;  %vm5063_vm10 = vmmov %vm5060_vm0  ;;  %v332_v62 = vand.u32 2147483648, %v3009_v31 }
 0x10f   :  { %vm3332_vm0 = vmand %vm3281_vm7, %vm5063_vm10  ;;  %v288_v57 = vmul.f32 %v3235_v30, %v287_v59  ;;  %v4927_v49 = vsub.f32 0.0, %v3321_v38  ;;  %vm331_vm7 = vcmp.eq.f32.partialorder %v3009_v31, 0.0  ;;  %v5067_v8 = vmov 0 }
 0x110   :  { %v5065_v41 = vsel %vm3332_vm0, 4294967295, %v5064_v41  ;;  %vm552_vm9 = vmxor %vm518_vm4, %vm5000_vm13  ;;  %v3345_v46 = vsel %vm3332_vm0, %v285_v23, 0.0  ;;  %v333_v51 = vsel %vm331_vm7, %v332_v62, %v330_v19  ;;  %v376_v47 = vmul.f32 %v375_v17, %v3059_v37 }
 0x111   :  { %5066 = vst [vmem:[#allocation25_spill] sm:$0xff] %v5065_v41  ;;  %vm3353_vm14 = vmand %vm518_vm4, %vm5063_vm10  ;;  %v338_v0 = vsub.f32 1.5, %v337_v29  ;;  %v383_v23 = vmul.f32 %v3326_v54, %v3185_v2  ;;  %v3362_v31 = vpop.eup %2124  ;;  %v4926_v22 = vsub.f32 0.0, %v3345_v46  ;;  %v423_v19 = vmul.f32 %v3223_v44, %v422_v61 }
 0x112   :  { %v5068_v8 = vsel %vm3353_vm14, 4294967295, %v5067_v8  ;;  %1076 = vmax.xlane.f32.xlu2 %v4927_v49  ;;  %vm5069_vm7 = vmmov %vm5063_vm10  ;;  %v289_v62 = vmul.f32 0.5, %v288_v57  ;;  %vm5072_vm4 = vcmp.eq.s32.totalorder %v3156_v7, %v2704_v6  ;;  %v3378_v17 = vsel %vm3353_vm14, %v333_v51, 0.0 }
 0x113   :  { %vm3366_vm0 = vmand %vm552_vm9, %vm5069_vm7  ;;  %vm377_vm9 = vcmp.eq.f32.partialorder %v3059_v37, inf  ;;  %v339_v7 = vmul.f32 %v3209_v3, %v338_v0  ;;  %v384_v57 = vmul.f32 %v3326_v54, %v383_v23  ;;  %v431_v61 = vmul.f32 %v3362_v31, %v3237_v42 }
 0x114   :  { %vm559_vm10 = vmxor %vm5072_vm4, %vm5000_vm13  ;;  %606 = vmax.xlane.f32.xlu0 %v3378_v17  ;;  %v3385_v29 = vsel %vm3366_vm0, %v333_v51, 0.0  ;;  %v378_v44 = vsel %vm377_vm9, %v3059_v37, %v376_v47  ;;  %v380_v51 = vand.u32 2147483648, %v3059_v37  ;;  %v424_v49 = vmul.f32 %v423_v19, %v3061_v14 }
 0x115   :  { %1062 = vmax.xlane.f32.xlu1 %v4926_v22  ;;  %vm3395_vm4 = vmand %vm559_vm10, %vm5069_vm7  ;;  %v5073_v22 = vmov 0  ;;  %v290_v41 = vsub.f32 1.5, %v289_v62  ;;  %vm522_vm9 = vcmp.eq.s32.totalorder %v3033_v63, %v2704_v6  ;;  %v4932_v3 = vsub.f32 0.0, %v3385_v29 }
 0x116   :  { %v5074_v22 = vsel %vm3395_vm4, 4294967295, %v5073_v22  ;;  %vm379_vm3 = vcmp.eq.f32.partialorder %v3059_v37, 0.0  ;;  %v3407_v47 = vsel %vm3395_vm4, %v417_v26, 0.0  ;;  %vm425_vm10 = vcmp.eq.f32.partialorder %v3061_v14, inf  ;;  %vm3416_vm1 = vmand %vm522_vm9, %vm5069_vm7 }
 0x117   :  { %5075 = vst [vmem:[#allocation26_spill] sm:$0xff] %v5074_v22  ;;  %v381_v0 = vsel %vm379_vm3, %v380_v51, %v378_v44  ;;  %v340_v23 = vmul.f32 %v339_v7, %v3081_v34  ;;  %v385_v19 = vmul.f32 0.5, %v384_v57  ;;  %v432_v62 = vmul.f32 %v3362_v31, %v431_v61  ;;  %vm556_vm3 = vmxor %vm522_vm9, %vm5000_vm13 }
 0x118   :  { %v4939_v37 = vsub.f32 0.0, %v3407_v47  ;;  %v426_v26 = vsel %vm425_vm10, %v3061_v14, %v424_v49  ;;  %v291_v44 = vmul.f32 %v3235_v30, %v290_v41  ;;  %v3426_v7 = vsel %vm3416_vm1, %v381_v0, 0.0 }
 0x119   :  { %v428_v57 = vand.u32 2147483648, %v3061_v14  ;;  %vm427_vm7 = vcmp.eq.f32.partialorder %v3061_v14, 0.0  ;;  %vm341_vm4 = vcmp.eq.f32.partialorder %v3081_v34, inf  ;;  %v386_v41 = vsub.f32 1.5, %v385_v19 }
 0x11a   :  { %1070 = vmax.xlane.f32.xlu2 %v4932_v3  ;;  %v342_v30 = vsel %vm341_vm4, %v3081_v34, %v340_v23  ;;  %v433_v61 = vmul.f32 0.5, %v432_v62  ;;  %vm5078_vm13 = vcmp.lt.s32.totalorder %v2702_v5, 8  ;;  %v344_v3 = vand.u32 2147483648, %v3081_v34 }
 0x11b   :  { %v429_v49 = vsel %vm427_vm7, %v428_v57, %v426_v26  ;;  %vm3437_vm9 = vmand %vm556_vm3, %vm5078_vm13  ;;  %v292_v22 = vmul.f32 %v291_v44, %v3079_v20  ;;  %vm5082_vm14 = vcmp.eq.s32.totalorder %v2872_v45, %v2704_v6  ;;  %vm343_vm4 = vcmp.eq.f32.partialorder %v3081_v34, 0.0 }
 0x11c   :  { %1084 = vmax.xlane.f32.xlu0 %v4939_v37  ;;  %vm5081_vm10 = vmmov %vm5078_vm13  ;;  %v3455_v23 = vsel %vm3437_vm9, %v381_v0, 0.0  ;;  %v345_v62 = vsel %vm343_vm4, %v344_v3, %v342_v30  ;;  %vm293_vm3 = vcmp.eq.f32.partialorder %v3079_v20, inf  ;;  %v387_v45 = vmul.f32 %v3326_v54, %v386_v41 }
 0x11d   :  { %614 = vmax.xlane.f32.xlu1 %v3426_v7  ;;  %vm3448_vm7 = vmand %vm5082_vm14, %vm5081_vm10  ;;  %v434_v26 = vsub.f32 1.5, %v433_v61  ;;  %vm5086_vm13 = vcmp.eq.s32.totalorder %v2731_v15, %v2704_v6  ;;  %v4940_v0 = vsub.f32 0.0, %v3455_v23  ;;  %v294_v3 = vsel %vm293_vm3, %v3079_v20, %v292_v22 }
 0x11e   :  { %v3459_v19 = vsel %vm3448_vm7, %v429_v49, 0.0  ;;  %vm5085_vm14 = vmmov %vm5081_vm10  ;;  %v296_v54 = vand.u32 2147483648, %v3079_v20  ;;  %vm295_vm4 = vcmp.eq.f32.partialorder %v3079_v20, 0.0  ;;  %v388_v6 = vmul.f32 %v387_v45, %v3185_v2 }
 0x11f   :  { %vm3469_vm10 = vmand %vm5086_vm13, %vm5085_vm14  ;;  %v435_v15 = vmul.f32 %v3362_v31, %v434_v26  ;;  %v3488_v22 = vsel %vm2924_vm12, %v429_v49, 0.0  ;;  %v3492_v57 = vsel %vm2747_vm8, %v345_v62, 0.0  ;;  %vm389_vm3 = vcmp.eq.f32.partialorder %v3185_v2, inf }
 0x120   :  { %v3477_v44 = vsel %vm3469_vm10, %v345_v62, 0.0  ;;  %v297_v5 = vsel %vm295_vm4, %v296_v54, %v294_v3  ;;  %v390_v20 = vsel %vm389_vm3, %v3185_v2, %v388_v6  ;;  %v4938_v41 = vsub.f32 0.0, %v3488_v22 }
 0x121   :  { %v3496_v30 = vsel %vm2712_vm2, %v297_v5, 0.0  ;;  %v436_v31 = vmul.f32 %v435_v15, %v3237_v42  ;;  %v4937_v49 = vsub.f32 0.0, %v3492_v57  ;;  %v392_v61 = vand.u32 2147483648, %v3185_v2 }
 0x122   :  { %622 = vmax.xlane.f32.xlu2 %v3459_v19  ;;  %vm391_vm14 = vcmp.eq.f32.partialorder %v3185_v2, 0.0  ;;  %v3512_v45 = vsel %vm2721_vm5, %v297_v5, 0.0  ;;  %vm437_vm13 = vcmp.eq.f32.partialorder %v3237_v42, inf  ;;  %v440_v3 = vand.u32 2147483648, %v3237_v42 }
 0x123   :  { %v393_v62 = vsel %vm391_vm14, %v392_v61, %v390_v20  ;;  %v438_v26 = vsel %vm437_vm13, %v3237_v42, %v436_v31  ;;  %v4936_v54 = vsub.f32 0.0, %v3512_v45  ;;  %vm439_vm4 = vcmp.eq.f32.partialorder %v3237_v42, 0.0 }
 0x124   :  { %1078 = vmax.xlane.f32.xlu0 %v4940_v0  ;;  %v3519_v2 = vsel %vm2831_vm15, %v393_v62, 0.0  ;;  %v441_v6 = vsel %vm439_vm4, %v440_v3, %v438_v26  ;;  %vm5089_vm3 = vnez %v4958_v18  ;;  %vm5090_vm14 = vnez %v4970_v56 }
 0x125   :  { %608 = vmax.xlane.f32.xlu1 %v3477_v44  ;;  %v4935_v5 = vsub.f32 0.0, %v3519_v2  ;;  %v3528_v15 = vsel %vm2866_vm6, %v441_v6, 0.0  ;;  %v3535_v20 = vsel %vm5089_vm3, %v393_v62, 0.0  ;;  %v3540_v42 = vsel %vm5090_vm14, %v441_v6, 0.0 }
 0x126   :  { %5091 = vst [vmem:[#allocation27_spill] sm:$0xff] %v3540_v42  ;;  %v4943_v31 = vsub.f32 0.0, %v3540_v42  ;;  %v5093_v42 = vsub.f32 0.0, %v2994_v50  ;;  %vm5094_vm13 = vnez %v4964_v32  ;;  %vm5096_vm4 = vnez %v4988_v33 }
 0x127   :  { %v5133_v51 = vsub.f32 0.0, %v3492_v57 }
 0x12a   :  { %600 = vmax.xlane.f32.xlu2 %v3496_v30 }
 0x12c   :  { %1072 = vmax.xlane.f32.xlu0 %v4937_v49 }
 0x12d   :  { %1086 = vmax.xlane.f32.xlu1 %v4938_v41  ;;  %v5092_v41 = vsub.f32 0.0, %v2945_v39 }
 0x132   :  { %1064 = vmax.xlane.f32.xlu2 %v4936_v54 }
 0x134   :  { %624 = vmax.xlane.f32.xlu0 %v3528_v15 }
 0x135   :  { %1080 = vmax.xlane.f32.xlu1 %v4935_v5 }
 0x13a   :  { %616 = vmax.xlane.f32.xlu2 %v3535_v20 }
 0x142   :  { %1088 = vmax.xlane.f32.xlu2 %v4943_v31 }
 0x153   :  { %v603_v61 = vpop.xlane.xlu1 %602 }
 0x154   :  { %v595_v26 = vpop.xlane.xlu2 %594  ;;  %v630_v3 = vsub.f32 %v2930_v25, %v603_v61 }
 0x155   :  { %v626_v5 = vsub.f32 %v2934_v28, %v595_v26 }
 0x156   :  { %v650_v54 = vmul.f32 1.442695, %v630_v3  ;;  %v1059_v49 = vpop.xlane.xlu0 %1058 }
 0x157   :  { %v642_v62 = vmul.f32 1.442695, %v626_v5  ;;  %v1090_v37 = vsub.f32 %v5092_v41, %v1059_v49 }
 0x158   :  { %2126 = vpow2.f32 %v650_v54 }
 0x159   :  { %2128 = vpow2.f32 %v642_v62  ;;  %v1106_v6 = vmul.f32 1.442695, %v1090_v37 }
 0x15b   :  { %2130 = vpow2.f32 %v1106_v6 }
 0x15d   :  { %v611_v0 = vpop.xlane.xlu2 %610 }
 0x15e   :  { %v2127_v56 = vpop.eup %2126  ;;  %v634_v49 = vsub.f32 %v3015_v21, %v611_v0 }
 0x15f   :  { %v1067_v18 = vpop.xlane.xlu0 %1066  ;;  %v2129_v31 = vpop.eup %2128  ;;  %v678_v26 = vsel %vm2897_vm11, %v2127_v56, 0.0  ;;  %vm5095_vm11 = vnez %v4966_v10 }
 0x160   :  { %v1094_v61 = vsub.f32 %v5093_v42, %v1067_v18  ;;  %v674_v5 = vsel %vm5094_vm13, %v2129_v31, 0.0  ;;  %698 = vadd.xlane.f32.xlu2 %v678_v26  ;;  %v658_v62 = vmul.f32 1.442695, %v634_v49  ;;  %vm5098_vm13 = vnez %v5021_v40 }
 0x161   :  { %v597_v4 = vpop.xlane.xlu1 %596  ;;  %690 = vadd.xlane.f32.xlu1 %v674_v5  ;;  %v738_v37 = vmul.f32 %v674_v5, %v2934_v28  ;;  %v2131_v54 = vpop.eup %2130  ;;  %v5097_v5 = vsub.f32 0.0, %v3162_v52  ;;  %v742_v40 = vmul.f32 %v678_v26, %v2930_v25  ;;  %v5108_v25 = vld [vmem:[#allocation18_spill] sm:$0xff] }
 0x162   :  { %v1114_v41 = vmul.f32 1.442695, %v1094_v61  ;;  %v1138_v32 = vsel %vm5095_vm11, %v2131_v54, 0.0 }
 0x163   :  { %754 = vadd.xlane.f32.xlu0 %v738_v37 }
 0x164   :  { %2132 = vpow2.f32 %v1114_v41 }
 0x165   :  { %2134 = vpow2.f32 %v658_v62 }
 0x168   :  { %v605_v3 = vpop.xlane.xlu2 %604  ;;  %1154 = vadd.xlane.f32.xlu2 %v1138_v32 }
 0x169   :  { %v631_v0 = vsub.f32 %v3111_v36, %v605_v3  ;;  %v5100_v3 = vsub.f32 0.0, %v3097_v53 }
 0x16a   :  { %v2133_v56 = vpop.eup %2132 }
 0x16b   :  { %v619_v6 = vpop.xlane.xlu0 %618  ;;  %v1075_v18 = vpop.xlane.xlu1 %1074  ;;  %v1142_v28 = vsel %vm5096_vm4, %v2133_v56, 0.0  ;;  %v652_v37 = vmul.f32 1.442695, %v631_v0  ;;  %v5101_v56 = vld [vmem:[#allocation14_spill] sm:$0xff]  ;;  %v5103_v0 = vsub.f32 0.0, %v3219_v55 }
 0x16c   :  { %v638_v16 = vsub.f32 %v3138_v27, %v619_v6  ;;  %v1206_v31 = vmul.f32 %v1142_v28, %v2994_v50  ;;  %v2135_v54 = vpop.eup %2134  ;;  %v1098_v50 = vsub.f32 %v5100_v3, %v1075_v18  ;;  %vm5102_vm11 = vnez %v5101_v56  ;;  %v5105_v3 = vld [vmem:[#allocation20_spill] sm:$0xff] }
 0x16d   :  { %vm5106_vm4 = vnez %v5105_v3 }
 0x16e   :  { %v666_v42 = vmul.f32 1.442695, %v638_v16  ;;  %1226 = vadd.xlane.f32.xlu0 %v1206_v31  ;;  %v5104_v31 = vld [vmem:[#allocation16_spill] sm:$0xff] }
 0x170   :  { %2136 = vpow2.f32 %v666_v42  ;;  %1162 = vadd.xlane.f32.xlu2 %v1142_v28  ;;  %v682_v42 = vsel %vm5102_vm11, %v2135_v54, 0.0 }
 0x173   :  { %v1083_v61 = vpop.xlane.xlu2 %1082 }
 0x174   :  { %v1102_v41 = vsub.f32 %v5097_v5, %v1083_v61  ;;  %v627_v61 = vsub.f32 %v5104_v31, %v597_v4 }
 0x175   :  { %v1069_v49 = vpop.xlane.xlu1 %1068 }
 0x176   :  { %v1130_v10 = vmul.f32 1.442695, %v1102_v41  ;;  %v2137_v6 = vpop.eup %2136  ;;  %v613_v62 = vpop.xlane.xlu0 %612  ;;  %706 = vadd.xlane.f32.xlu0 %v682_v42  ;;  %v1122_v41 = vmul.f32 1.442695, %v1098_v50 }
 0x177   :  { %v3568_v33 = vsel %vm5098_vm13, %v2137_v6, 0.0  ;;  %v644_v6 = vmul.f32 1.442695, %v627_v61  ;;  %vm5109_vm13 = vnez %v5108_v25 }
 0x178   :  { %2138 = vpow2.f32 %v1130_v10  ;;  %5099 = vst [vmem:[#allocation28_spill] sm:$0xff] %v3568_v33  ;;  %714 = vadd.xlane.f32.xlu1 %v3568_v33  ;;  %762 = vadd.xlane.f32.xlu2 %v742_v40 }
 0x179   :  { %2140 = vpow2.f32 %v652_v37 }
 0x17d   :  { %v1061_v16 = vpop.xlane.xlu2 %1060 }
 0x17e   :  { %v1091_v28 = vsub.f32 %v5103_v0, %v1061_v16  ;;  %v2139_v5 = vpop.eup %2138  ;;  %v5107_v16 = vsub.f32 0.0, %v3193_v60  ;;  %v1202_v0 = vmul.f32 %v1138_v32, %v2945_v39 }
 0x17f   :  { %v2141_v18 = vpop.eup %2140  ;;  %v3583_v54 = vsel %vm5106_vm4, %v2139_v5, 0.0  ;;  %v3590_v50 = vpop.xlane.xlu0 %598 }
 0x180   :  { %v1108_v37 = vmul.f32 1.442695, %v1091_v28  ;;  %v3579_v10 = vpop.xlane.xlu1 %620  ;;  %v1095_v56 = vsub.f32 %v5107_v16, %v1069_v49  ;;  %1178 = vadd.xlane.f32.xlu1 %v3583_v54  ;;  %v679_v26 = vsel %vm5109_vm13, %v2141_v18, 0.0  ;;  %1218 = vadd.xlane.f32.xlu2 %v1202_v0  ;;  %v5112_v18 = vld [vmem:[#allocation17_spill] sm:$0xff] }
 0x181   :  { %700 = vadd.xlane.f32.xlu0 %v679_v26  ;;  %vm5113_vm4 = vnez %v5112_v18  ;;  %v5117_v18 = vld [vmem:[#allocation21_spill] sm:$0xff] }
 0x182   :  { %2142 = vpow2.f32 %v1108_v37  ;;  %v1116_v61 = vmul.f32 1.442695, %v1095_v56  ;;  %v5115_v56 = vld [vmem:[#allocation15_spill] sm:$0xff] }
 0x183   :  { %2144 = vpow2.f32 %v1122_v41  ;;  %v5110_v41 = vld [vmem:[#allocation22_spill] sm:$0xff]  ;;  %vm5116_vm13 = vnez %v5115_v56 }
 0x184   :  { %2146 = vpow2.f32 %v644_v6  ;;  %vm5111_vm11 = vnez %v5110_v41  ;;  %v5114_v6 = vsub.f32 0.0, %v3385_v29 }
 0x185   :  { %v1077_v4 = vpop.xlane.xlu2 %1076  ;;  %2148 = vpow2.f32 %v1116_v61 }
 0x187   :  { %v607_v39 = vpop.xlane.xlu0 %606 }
 0x188   :  { %v2143_v28 = vpop.eup %2142  ;;  %v3593_v40 = vpop.xlane.xlu1 %1062 }
 0x189   :  { %v2145_v5 = vpop.eup %2144  ;;  %v1139_v49 = vsel %vm5111_vm11, %v2143_v28, 0.0  ;;  %v635_v28 = vsub.f32 %v3241_v12, %v613_v62  ;;  %vm5118_vm11 = vnez %v5117_v18  ;;  %v743_v18 = vmul.f32 %v679_v26, %v3111_v36 }
 0x18a   :  { %1156 = vadd.xlane.f32.xlu1 %v1139_v49  ;;  %v2147_v37 = vpop.eup %2146  ;;  %v1146_v16 = vsel %vm5113_vm4, %v2145_v5, 0.0  ;;  %v1203_v41 = vmul.f32 %v1139_v49, %v3219_v55 }
 0x18b   :  { %1170 = vadd.xlane.f32.xlu0 %v1146_v16  ;;  %v675_v0 = vsel %vm5116_vm13, %v2147_v37, 0.0  ;;  %v2149_v33 = vpop.eup %2148  ;;  %v660_v27 = vmul.f32 1.442695, %v635_v28  ;;  %v632_v37 = vsub.f32 %v3378_v17, %v607_v39  ;;  %v1210_v63 = vmul.f32 %v1146_v16, %v3097_v53 }
 0x18c   :  { %692 = vadd.xlane.f32.xlu2 %v675_v0  ;;  %v1143_v5 = vsel %vm5118_vm11, %v2149_v33, 0.0  ;;  %v5127_v16 = vsub.f32 0.0, %v3345_v46  ;;  %vm5128_vm13 = vnez %v5059_v13 }
 0x18d   :  { %v1071_v3 = vpop.xlane.xlu2 %1070  ;;  %v1207_v56 = vmul.f32 %v1143_v5, %v3193_v60  ;;  %v654_v28 = vmul.f32 1.442695, %v632_v37  ;;  %v5119_v60 = vsub.f32 0.0, %v3321_v38 }
 0x18e   :  { %v1096_v25 = vsub.f32 %v5114_v6, %v1071_v3  ;;  %v746_v6 = vmul.f32 %v682_v42, %v3015_v21 }
 0x18f   :  { %v1085_v62 = vpop.xlane.xlu0 %1084  ;;  %v1099_v39 = vsub.f32 %v5119_v60, %v1077_v4  ;;  %v5122_v4 = vsub.f32 0.0, %v3455_v23 }
 0x190   :  { %v1118_v32 = vmul.f32 1.442695, %v1096_v25  ;;  %v615_v61 = vpop.xlane.xlu1 %614 }
 0x191   :  { %v636_v3 = vsub.f32 %v3426_v7, %v615_v61 }
 0x192   :  { %2150 = vpow2.f32 %v1118_v32  ;;  %1220 = vadd.xlane.f32.xlu1 %v1203_v41  ;;  %v739_v32 = vmul.f32 %v675_v0, %v5104_v31  ;;  %v5120_v31 = vld [vmem:[#allocation23_spill] sm:$0xff]  ;;  %v639_v0 = vsub.f32 %v3308_v43, %v3579_v10  ;;  %v5123_v10 = vsub.f32 0.0, %v3407_v47 }
 0x193   :  { %1164 = vadd.xlane.f32.xlu0 %v1143_v5  ;;  %2152 = vpow2.f32 %v660_v27  ;;  %v662_v55 = vmul.f32 1.442695, %v636_v3  ;;  %vm5121_vm4 = vnez %v5120_v31  ;;  %v1124_v5 = vmul.f32 1.442695, %v1099_v39 }
 0x194   :  { %770 = vadd.xlane.f32.xlu2 %v746_v6 }
 0x195   :  { %2154 = vpow2.f32 %v662_v55  ;;  %v628_v55 = vsub.f32 %v3312_v35, %v3590_v50 }
 0x196   :  { %2156 = vpow2.f32 %v654_v28 }
 0x197   :  { %v1079_v41 = vpop.xlane.xlu0 %1078 }
 0x198   :  { %v2151_v25 = vpop.eup %2150  ;;  %v609_v49 = vpop.xlane.xlu1 %608  ;;  %v1100_v3 = vsub.f32 %v5122_v4, %v1079_v41 }
 0x199   :  { %v3614_v33 = vsel %vm3366_vm0, %v2151_v25, 0.0  ;;  %v633_v21 = vsub.f32 %v3477_v44, %v609_v49  ;;  %v2153_v42 = vpop.eup %2152  ;;  %v668_v25 = vmul.f32 1.442695, %v639_v0  ;;  %vm5124_vm0 = vnez %v5068_v8  ;;  %v623_v49 = vpop.xlane.xlu2 %622 }
 0x19a   :  { %1228 = vadd.xlane.f32.xlu1 %v1207_v56  ;;  %v1208_v27 = vmul.f32 %v3614_v33, %v3385_v29  ;;  %v3623_v59 = vsel %vm5121_vm4, %v2153_v42, 0.0  ;;  %v1103_v56 = vsub.f32 %v5123_v10, %v1085_v62  ;;  %v1126_v36 = vmul.f32 1.442695, %v1100_v3  ;;  %v5131_v3 = vld [vmem:[#allocation24_spill] sm:$0xff] }
 0x19b   :  { %756 = vadd.xlane.f32.xlu0 %v739_v32  ;;  %v656_v61 = vmul.f32 1.442695, %v633_v21  ;;  %v2155_v29 = vpop.eup %2154  ;;  %v5125_v62 = vsub.f32 0.0, %v3488_v22  ;;  %v646_v42 = vmul.f32 1.442695, %v628_v55  ;;  %vm5132_vm11 = vnez %v5131_v3 }
 0x19c   :  { %1230 = vadd.xlane.f32.xlu2 %v1208_v27  ;;  %v2157_v6 = vpop.eup %2156  ;;  %v3633_v37 = vsel %vm3416_vm1, %v2155_v29, 0.0  ;;  %v1132_v21 = vmul.f32 1.442695, %v1103_v56  ;;  %vm5126_vm1 = vnez %v5062_v1  ;;  %v640_v58 = vsub.f32 %v3459_v19, %v623_v49 }
 0x19d   :  { %2158 = vpow2.f32 %v656_v61  ;;  %v3640_v26 = vsel %vm5124_vm0, %v2157_v6, 0.0  ;;  %v1092_v61 = vsub.f32 %v5127_v16, %v3593_v40  ;;  %v5129_v40 = vld [vmem:[#allocation26_spill] sm:$0xff] }
 0x19e   :  { %2160 = vpow2.f32 %v1124_v5 }
 0x19f   :  { %2162 = vpow2.f32 %v668_v25  ;;  %v1073_v13 = vpop.xlane.xlu0 %1072 }
 0x1a0   :  { %v1087_v32 = vpop.xlane.xlu1 %1086  ;;  %2164 = vpow2.f32 %v1126_v36  ;;  %v1097_v25 = vsub.f32 %v5133_v51, %v1073_v13 }
 0x1a1   :  { %v1104_v27 = vsub.f32 %v5125_v62, %v1087_v32  ;;  %2166 = vpow2.f32 %v1132_v21  ;;  %v601_v0 = vpop.xlane.xlu2 %600 }
 0x1a2   :  { %708 = vadd.xlane.f32.xlu1 %v3623_v59  ;;  %2168 = vpow2.f32 %v646_v42  ;;  %v629_v55 = vsub.f32 %v3496_v30, %v601_v0  ;;  %v1120_v32 = vmul.f32 1.442695, %v1097_v25 }
 0x1a3   :  { %764 = vadd.xlane.f32.xlu0 %v743_v18  ;;  %v2159_v28 = vpop.eup %2158  ;;  %v1134_v39 = vmul.f32 1.442695, %v1104_v27  ;;  %v1110_v18 = vmul.f32 1.442695, %v1092_v61  ;;  %v5136_v61 = vsub.f32 0.0, %v3512_v45 }
 0x1a4   :  { %710 = vadd.xlane.f32.xlu2 %v3633_v37  ;;  %v2161_v8 = vpop.eup %2160  ;;  %v3650_v60 = vsel %vm3469_vm10, %v2159_v28, 0.0  ;;  %vm5130_vm10 = vnez %v5129_v40  ;;  %v648_v21 = vmul.f32 1.442695, %v629_v55  ;;  %v5138_v55 = vld [vmem:[#allocation27_spill] sm:$0xff] }
 0x1a5   :  { %v2163_v50 = vpop.eup %2162  ;;  %v1147_v53 = vsel %vm5126_vm1, %v2161_v8, 0.0  ;;  %2170 = vpow2.f32 %v1134_v39  ;;  %v670_v39 = vmul.f32 1.442695, %v640_v58 }
 0x1a6   :  { %v2165_v31 = vpop.eup %2164  ;;  %v3660_v34 = vsel %vm5128_vm13, %v2163_v50, 0.0  ;;  %2172 = vpow2.f32 %v1110_v18  ;;  %v1211_v62 = vmul.f32 %v1147_v53, %v3321_v38  ;;  %v748_v18 = vmul.f32 %v3633_v37, %v3426_v7 }
 0x1a7   :  { %v2167_v41 = vpop.eup %2166  ;;  %v3665_v1 = vsel %vm3437_vm9, %v2165_v31, 0.0  ;;  %2174 = vpow2.f32 %v1120_v32  ;;  %v625_v42 = vpop.xlane.xlu0 %624  ;;  %v745_v37 = vmul.f32 %v3650_v60, %v3477_v44  ;;  %v5139_v32 = vsub.f32 0.0, %v5138_v55 }
 0x1a8   :  { %v2169_v29 = vpop.eup %2168  ;;  %v3670_v5 = vsel %vm5130_vm10, %v2167_v41, 0.0  ;;  %2176 = vpow2.f32 %v648_v21  ;;  %v641_v16 = vsub.f32 %v3528_v15, %v625_v42 }
 0x1a9   :  { %v676_v6 = vsel %vm5132_vm11, %v2169_v29, 0.0  ;;  %v1065_v10 = vpop.xlane.xlu2 %1064  ;;  %2178 = vpow2.f32 %v670_v39  ;;  %v5137_v29 = vsub.f32 0.0, %v3519_v2 }
 0x1aa   :  { %702 = vadd.xlane.f32.xlu1 %v3640_v26  ;;  %v740_v8 = vmul.f32 %v676_v6, %v3312_v35  ;;  %v1093_v31 = vsub.f32 %v5136_v61, %v1065_v10  ;;  %v744_v35 = vmul.f32 %v3640_v26, %v3378_v17 }
 0x1ab   :  { %1234 = vadd.xlane.f32.xlu0 %v1210_v63  ;;  %v2171_v4 = vpop.eup %2170  ;;  %v5134_v63 = vld [vmem:[#allocation25_spill] sm:$0xff] }
 0x1ac   :  { %704 = vadd.xlane.f32.xlu2 %v3650_v60  ;;  %v3679_v56 = vsel %vm2924_vm12, %v2171_v4, 0.0  ;;  %v2173_v36 = vpop.eup %2172  ;;  %vm5135_vm9 = vnez %v5134_v63  ;;  %v1112_v0 = vmul.f32 1.442695, %v1093_v31 }
 0x1ad   :  { %v1140_v28 = vsel %vm5135_vm9, %v2173_v36, 0.0 }
 0x1ae   :  { %v1204_v50 = vmul.f32 %v1140_v28, %v3345_v46  ;;  %v1081_v46 = vpop.xlane.xlu1 %1080 }
 0x1af   :  { %v1101_v40 = vsub.f32 %v5137_v29, %v1081_v46 }
 0x1b1   :  { %v617_v27 = vpop.xlane.xlu2 %616  ;;  %v1128_v17 = vmul.f32 1.442695, %v1101_v40 }
 0x1b2   :  { %1172 = vadd.xlane.f32.xlu1 %v1147_v53  ;;  %v672_v53 = vmul.f32 1.442695, %v641_v16  ;;  %v637_v7 = vsub.f32 %v3535_v20, %v617_v27 }
 0x1b3   :  { %716 = vadd.xlane.f32.xlu0 %v3660_v34 }
 0x1b4   :  { %1174 = vadd.xlane.f32.xlu2 %v3665_v1  ;;  %2180 = vpow2.f32 %v672_v53  ;;  %v664_v14 = vmul.f32 1.442695, %v637_v7  ;;  %v1214_v53 = vmul.f32 %v3583_v54, %v3162_v52  ;;  %v747_v52 = vmul.f32 %v3623_v59, %v3241_v12 }
 0x1b5   :  { %2182 = vpow2.f32 %v1112_v0 }
 0x1b6   :  { %2184 = vpow2.f32 %v1128_v17 }
 0x1b9   :  { %v1089_v41 = vpop.xlane.xlu2 %1088 }
 0x1ba   :  { %1180 = vadd.xlane.f32.xlu1 %v3670_v5  ;;  %v1105_v63 = vsub.f32 %v5139_v32, %v1089_v41 }
 0x1bb   :  { %694 = vadd.xlane.f32.xlu0 %v676_v6 }
 0x1bc   :  { %1182 = vadd.xlane.f32.xlu2 %v3679_v56  ;;  %v1136_v11 = vmul.f32 1.442695, %v1105_v63 }
 0x1c2   :  { %1166 = vadd.xlane.f32.xlu1 %v3614_v33  ;;  %v2175_v33 = vpop.eup %2174 }
 0x1c3   :  { %1158 = vadd.xlane.f32.xlu0 %v1140_v28  ;;  %v3695_v38 = vsel %vm2747_vm8, %v2175_v33, 0.0  ;;  %v2177_v49 = vpop.eup %2176 }
 0x1c4   :  { %1236 = vadd.xlane.f32.xlu2 %v1211_v62  ;;  %v677_v24 = vsel %vm2712_vm2, %v2177_v49, 0.0  ;;  %v2179_v4 = vpop.eup %2178 }
 0x1c5   :  { %v741_v13 = vmul.f32 %v677_v24, %v3496_v30  ;;  %v3709_v26 = vsel %vm3448_vm7, %v2179_v4, 0.0  ;;  %v2181_v3 = vpop.eup %2180 }
 0x1c6   :  { %v2183_v30 = vpop.eup %2182  ;;  %v3719_v10 = vsel %vm2866_vm6, %v2181_v3, 0.0 }
 0x1c7   :  { %v1141_v44 = vsel %vm2721_vm5, %v2183_v30, 0.0  ;;  %v2185_v60 = vpop.eup %2184 }
 0x1c8   :  { %v1205_v48 = vmul.f32 %v1141_v44, %v3512_v45  ;;  %v3736_v42 = vsel %vm2831_vm15, %v2185_v60, 0.0  ;;  %v752_v60 = vmul.f32 %v3709_v26, %v3459_v19 }
 0x1ca   :  { %758 = vadd.xlane.f32.xlu1 %v740_v8 }
 0x1cb   :  { %1222 = vadd.xlane.f32.xlu0 %v1204_v50 }
 0x1cc   :  { %1168 = vadd.xlane.f32.xlu2 %v3695_v38 }
 0x1d2   :  { %766 = vadd.xlane.f32.xlu1 %v744_v35 }
 0x1d3   :  { %774 = vadd.xlane.f32.xlu0 %v748_v18  ;;  %v699_v9 = vpop.xlane.xlu2 %698 }
 0x1d4   :  { %760 = vadd.xlane.f32.xlu2 %v741_v13  ;;  %v691_v6 = vpop.xlane.xlu1 %690  ;;  %v726_v51 = vadd.f32 1e-06, %v699_v9 }
 0x1d5   :  { %v3715_v25 = vadd.f32 1e-06, %v691_v6 }
 0x1d6   :  { %2186 = vrcp.f32 %v726_v51  ;;  %v3721_v36 = vpop.xlane.xlu0 %754  ;;  %v853_v0 = vand.u32 2147483648, %v726_v51  ;;  %vm847_vm5 = vweird.f32 %v726_v51  ;;  %v851_v18 = vand.u32 2147483647, %v726_v51 }
 0x1d7   :  { %2188 = vrcp.f32 %v3715_v25  ;;  %vm791_vm15 = vweird.f32 %v3715_v25  ;;  %v795_v63 = vand.u32 2147483647, %v3715_v25 }
 0x1d8   :  { %2190 = vpow2.f32 %v664_v14  ;;  %v854_v54 = vor.u32 1.1754944e-38, %v853_v0  ;;  %vm852_vm8 = vcmp.eq.f32.partialorder %v851_v18, 8.507059e+37 }
 0x1d9   :  { %vm796_vm0 = vcmp.eq.f32.partialorder %v795_v63, 8.507059e+37 }
 0x1da   :  { %718 = vadd.xlane.f32.xlu1 %v3709_v26 }
 0x1db   :  { %768 = vadd.xlane.f32.xlu0 %v745_v37  ;;  %v1155_v28 = vpop.xlane.xlu2 %1154 }
 0x1dc   :  { %720 = vadd.xlane.f32.xlu2 %v3719_v10  ;;  %v2187_v21 = vpop.eup %2186  ;;  %v3730_v62 = vadd.f32 1e-06, %v1155_v28  ;;  %v797_v28 = vand.u32 2147483648, %v3715_v25 }
 0x1dd   :  { %v843_v58 = vmul.f32 %v2187_v21, %v726_v51  ;;  %v3732_v27 = vpop.eup %2188  ;;  %vm848_vm2 = vweird.f32 %v2187_v21 }
 0x1de   :  { %v2191_v39 = vpop.eup %2190  ;;  %2192 = vrcp.f32 %v3730_v62  ;;  %v787_v16 = vmul.f32 %v3732_v27, %v3715_v25  ;;  %vm849_vm6 = vmor %vm847_vm5, %vm848_vm2  ;;  %vm792_vm12 = vweird.f32 %v3732_v27  ;;  %v5145_v25 = vld [vmem:[#allocation19_spill] sm:$0xff]  ;;  %vm1255_vm4 = vweird.f32 %v3730_v62 }
 0x1df   :  { %v844_v50 = vsub.f32 1.0, %v843_v58  ;;  %2194 = vpow2.f32 %v1136_v11  ;;  %v3748_v35 = vsel %vm5089_vm3, %v2191_v39, 0.0  ;;  %v1261_v11 = vand.u32 2147483648, %v3730_v62  ;;  %vm3784_vm3 = vmor %vm791_vm15, %vm792_vm12  ;;  %v5146_v39 = vld [vmem:[#allocation28_spill] sm:$0xff] }
 0x1e0   :  { %v788_v41 = vsub.f32 1.0, %v787_v16  ;;  %v1259_v49 = vand.u32 2147483647, %v3730_v62  ;;  %vm1986_vm2 = vcmask 0  }
 0x1e1   :  { %v3738_v33 = vpop.xlane.xlu0 %1226  ;;  %v845_v45 = vmul.f32 %v2187_v21, %v844_v50 }
 0x1e2   :  { %696 = vadd.xlane.f32.xlu1 %v677_v24  ;;  %v789_v7 = vmul.f32 %v3732_v27, %v788_v41  ;;  %vm1260_vm9 = vcmp.eq.f32.partialorder %v1259_v49, 8.507059e+37 }
 0x1e3   :  { %1224 = vadd.xlane.f32.xlu0 %v1205_v48  ;;  %v1163_v61 = vpop.xlane.xlu2 %1162  ;;  %v846_v46 = vadd.f32 %v2187_v21, %v845_v45  ;;  %v750_v45 = vmul.f32 %v5146_v39, %v5145_v25 }
 0x1e4   :  { %1176 = vadd.xlane.f32.xlu2 %v3736_v42  ;;  %v3744_v31 = vadd.f32 1e-06, %v1163_v61  ;;  %v3754_v24 = vpop.eup %2192  ;;  %v790_v59 = vadd.f32 %v3732_v27, %v789_v7 }
 0x1e5   :  { %v850_v13 = vsel %vm849_vm6, %v2187_v21, %v846_v46  ;;  %v2195_v4 = vpop.eup %2194  ;;  %v1251_v9 = vmul.f32 %v3754_v24, %v3730_v62  ;;  %vm1256_vm7 = vweird.f32 %v3754_v24  ;;  %v751_v46 = vmul.f32 %v3660_v34, %v3308_v43 }
 0x1e6   :  { %2196 = vrcp.f32 %v3744_v31  ;;  %v855_v37 = vsel %vm852_vm8, %v854_v54, %v850_v13  ;;  %v3768_v14 = vsel %vm5090_vm14, %v2195_v4, 0.0  ;;  %v1317_v21 = vand.u32 2147483648, %v3744_v31  ;;  %vm3805_vm13 = vmor %vm1255_vm4, %vm1256_vm7 }
 0x1e7   :  { %v1315_v8 = vand.u32 2147483647, %v3744_v31  ;;  %v794_v61 = vsel %vm3784_vm3, %v3732_v27, %v790_v59  ;;  %vm1311_vm1 = vweird.f32 %v3744_v31  ;;  %v1262_v34 = vor.u32 1.1754944e-38, %v1261_v11 }
 0x1e8   :  { %v1318_v27 = vor.u32 1.1754944e-38, %v1317_v21  ;;  %v1217_v59 = vmul.f32 %v3768_v14, %v5138_v55 }
 0x1e9   :  { %v707_v40 = vpop.xlane.xlu0 %706  ;;  %vm1316_vm11 = vcmp.eq.f32.partialorder %v1315_v8, 8.507059e+37 }
 0x1ea   :  { %1160 = vadd.xlane.f32.xlu1 %v1141_v44  ;;  %v3758_v17 = vadd.f32 1e-06, %v707_v40  ;;  %v1252_v44 = vsub.f32 1.0, %v1251_v9 }
 0x1eb   :  { %712 = vadd.xlane.f32.xlu0 %v3748_v35  ;;  %v3756_v29 = vpop.xlane.xlu1 %714  ;;  %v763_v3 = vpop.xlane.xlu2 %762 }
 0x1ec   :  { %1242 = vadd.xlane.f32.xlu2 %v1214_v53  ;;  %v2197_v6 = vpop.eup %2196  ;;  %2198 = vrcp.f32 %v3758_v17  ;;  %v1014_v51 = vmul.f32 %v855_v37, %v763_v3  ;;  %v1253_v32 = vmul.f32 %v3754_v24, %v1252_v44  ;;  %v798_v53 = vor.u32 1.1754944e-38, %v797_v28 }
 0x1ed   :  { %v1307_v12 = vmul.f32 %v2197_v6, %v3744_v31  ;;  %vm1312_vm14 = vweird.f32 %v2197_v6  ;;  %v1213_v44 = vmul.f32 %v3736_v42, %v3519_v2  ;;  %v1209_v42 = vmul.f32 %v3695_v38, %v3492_v57 }
 0x1ee   :  { %v1254_v58 = vadd.f32 %v3754_v24, %v1253_v32  ;;  %vm1313_vm10 = vmor %vm1311_vm1, %vm1312_vm14  ;;  %v799_v40 = vsel %vm796_vm0, %v798_v53, %v794_v61  ;;  %v909_v28 = vand.u32 2147483648, %v3758_v17  ;;  %vm903_vm6 = vweird.f32 %v3758_v17 }
 0x1ef   :  { %v1308_v48 = vsub.f32 1.0, %v1307_v12  ;;  %v3821_v37 = vmul.f32 %v799_v40, %v3721_v36  ;;  %v1216_v57 = vmul.f32 %v3679_v56, %v3488_v22 }
 0x1f0   :  { %v1258_v43 = vsel %vm3805_vm13, %v3754_v24, %v1254_v58  ;;  %v910_v8 = vor.u32 1.1754944e-38, %v909_v28 }
 0x1f1   :  { %v1309_v26 = vmul.f32 %v2197_v6, %v1308_v48  ;;  %v1263_v7 = vsel %vm1260_vm9, %v1262_v34, %v1258_v43 }
 0x1f2   :  { %772 = vadd.xlane.f32.xlu1 %v747_v52  ;;  %v3793_v16 = vpop.eup %2198  ;;  %v749_v52 = vmul.f32 %v3748_v35, %v3535_v20  ;;  %v1212_v20 = vmul.f32 %v3665_v1, %v3455_v23  ;;  %v2399_v35 = vmov 0.0  }
 0x1f3   :  { %1184 = vadd.xlane.f32.xlu0 %v3768_v14  ;;  %v3789_v50 = vpop.xlane.xlu1 %1178  ;;  %v1310_v0 = vadd.f32 %v2197_v6, %v1309_v26  ;;  %v899_v13 = vmul.f32 %v3793_v16, %v3758_v17  ;;  %v1219_v9 = vpop.xlane.xlu2 %1218  ;;  %1987 = vst.msk [vmem:[#allocation5] sm:$0x1] %vm1986_vm2, %v2399_v35  ;;  %vm904_vm5 = vweird.f32 %v3793_v16  ;;  %v907_v14 = vand.u32 2147483647, %v3758_v17 }
 0x1f4   :  { %782 = vadd.xlane.f32.xlu2 %v752_v60  ;;  %v701_v41 = vpop.xlane.xlu0 %700  ;;  %v3824_v24 = vmul.f32 %v1263_v7, %v1219_v9  ;;  %1988 = vst.msk [vmem:[#allocation6] sm:$0x1] %vm1986_vm2, %v2399_v35  ;;  %vm3864_vm8 = vmor %vm903_vm6, %vm904_vm5  ;;  %v753_v9 = vmul.f32 %v3719_v10, %v3528_v15 }
 0x1f5   :  { %v3810_v62 = vadd.f32 1e-06, %v701_v41  ;;  %v1314_v31 = vsel %vm1313_vm10, %v2197_v6, %v1310_v0  ;;  %v900_v3 = vsub.f32 1.0, %v899_v13  ;;  %vm908_vm12 = vcmp.eq.f32.partialorder %v907_v14, 8.507059e+37 }
 0x1f6   :  { %v1319_v4 = vsel %vm1316_vm11, %v1318_v27, %v1314_v31  ;;  %v3834_v36 = vsub.f32 %v3821_v37, %v3824_v24  ;;  %v1215_v0 = vmul.f32 %v3670_v5, %v3407_v47 }
 0x1f7   :  { %v1478_v54 = vmul.f32 %v1319_v4, %v3738_v33  ;;  %2200 = vrcp.f32 %v3810_v62  ;;  %v901_v23 = vmul.f32 %v3793_v16, %v900_v3  ;;  %v865_v31 = vand.u32 2147483647, %v3810_v62 }
 0x1f8   :  { %v3879_v39 = vsub.f32 0.0, %v3834_v36  ;;  %v867_v13 = vand.u32 2147483648, %v3810_v62  ;;  %vm861_vm4 = vweird.f32 %v3810_v62 }
 0x1f9   :  { %v3826_v6 = vsub.f32 %v1014_v51, %v1478_v54  ;;  %v902_v63 = vadd.f32 %v3793_v16, %v901_v23  ;;  %vm3910_vm1 = vcmp.eq.f32.partialorder %v865_v31, 8.507059e+37 }
 0x1fa   :  { %778 = vadd.xlane.f32.xlu1 %v750_v45  ;;  %v1652_v47 = vand.u32 2147483647, %v3879_v39  ;;  %v868_v23 = vor.u32 1.1754944e-38, %v867_v13 }
 0x1fb   :  { %780 = vadd.xlane.f32.xlu0 %v751_v46  ;;  %v906_v19 = vsel %vm3864_vm8, %v3793_v16, %v902_v63  ;;  %v3876_v26 = vsub.f32 0.0, %v3826_v6 }
 0x1fc   :  { %776 = vadd.xlane.f32.xlu2 %v749_v52  ;;  %v911_v61 = vsel %vm908_vm12, %v910_v8, %v906_v19 }
 0x1fd   :  { %v1157_v30 = vpop.xlane.xlu1 %1156  ;;  %v3846_v12 = vpop.eup %2200  ;;  %v1656_v41 = vand.u32 2147483647, %v3876_v26 }
 0x1fe   :  { %v3836_v33 = vadd.f32 1e-06, %v1157_v30  ;;  %v1171_v51 = vpop.xlane.xlu0 %1170  ;;  %v857_v48 = vmul.f32 %v3846_v12, %v3810_v62  ;;  %vm862_vm0 = vweird.f32 %v3846_v12 }
 0x1ff   :  { %v3844_v1 = vadd.f32 1e-06, %v1171_v51  ;;  %v693_v60 = vpop.xlane.xlu2 %692  ;;  %v1672_v3 = vsub.f32 0.0, %v1656_v41  ;;  %vm3923_vm10 = vmor %vm861_vm4, %vm862_vm0  ;;  %vm1929_vm0 = vcmp.ge.f32.partialorder %v3824_v24, %v3821_v37 }
 0x200   :  { %2202 = vrcp.f32 %v3836_v33  ;;  %v3850_v32 = vadd.f32 1e-06, %v693_v60  ;;  %v858_v25 = vsub.f32 1.0, %v857_v48  ;;  %v1275_v45 = vand.u32 2147483648, %v3836_v33 }
 0x201   :  { %2204 = vrcp.f32 %v3844_v1  ;;  %v1273_v16 = vand.u32 2147483647, %v3836_v33  ;;  %vm1269_vm7 = vweird.f32 %v3836_v33 }
 0x202   :  { %1238 = vadd.xlane.f32.xlu1 %v1212_v20  ;;  %2206 = vrcp.f32 %v3850_v32  ;;  %v859_v43 = vmul.f32 %v3846_v12, %v858_v25  ;;  %v1276_v34 = vor.u32 1.1754944e-38, %v1275_v45  ;;  %v809_v60 = vand.u32 2147483647, %v3850_v32 }
 0x203   :  { %1240 = vadd.xlane.f32.xlu0 %v1213_v44  ;;  %vm1274_vm14 = vcmp.eq.f32.partialorder %v1273_v16, 8.507059e+37  ;;  %v811_v63 = vand.u32 2147483648, %v3850_v32  ;;  %vm805_vm11 = vweird.f32 %v3850_v32 }
 0x204   :  { %1248 = vadd.xlane.f32.xlu2 %v1217_v59  ;;  %v860_v20 = vadd.f32 %v3846_v12, %v859_v43  ;;  %v1668_v59 = vsub.f32 0.0, %v1652_v47  ;;  %vm810_vm8 = vcmp.eq.f32.partialorder %v809_v60, 8.507059e+37  ;;  %v3975_v60 = vadd.f32 1e-06, %v3789_v50 }
 0x205   :  { %v1221_v2 = vpop.xlane.xlu1 %1220  ;;  %v3985_v50 = vadd.f32 1e-06, %v3756_v29 }
 0x206   :  { %v2203_v55 = vpop.eup %2202  ;;  %v1165_v58 = vpop.xlane.xlu0 %1164  ;;  %v1684_v19 = vmul.f32 1.442695, %v1668_v59 }
 0x207   :  { %v1265_v21 = vmul.f32 %v2203_v55, %v3836_v33  ;;  %v3870_v38 = vadd.f32 1e-06, %v1165_v58  ;;  %v3883_v22 = vpop.eup %2204  ;;  %vm1270_vm15 = vweird.f32 %v2203_v55  ;;  %v771_v49 = vpop.xlane.xlu2 %770 }
 0x208   :  { %v3886_v46 = vpop.eup %2206  ;;  %v3888_v53 = vmul.f32 %v911_v61, %v771_v49  ;;  %vm1271_vm3 = vmor %vm1269_vm7, %vm1270_vm15  ;;  %v1363_v52 = vmul.f32 %v3883_v22, %v3844_v1  ;;  %vm1368_vm15 = vweird.f32 %v3883_v22 }
 0x209   :  { %v1266_v17 = vsub.f32 1.0, %v1265_v21  ;;  %2208 = vrcp.f32 %v3870_v38  ;;  %v801_v40 = vmul.f32 %v3886_v46, %v3850_v32  ;;  %vm806_vm13 = vweird.f32 %v3886_v46 }
 0x20a   :  { %1232 = vadd.xlane.f32.xlu1 %v1209_v42  ;;  %v1364_v10 = vsub.f32 1.0, %v1363_v52  ;;  %v1331_v42 = vand.u32 2147483648, %v3870_v38  ;;  %v864_v21 = vsel %vm3923_vm10, %v3846_v12, %v860_v20  ;;  %vm1325_vm5 = vweird.f32 %v3870_v38  ;;  %vm807_vm6 = vmor %vm805_vm11, %vm806_vm13 }
 0x20b   :  { %1246 = vadd.xlane.f32.xlu0 %v1216_v57  ;;  %v1267_v56 = vmul.f32 %v2203_v55, %v1266_v17  ;;  %v802_v51 = vsub.f32 1.0, %v801_v40  ;;  %v1329_v57 = vand.u32 2147483647, %v3870_v38  ;;  %v812_v32 = vor.u32 1.1754944e-38, %v811_v63 }
 0x20c   :  { %v1365_v58 = vmul.f32 %v3883_v22, %v1364_v10  ;;  %v1332_v25 = vor.u32 1.1754944e-38, %v1331_v42  ;;  %v869_v45 = vsel %vm3910_vm1, %v868_v23, %v864_v21  ;;  %2210 = vpow2.f32 %v1684_v19 }
 0x20d   :  { %v1268_v18 = vadd.f32 %v2203_v55, %v1267_v56  ;;  %v3894_v27 = vpop.xlane.xlu1 %1228  ;;  %v803_v28 = vmul.f32 %v3886_v46, %v802_v51  ;;  %vm1330_vm7 = vcmp.eq.f32.partialorder %v1329_v57, 8.507059e+37  ;;  %vm1620_vm1 = vcmp.ne.f32.partialorder %v3879_v39, %v3879_v39 }
 0x20e   :  { %v757_v4 = vpop.xlane.xlu0 %756  ;;  %v1366_v61 = vadd.f32 %v3883_v22, %v1365_v58 }
 0x20f   :  { %v1272_v5 = vsel %vm1271_vm3, %v2203_v55, %v1268_v18  ;;  %v2209_v54 = vpop.eup %2208  ;;  %v3916_v15 = vpop.xlane.xlu2 %1230  ;;  %v1692_v55 = vmul.f32 1.442695, %v1672_v3  ;;  %v804_v62 = vadd.f32 %v3886_v46, %v803_v28  ;;  %vm1367_vm3 = vweird.f32 %v3844_v1 }
 0x210   :  { %v1277_v7 = vsel %vm1274_vm14, %v1276_v34, %v1272_v5  ;;  %v1321_v33 = vmul.f32 %v2209_v54, %v3870_v38  ;;  %vm1326_vm9 = vweird.f32 %v2209_v54  ;;  %vm1369_vm14 = vmor %vm1367_vm3, %vm1368_vm15  ;;  %vm1624_vm15 = vcmp.ne.f32.partialorder %v3876_v26, %v3876_v26 }
 0x211   :  { %v1475_v30 = vmul.f32 %v1277_v7, %v1221_v2  ;;  %v808_v12 = vsel %vm807_vm6, %v3886_v46, %v804_v62  ;;  %vm1327_vm12 = vmor %vm1325_vm5, %vm1326_vm9  ;;  %v1371_v46 = vand.u32 2147483647, %v3844_v1  ;;  %v1370_v31 = vsel %vm1369_vm14, %v3883_v22, %v1366_v61 }
 0x212   :  { %1244 = vadd.xlane.f32.xlu1 %v1215_v0  ;;  %v1322_v2 = vsub.f32 1.0, %v1321_v33  ;;  %v813_v56 = vsel %vm810_vm8, %v812_v32, %v808_v12  ;;  %v1373_v0 = vand.u32 2147483648, %v3844_v1  ;;  %2212 = vpow2.f32 %v1692_v55 }
 0x213   :  { %v1011_v49 = vmul.f32 %v813_v56, %v757_v4  ;;  %vm1372_vm4 = vcmp.eq.f32.partialorder %v1371_v46, 8.507059e+37  ;;  %v1588_v56 = vmax.f32 %v3834_v36, 0.0 }
 0x214   :  { %v1323_v11 = vmul.f32 %v2209_v54, %v1322_v2  ;;  %v1374_v5 = vor.u32 1.1754944e-38, %v1373_v0 }
 0x215   :  { %v3928_v14 = vpop.xlane.xlu1 %708  ;;  %v3948_v34 = vsub.f32 %v1011_v49, %v1475_v30 }
 0x216   :  { %v765_v17 = vpop.xlane.xlu0 %764  ;;  %v1324_v8 = vadd.f32 %v2209_v54, %v1323_v11  ;;  %v1375_v1 = vsel %vm1372_vm4, %v1374_v5, %v1370_v31 }
 0x217   :  { %v1015_v16 = vmul.f32 %v869_v45, %v765_v17  ;;  %v3943_v18 = vpop.xlane.xlu2 %710  ;;  %v3952_v13 = vsub.f32 0.0, %v3948_v34 }
 0x218   :  { %v1328_v38 = vsel %vm1327_vm12, %v2209_v54, %v1324_v8  ;;  %v2211_v54 = vpop.eup %2210 }
 0x219   :  { %v1333_v41 = vsel %vm1330_vm7, %v1332_v25, %v1328_v38  ;;  %v1653_v52 = vand.u32 2147483647, %v3952_v13  ;;  %v1716_v22 = vadd.f32 1.0, %v2211_v54  ;;  %v2213_v20 = vpop.eup %2212  ;;  %v1719_v63 = vmul.f32 -0.5, %v2211_v54 }
 0x21a   :  { %784 = vadd.xlane.f32.xlu1 %v753_v9  ;;  %v1479_v43 = vmul.f32 %v1333_v41, %v3894_v27  ;;  %v1752_v44 = vadd.f32 1.0, %v2213_v20  ;;  %v1755_v42 = vmul.f32 -0.5, %v2213_v20  ;;  %v1722_v11 = vand.u32 2147483647, %v2211_v54 }
 0x21b   :  { %v1669_v7 = vsub.f32 0.0, %v1653_v52  ;;  %v1720_v21 = vadd.f32 1.0, %v1719_v63  ;;  %v1758_v17 = vand.u32 2147483647, %v2213_v20  ;;  %vm1621_vm9 = vcmp.ne.f32.partialorder %v3952_v13, %v3952_v13 }
 0x21c   :  { %v3954_v47 = vsub.f32 %v1015_v16, %v1479_v43  ;;  %v1756_v32 = vadd.f32 1.0, %v1755_v42  ;;  %vm4005_vm13 = vcmp.lt.f32.partialorder %v1722_v11, 0.0004427343 }
 0x21d   :  { %v703_v40 = vpop.xlane.xlu1 %702  ;;  %v1686_v30 = vmul.f32 1.442695, %v1669_v7  ;;  %v1721_v16 = vmul.f32 %v2211_v54, %v1720_v21  ;;  %vm4010_vm10 = vcmp.lt.f32.partialorder %v1758_v17, 0.0004427343 }
 0x21e   :  { %v1235_v4 = vpop.xlane.xlu0 %1234  ;;  %v3969_v23 = vsub.f32 0.0, %v3954_v47  ;;  %v3972_v59 = vadd.f32 1e-06, %v703_v40  ;;  %v1757_v40 = vmul.f32 %v2213_v20, %v1756_v32 }
 0x21f   :  { %v1482_v27 = vmul.f32 %v1375_v1, %v1235_v4  ;;  %v3960_v3 = vpop.xlane.xlu2 %704  ;;  %2214 = vpow2.f32 %v1686_v30 }
 0x220   :  { %2216 = vlog2.f32 %v1716_v22  ;;  %v1657_v24 = vand.u32 2147483647, %v3969_v23  ;;  %v1589_v22 = vmax.f32 %v3948_v34, 0.0  ;;  %vm875_vm5 = vweird.f32 %v3972_v59 }
 0x221   :  { %v3958_v9 = vsub.f32 %v3888_v53, %v1482_v27  ;;  %v1945_v53 = vsel %vm1929_vm0, 1.0, %v2399_v35  ;;  %2218 = vlog2.f32 %v1752_v44 }
 0x222   :  { %v1976_v37 = vrot.slane %v1945_v53, 4  ;;  %2220 = vrcp.f32 %v3972_v59  ;;  %v1673_v62 = vsub.f32 0.0, %v1657_v24 }
 0x223   :  { %2222 = vrcp.f32 %v3975_v60  ;;  %v3992_v25 = vsub.f32 0.0, %v3958_v9 }
 0x224   :  { %v3987_v57 = vadd.f32 %v1976_v37, %v1945_v53  ;;  %v1694_v46 = vmul.f32 1.442695, %v1673_v62  ;;  %v4045_v62 = vadd.f32 1e-06, %v3943_v18 }
 0x225   :  { %v3962_v33 = vpop.xlane.xlu1 %1172  ;;  %v2215_v2 = vpop.eup %2214  ;;  %v1660_v4 = vand.u32 2147483647, %v3992_v25 }
 0x226   :  { %v3966_v51 = vpop.xlane.xlu0 %716  ;;  %v1725_v28 = vadd.f32 1.0, %v2215_v2  ;;  %v2217_v35 = vpop.eup %2216  ;;  %v1728_v55 = vmul.f32 -0.5, %v2215_v2  ;;  %v1731_v61 = vand.u32 2147483647, %v2215_v2  ;;  %v1978_v41 = vrot.slane %v3987_v57, 2 }
 0x227   :  { %v3977_v10 = vpop.xlane.xlu2 %1174  ;;  %v1718_v8 = vmul.f32 0.6931472, %v2217_v35  ;;  %v2219_v12 = vpop.eup %2218  ;;  %v4050_v13 = vadd.f32 1e-06, %v3962_v33 }
 0x228   :  { %2224 = vlog2.f32 %v1725_v28  ;;  %v1729_v45 = vadd.f32 1.0, %v1728_v55  ;;  %v3995_v29 = vpop.eup %2220  ;;  %v1754_v1 = vmul.f32 0.6931472, %v2219_v12  ;;  %vm1732_vm11 = vcmp.lt.f32.partialorder %v1731_v61, 0.0004427343 }
 0x229   :  { %v4001_v49 = vpop.eup %2222  ;;  %v1724_v5 = vsel %vm4005_vm13, %v1721_v16, %v1718_v8  ;;  %v871_v7 = vmul.f32 %v3995_v29, %v3972_v59  ;;  %v1676_v28 = vsub.f32 0.0, %v1660_v4  ;;  %v4038_v55 = vadd.f32 1e-06, %v3928_v14 }
 0x22a   :  { %v1730_v27 = vmul.f32 %v2215_v2, %v1729_v45  ;;  %v4024_v44 = vmul.f32 %v4001_v49, %v3975_v60  ;;  %v1860_v63 = vadd.f32 %v1724_v5, %v1588_v56  ;;  %v879_v14 = vand.u32 2147483647, %v3972_v59 }
 0x22b   :  { %v872_v21 = vsub.f32 1.0, %v871_v7  ;;  %v881_v12 = vand.u32 2147483648, %v3972_v59  ;;  %v1592_v45 = vmax.f32 %v3826_v6, 0.0  ;;  %v1700_v18 = vmul.f32 1.442695, %v1676_v28 }
 0x22c   :  { %v4065_v33 = vadd.f32 %v1978_v41, %v3987_v57  ;;  %vm876_vm6 = vweird.f32 %v3995_v29  ;;  %vm4079_vm8 = vcmp.eq.f32.partialorder %v879_v14, 8.507059e+37 }
 0x22d   :  { %v3981_v48 = vpop.xlane.xlu1 %1180  ;;  %v882_v31 = vor.u32 1.1754944e-38, %v881_v12  ;;  %vm4114_vm0 = vmor %vm875_vm5, %vm876_vm6 }
 0x22e   :  { %v695_v58 = vpop.xlane.xlu0 %694  ;;  %v2225_v43 = vpop.eup %2224 }
 0x22f   :  { %v3989_v19 = vadd.f32 1e-06, %v695_v58  ;;  %v3999_v38 = vpop.xlane.xlu2 %1182  ;;  %v1727_v54 = vmul.f32 0.6931472, %v2225_v43  ;;  %v1760_v58 = vsel %vm4010_vm10, %v1757_v40, %v1754_v1 }
 0x230   :  { %v4071_v40 = vadd.f32 %v1760_v58, %v1592_v45 }
 0x231   :  { %2226 = vrcp.f32 %v3989_v19  ;;  %v1733_v37 = vsel %vm1732_vm11, %v1730_v27, %v1727_v54  ;;  %v825_v54 = vand.u32 2147483648, %v3989_v19  ;;  %vm819_vm7 = vweird.f32 %v3989_v19 }
 0x232   :  { %2228 = vrcp.f32 %v3985_v50  ;;  %v1861_v42 = vadd.f32 %v1733_v37, %v1589_v22  ;;  %v823_v7 = vand.u32 2147483647, %v3989_v19 }
 0x233   :  { %2230 = vpow2.f32 %v1694_v46  ;;  %v873_v46 = vmul.f32 %v3995_v29, %v872_v21  ;;  %v826_v45 = vor.u32 1.1754944e-38, %v825_v54 }
 0x234   :  { %v1877_v11 = vsel %vm1621_vm9, %v3948_v34, %v1861_v42  ;;  %v1876_v34 = vsel %vm1620_vm1, %v3834_v36, %v1860_v63  ;;  %v1420_v36 = vsub.f32 1.0, %v4024_v44  ;;  %vm824_vm13 = vcmp.eq.f32.partialorder %v823_v7, 8.507059e+37 }
 0x235   :  { %v1167_v52 = vpop.xlane.xlu1 %1166  ;;  %v1893_v8 = vmul.f32 0.0, %v1877_v11  ;;  %v874_v27 = vadd.f32 %v3995_v29, %v873_v46  ;;  %v1880_v7 = vsel %vm1624_vm15, %v3826_v6, %v4071_v40  ;;  %v937_v63 = vand.u32 2147483648, %v4045_v62 }
 0x236   :  { %v4020_v30 = vadd.f32 1e-06, %v1167_v52  ;;  %v1159_v20 = vpop.xlane.xlu0 %1158  ;;  %v4152_v6 = vmul.f32 0.0, %v1880_v7  ;;  %vm1381_vm15 = vweird.f32 %v4050_v13 }
 0x237   :  { %v4026_v53 = vpop.eup %2226  ;;  %v4028_v24 = vadd.f32 1e-06, %v1159_v20  ;;  %v4047_v32 = vpop.xlane.xlu2 %1236  ;;  %v4067_v0 = vadd.f32 %v1893_v8, %v1876_v34  ;;  %v935_v8 = vand.u32 2147483647, %v4045_v62 }
 0x238   :  { %v4030_v2 = vpop.eup %2228  ;;  %2232 = vrcp.f32 %v4020_v30  ;;  %v815_v35 = vmul.f32 %v4026_v53, %v3989_v19  ;;  %vm820_vm12 = vweird.f32 %v4026_v53  ;;  %v1345_v20 = vand.u32 2147483648, %v4020_v30  ;;  %5165 = vst [vmem:[#allocation14_spill] sm:$0xff] %v4152_v6 }
 0x239   :  { %2234 = vrcp.f32 %v4028_v24  ;;  %v4062_v61 = vpop.eup %2230  ;;  %vm4096_vm3 = vmor %vm819_vm7, %vm820_vm12  ;;  %v1289_v37 = vand.u32 2147483648, %v4028_v24  ;;  %v1287_v11 = vand.u32 2147483647, %v4028_v24  ;;  %vm1339_vm1 = vweird.f32 %v4020_v30 }
 0x23a   :  { %v816_v17 = vsub.f32 1.0, %v815_v35  ;;  %2236 = vrcp.f32 %v4038_v55  ;;  %v1761_v52 = vadd.f32 1.0, %v4062_v61  ;;  %v1343_v35 = vand.u32 2147483647, %v4020_v30 }
 0x23b   :  { %2238 = vrcp.f32 %v4045_v62  ;;  %vm1283_vm10 = vweird.f32 %v4028_v24  ;;  %v1346_v59 = vor.u32 1.1754944e-38, %v1345_v20  ;;  %vm1288_vm6 = vcmp.eq.f32.partialorder %v1287_v11, 8.507059e+37 }
 0x23c   :  { %v817_v16 = vmul.f32 %v4026_v53, %v816_v17  ;;  %2240 = vrcp.f32 %v4050_v13  ;;  %vm1344_vm5 = vcmp.eq.f32.partialorder %v1343_v35, 8.507059e+37  ;;  %v1993_v35 = vld [vmem:[#allocation6] sm:$0x1]  ;;  %vm1423_vm12 = vweird.f32 %v3975_v60 }
 0x23d   :  { %v4059_v56 = vpop.xlane.xlu1 %758  ;;  %2242 = vpow2.f32 %v1700_v18 }
 0x23e   :  { %v2233_v43 = vpop.eup %2232  ;;  %v818_v5 = vadd.f32 %v4026_v53, %v817_v16  ;;  %v1223_v42 = vpop.xlane.xlu0 %1222  ;;  %2244 = vlog2.f32 %v1761_v52  ;;  %v1764_v52 = vmul.f32 -0.5, %v4062_v61 }
 0x23f   :  { %v2235_v39 = vpop.eup %2234  ;;  %v1335_v57 = vmul.f32 %v2233_v43, %v4020_v30  ;;  %vm1340_vm14 = vweird.f32 %v2233_v43  ;;  %v4108_v17 = vpop.xlane.xlu2 %1168 }
 0x240   :  { %v1279_v4 = vmul.f32 %v2235_v39, %v4028_v24  ;;  %v4094_v44 = vpop.eup %2236  ;;  %v822_v19 = vsel %vm4096_vm3, %v4026_v53, %v818_v5  ;;  %vm1284_vm4 = vweird.f32 %v2235_v39  ;;  %v878_v53 = vsel %vm4114_vm0, %v3995_v29, %v874_v27  ;;  %vm1341_vm11 = vmor %vm1339_vm1, %vm1340_vm14 }
 0x241   :  { %v1336_v1 = vsub.f32 1.0, %v1335_v57  ;;  %v4102_v21 = vpop.eup %2238  ;;  %v827_v46 = vsel %vm824_vm13, %v826_v45, %v822_v19  ;;  %vm1285_vm9 = vmor %vm1283_vm10, %vm1284_vm4  ;;  %v1290_v57 = vor.u32 1.1754944e-38, %v1289_v37  ;;  %v883_v29 = vsel %vm4079_vm8, %v882_v31, %v878_v53 }
 0x242   :  { %v1280_v22 = vsub.f32 1.0, %v1279_v4  ;;  %v4118_v12 = vpop.eup %2240  ;;  %v4143_v31 = vadd.f32 1e-06, %v3960_v3  ;;  %v1593_v19 = vmax.f32 %v3954_v47, 0.0  ;;  %v4178_v53 = vor.u32 1.1754944e-38, %v937_v63 }
 0x243   :  { %v1337_v28 = vmul.f32 %v2233_v43, %v1336_v1  ;;  %v4124_v18 = vpop.eup %2242  ;;  %v1980_v1 = vrot.slane %v4065_v33, 1  ;;  %v1377_v40 = vmul.f32 %v4118_v12, %v4050_v13  ;;  %vm1424_vm8 = vweird.f32 %v4001_v49 }
 0x244   :  { %v1281_v58 = vmul.f32 %v2235_v39, %v1280_v22  ;;  %v1421_v22 = vmul.f32 %v4001_v49, %v1420_v36  ;;  %2246 = vrcp.f32 %v4143_v31  ;;  %vm932_vm7 = vweird.f32 %v4102_v21  ;;  %vm4245_vm13 = vmor %vm1423_vm12, %vm1424_vm8 }
 0x245   :  { %v767_v14 = vpop.xlane.xlu1 %766  ;;  %v1338_v34 = vadd.f32 %v2233_v43, %v1337_v28  ;;  %vm1625_vm3 = vcmp.ne.f32.partialorder %v3969_v23, %v3969_v23  ;;  %vm931_vm14 = vweird.f32 %v4045_v62  ;;  %vm1382_vm1 = vweird.f32 %v4118_v12 }
 0x246   :  { %v1282_v16 = vadd.f32 %v2235_v39, %v1281_v58  ;;  %v1016_v27 = vmul.f32 %v883_v29, %v767_v14  ;;  %v4160_v3 = vpop.xlane.xlu0 %774  ;;  %v4169_v28 = vadd.f32 %v4001_v49, %v1421_v22  ;;  %v1788_v58 = vadd.f32 1.0, %v4124_v18  ;;  %vm4252_vm10 = vmor %vm1381_vm15, %vm1382_vm1 }
 0x247   :  { %v1342_v5 = vsel %vm1341_vm11, %v2233_v43, %v1338_v34  ;;  %v1012_v43 = vmul.f32 %v827_v46, %v4059_v56  ;;  %v1981_v56 = vadd.f32 %v1980_v1, %v4065_v33  ;;  %v1427_v33 = vand.u32 2147483647, %v3975_v60  ;;  %v2245_v34 = vpop.eup %2244 }
 0x248   :  { %v1286_v4 = vsel %vm1285_vm9, %v2235_v39, %v1282_v16  ;;  %v1347_v30 = vsel %vm1344_vm5, %v1346_v59, %v1342_v5  ;;  %v4182_v16 = vadd.f32 1e-06, %v3966_v51  ;;  %v1378_v59 = vsub.f32 1.0, %v1377_v40  ;;  %vm4290_vm5 = vmor %vm931_vm14, %vm932_vm7 }
 0x249   :  { %v1291_v54 = vsel %vm1288_vm6, %v1290_v57, %v1286_v4  ;;  %v1480_v24 = vmul.f32 %v1347_v30, %v3916_v15  ;;  %v927_v15 = vmul.f32 %v4102_v21, %v4045_v62  ;;  %v913_v46 = vmul.f32 %v4094_v44, %v4038_v55 }
 0x24a   :  { %v1476_v39 = vmul.f32 %v1291_v54, %v1223_v42  ;;  %v4166_v42 = vpop.xlane.xlu2 %760  ;;  %v1994_v57 = vadd.f32 %v1993_v35, %v1981_v56  ;;  %v1765_v5 = vadd.f32 1.0, %v1764_v52  ;;  %v1385_v4 = vand.u32 2147483647, %v4050_v13  ;;  %v4198_v63 = vpop.eup %2246 }
 0x24b   :  { %v4140_v41 = vsub.f32 %v1016_v27, %v1480_v24  ;;  %v928_v45 = vsub.f32 1.0, %v927_v15  ;;  %v1387_v29 = vand.u32 2147483648, %v4050_v13  ;;  %v1767_v1 = vand.u32 2147483647, %v4062_v61 }
 0x24c   :  { %v4145_v20 = vsub.f32 %v1012_v43, %v1476_v39  ;;  %v1596_v54 = vmax.f32 %v3958_v9, 0.0  ;;  %2248 = vlog2.f32 %v1788_v58  ;;  %1995 = vst.msk [vmem:[#allocation6] sm:$0x1] %vm1986_vm2, %v1994_v57  ;;  %v1763_v27 = vmul.f32 0.6931472, %v2245_v34 }
 0x24d   :  { %v4150_v26 = vpop.xlane.xlu1 %718  ;;  %v4158_v36 = vsub.f32 0.0, %v4140_v41  ;;  %v1379_v43 = vmul.f32 %v4118_v12, %v1378_v59  ;;  %v929_v39 = vmul.f32 %v4102_v21, %v928_v45  ;;  %v914_v15 = vsub.f32 1.0, %v913_v46  ;;  %2023 = dma.vmem_to_hbm [thread:$0]  %s2019_s2, 16, %s2021_s11, [#allocation7]  }
 0x24e   :  { %v4164_v37 = vsub.f32 0.0, %v4145_v20  ;;  %v1766_v56 = vmul.f32 %v4062_v61, %v1765_v5  ;;  %v1791_v40 = vmul.f32 -0.5, %v4124_v18  ;;  %v4205_v52 = vadd.f32 1e-06, %v3977_v10  ;;  %v4217_v61 = vpop.xlane.xlu0 %768 }
 0x24f   :  { %v1658_v11 = vand.u32 2147483647, %v4158_v36  ;;  %v1388_v35 = vor.u32 1.1754944e-38, %v1387_v29  ;;  %vm4208_vm4 = vcmp.lt.f32.partialorder %v1767_v1, 0.0004427343  ;;  %2250 = vrcp.f32 %v4182_v16 }
 0x250   :  { %v1654_v14 = vand.u32 2147483647, %v4164_v37  ;;  %vm4213_vm0 = vcmp.eq.f32.partialorder %v1385_v4, 8.507059e+37  ;;  %v1769_v10 = vsel %vm4208_vm4, %v1766_v56, %v1763_v27  ;;  %v4223_v34 = vadd.f32 1e-06, %v3981_v48 }
 0x251   :  { %v1674_v51 = vsub.f32 0.0, %v1658_v11  ;;  %v955_v46 = vmul.f32 %v4030_v2, %v3985_v50  ;;  %v1380_v5 = vadd.f32 %v4118_v12, %v1379_v43  ;;  %v915_v4 = vmul.f32 %v4094_v44, %v914_v15 }
 0x252   :  { %v1670_v30 = vsub.f32 0.0, %v1654_v14  ;;  %v4225_v59 = vpop.xlane.xlu2 %720  ;;  %v2249_v57 = vpop.eup %2248  ;;  %v1792_v29 = vadd.f32 1.0, %v1791_v40  ;;  %v4236_v48 = vadd.f32 %v4102_v21, %v929_v39  ;;  %v1865_v1 = vadd.f32 %v1769_v10, %v1593_v19 }
 0x253   :  { %v1696_v14 = vmul.f32 1.442695, %v1674_v51  ;;  %v885_v51 = vmul.f32 %v4198_v63, %v4143_v31  ;;  %v1426_v39 = vsel %vm4245_vm13, %v4001_v49, %v4169_v28  ;;  %v956_v15 = vsub.f32 1.0, %v955_v46 }
 0x254   :  { %v1688_v24 = vmul.f32 1.442695, %v1670_v30  ;;  %v1794_v30 = vand.u32 2147483647, %v4124_v18  ;;  %v4263_v40 = vadd.f32 1e-06, %v3999_v38  ;;  %v1384_v13 = vsel %vm4252_vm10, %v4118_v12, %v1380_v5 }
 0x255   :  { %v697_v7 = vpop.xlane.xlu1 %696  ;;  %v4260_v56 = vpop.eup %2250  ;;  %v916_v58 = vadd.f32 %v4094_v44, %v915_v4  ;;  %vm918_vm11 = vweird.f32 %v4094_v44  ;;  %v1793_v10 = vmul.f32 %v4124_v18, %v1792_v29  ;;  %v923_v38 = vand.u32 2147483648, %v4038_v55 }
 0x256   :  { %v4196_v22 = vadd.f32 1e-06, %v697_v7  ;;  %2252 = vpow2.f32 %v1688_v24  ;;  %v1790_v7 = vmul.f32 0.6931472, %v2249_v57  ;;  %vm4273_vm9 = vcmp.lt.f32.partialorder %v1794_v30, 0.0004427343  ;;  %v4318_v11 = vpop.xlane.xlu0 %1224 }
 0x257   :  { %v1881_v12 = vsel %vm1625_vm3, %v3954_v47, %v1865_v1  ;;  %v886_v5 = vsub.f32 1.0, %v885_v51  ;;  %vm917_vm6 = vweird.f32 %v4038_v55  ;;  %v921_v4 = vand.u32 2147483647, %v4038_v55 }
 0x258   :  { %2254 = vrcp.f32 %v4196_v22  ;;  %v1796_v30 = vsel %vm4273_vm9, %v1793_v10, %v1790_v7  ;;  %v1389_v47 = vsel %vm4213_vm0, %v1388_v35, %v1384_v13  ;;  %vm4305_vm8 = vmor %vm917_vm6, %vm918_vm11  ;;  %v957_v1 = vmul.f32 %v4030_v2, %v956_v15 }
 0x259   :  { %2256 = vrcp.f32 %v4205_v52  ;;  %v1483_v55 = vmul.f32 %v1389_v47, %v4047_v32  ;;  %v920_v7 = vsel %vm4305_vm8, %v4094_v44, %v916_v58  ;;  %v924_v10 = vor.u32 1.1754944e-38, %v923_v38 }
 0x25a   :  { %2258 = vpow2.f32 %v1696_v14  ;;  %v4330_v13 = vpop.xlane.xlu2 %1176  ;;  %v4334_v57 = vadd.f32 %v1796_v30, %v1596_v54  ;;  %v887_v47 = vmul.f32 %v4198_v63, %v886_v5  ;;  %v1429_v44 = vand.u32 2147483648, %v3975_v60 }
 0x25b   :  { %2260 = vrcp.f32 %v4223_v34  ;;  %vm922_vm12 = vcmp.eq.f32.partialorder %v921_v4, 8.507059e+37  ;;  %v958_v45 = vadd.f32 %v4030_v2, %v957_v1  ;;  %vm960_vm15 = vweird.f32 %v4030_v2 }
 0x25c   :  { %v4270_v14 = vpop.eup %2252  ;;  %v4342_v35 = vadd.f32 1e-06, %v4108_v17  ;;  %v4345_v38 = vadd.f32 1e-06, %v4150_v26  ;;  %v965_v5 = vand.u32 2147483648, %v3985_v50  ;;  %vm959_vm7 = vweird.f32 %v3985_v50 }
 0x25d   :  { %v1161_v43 = vpop.xlane.xlu1 %1160  ;;  %v1734_v15 = vadd.f32 1.0, %v4270_v14  ;;  %vm1428_vm3 = vcmp.eq.f32.partialorder %v1427_v33, 8.507059e+37  ;;  %v1430_v26 = vor.u32 1.1754944e-38, %v1429_v44  ;;  %vm4363_vm14 = vmor %vm959_vm7, %vm960_vm15  ;;  %vm890_vm4 = vweird.f32 %v4198_v63 }
 0x25e   :  { %v4277_v46 = vadd.f32 1e-06, %v1161_v43  ;;  %v4280_v27 = vpop.eup %2254  ;;  %v4325_v43 = vmul.f32 0.0, %v1881_v12  ;;  %v925_v12 = vsel %vm922_vm12, %v924_v10, %v920_v7  ;;  %v963_v7 = vand.u32 2147483647, %v3985_v50  ;;  %v713_v49 = vpop.xlane.xlu0 %712 }
 0x25f   :  { %v4296_v29 = vpop.eup %2256  ;;  %v829_v32 = vmul.f32 %v4280_v27, %v4196_v22  ;;  %v4355_v10 = vadd.f32 %v4198_v63, %v887_v47  ;;  %v837_v50 = vand.u32 2147483647, %v4196_v22  ;;  %v962_v47 = vsel %vm4363_vm14, %v4030_v2, %v958_v45 }
 0x260   :  { %2262 = vrcp.f32 %v4277_v46  ;;  %v4310_v51 = vpop.eup %2258  ;;  %5180 = vst [vmem:[#allocation16_spill] sm:$0xff] %v4325_v43  ;;  %v966_v33 = vor.u32 1.1754944e-38, %v965_v5  ;;  %vm964_vm0 = vcmp.eq.f32.partialorder %v963_v7, 8.507059e+37  ;;  %vm1628_vm1 = vcmp.ne.f32.partialorder %v3992_v25, %v3992_v25 }
 0x261   :  { %2264 = vrcp.f32 %v4263_v40  ;;  %v4323_v19 = vpop.eup %2260  ;;  %v1770_v58 = vadd.f32 1.0, %v4310_v51  ;;  %v830_v4 = vsub.f32 1.0, %v829_v32  ;;  %v1773_v2 = vmul.f32 -0.5, %v4310_v51 }
 0x262   :  { %2266 = vlog2.f32 %v1734_v15  ;;  %vm4388_vm10 = vcmp.eq.f32.partialorder %v935_v8, 8.507059e+37  ;;  %vm889_vm11 = vweird.f32 %v4143_v31  ;;  %vm833_vm9 = vweird.f32 %v4196_v22  ;;  %v1243_v8 = vpop.xlane.xlu2 %1242 }
 0x263   :  { %2268 = vlog2.f32 %v1770_v58  ;;  %v831_v58 = vmul.f32 %v4280_v27, %v830_v4  ;;  %v967_v28 = vsel %vm964_vm0, %v966_v33, %v962_v47  ;;  %vm4396_vm13 = vcmp.eq.f32.partialorder %v837_v50, 8.507059e+37 }
 0x264   :  { %2270 = vrcp.f32 %v4345_v38  ;;  %v839_v62 = vand.u32 2147483648, %v4196_v22  ;;  %vm834_vm8 = vweird.f32 %v4280_v27  ;;  %vm1297_vm12 = vweird.f32 %v4277_v46 }
 0x265   :  { %v773_v23 = vpop.xlane.xlu1 %772  ;;  %v832_v15 = vadd.f32 %v4280_v27, %v831_v58  ;;  %v1301_v50 = vand.u32 2147483647, %v4277_v46  ;;  %v4408_v47 = vadd.f32 1e-06, %v713_v49  ;;  %v1774_v44 = vadd.f32 1.0, %v1773_v2 }
 0x266   :  { %v1019_v54 = vmul.f32 %v925_v12, %v773_v23  ;;  %v4348_v30 = vpop.eup %2262  ;;  %v1737_v12 = vmul.f32 -0.5, %v4270_v14  ;;  %v1740_v23 = vand.u32 2147483647, %v4270_v14 }
 0x267   :  { %v4352_v1 = vpop.eup %2264  ;;  %v1293_v17 = vmul.f32 %v4348_v30, %v4277_v46  ;;  %vm1298_vm6 = vweird.f32 %v4348_v30  ;;  %vm1302_vm14 = vcmp.eq.f32.partialorder %v1301_v50, 8.507059e+37  ;;  %2272 = vrcp.f32 %v4408_v47 }
 0x268   :  { %v4368_v32 = vsub.f32 %v1019_v54, %v1483_v55  ;;  %v1431_v55 = vsel %vm1428_vm3, %v1430_v26, %v1426_v39  ;;  %v2267_v39 = vpop.eup %2266  ;;  %v1738_v4 = vadd.f32 1.0, %v1737_v12  ;;  %vm4414_vm15 = vmor %vm1297_vm12, %vm1298_vm6  ;;  %vm4418_vm7 = vcmp.lt.f32.partialorder %v1740_v23, 0.0004427343 }
 0x269   :  { %v1294_v60 = vsub.f32 1.0, %v1293_v17  ;;  %v1303_v17 = vand.u32 2147483648, %v4277_v46  ;;  %v2269_v26 = vpop.eup %2268  ;;  %v1736_v33 = vmul.f32 0.6931472, %v2267_v39  ;;  %v1776_v46 = vand.u32 2147483647, %v4310_v51  ;;  %vm4434_vm3 = vmor %vm833_vm9, %vm834_vm8 }
 0x26a   :  { %v4427_v2 = vsub.f32 0.0, %v4368_v32  ;;  %v1739_v39 = vmul.f32 %v4270_v14, %v1738_v4  ;;  %v1772_v6 = vmul.f32 0.6931472, %v2269_v26  ;;  %vm4475_vm9 = vmor %vm889_vm11, %vm890_vm4  ;;  %2274 = vrcp.f32 %v4342_v35 }
 0x26b   :  { %v1295_v24 = vmul.f32 %v4348_v30, %v1294_v60  ;;  %v4410_v60 = vpop.eup %2270  ;;  %vm4459_vm0 = vcmp.lt.f32.partialorder %v1776_v46, 0.0004427343  ;;  %vm1622_vm4 = vcmp.ne.f32.partialorder %v4164_v37, %v4164_v37  ;;  %v1597_v46 = vmax.f32 %v4368_v32, 0.0 }
 0x26c   :  { %v983_v14 = vmul.f32 %v4410_v60, %v4345_v38  ;;  %v1742_v22 = vsel %vm4418_vm7, %v1739_v39, %v1736_v33  ;;  %v1661_v25 = vand.u32 2147483647, %v4427_v2  ;;  %vm988_vm11 = vweird.f32 %v4410_v60 }
 0x26d   :  { %v779_v5 = vpop.xlane.xlu1 %778  ;;  %v1296_v7 = vadd.f32 %v4348_v30, %v1295_v24  ;;  %v1486_v24 = vmul.f32 %v1431_v55, %v1243_v8  ;;  %v840_v8 = vor.u32 1.1754944e-38, %v839_v62  ;;  %v1594_v62 = vmax.f32 %v4140_v41, 0.0  ;;  %v4503_v54 = vpop.eup %2272 }
 0x26e   :  { %v1022_v43 = vmul.f32 %v967_v28, %v779_v5  ;;  %v1304_v28 = vor.u32 1.1754944e-38, %v1303_v17  ;;  %v984_v17 = vsub.f32 1.0, %v983_v14  ;;  %v1677_v50 = vsub.f32 0.0, %v1661_v25 }
 0x26f   :  { %v1300_v49 = vsel %vm4414_vm15, %v4348_v30, %v1296_v7  ;;  %v836_v30 = vsel %vm4434_vm3, %v4280_v27, %v832_v15  ;;  %v4457_v27 = vsel %vm1628_vm1, %v3958_v9, %v4334_v57  ;;  %v5198_v57 = vmax.f32 %v4145_v20, 0.0 }
 0x270   :  { %v4438_v23 = vsub.f32 %v1022_v43, %v1486_v24  ;;  %v1775_v43 = vmul.f32 %v4310_v51, %v1774_v44  ;;  %v1305_v5 = vsel %vm1302_vm14, %v1304_v28, %v1300_v49  ;;  %v5195_v51 = vsel %vm4290_vm5, %v4102_v21, %v4236_v48  ;;  %v4532_v55 = vpop.eup %2274 }
 0x271   :  { %v939_v44 = vsel %vm4388_vm10, %v4178_v53, %v5195_v51  ;;  %v892_v21 = vsel %vm4475_vm9, %v4198_v63, %v4355_v10  ;;  %v4487_v53 = vadd.f32 1e-06, %v4225_v59  ;;  %v841_v48 = vsel %vm4396_vm13, %v840_v8, %v836_v30 }
 0x272   :  { %v1778_v18 = vsel %vm4459_vm0, %v1775_v43, %v1772_v6  ;;  %v1862_v45 = vadd.f32 %v1742_v22, %v5198_v57  ;;  %v1477_v7 = vmul.f32 %v1305_v5, %v4318_v11  ;;  %v5199_v6 = vand.u32 2147483647, %v4143_v31 }
 0x273   :  { %v5200_v63 = vand.u32 2147483648, %v4143_v31  ;;  %v4501_v10 = vadd.f32 1e-06, %v4330_v13  ;;  %v1866_v26 = vadd.f32 %v1778_v18, %v1594_v62  ;;  %v4506_v15 = vmul.f32 %v939_v44, %v4160_v3  ;;  %v1185_v31 = vpop.xlane.xlu0 %1184 }
 0x274   :  { %vm894_vm5 = vcmp.eq.f32.partialorder %v5199_v6, 8.507059e+37  ;;  %v1013_v11 = vmul.f32 %v841_v48, %v4166_v42  ;;  %2276 = vrcp.f32 %v4487_v53  ;;  %v1391_v13 = vmul.f32 %v4296_v29, %v4205_v52 }
 0x275   :  { %v896_v59 = vor.u32 1.1754944e-38, %v5200_v63  ;;  %v1878_v12 = vsel %vm1622_vm4, %v4145_v20, %v1862_v45  ;;  %v985_v3 = vmul.f32 %v4410_v60, %v984_v17  ;;  %v969_v42 = vmul.f32 %v4260_v56, %v4182_v16 }
 0x276   :  { %v4515_v24 = vsub.f32 %v1013_v11, %v1477_v7  ;;  %vm1626_vm1 = vcmp.ne.f32.partialorder %v4158_v36, %v4158_v36  ;;  %2278 = vrcp.f32 %v4501_v10  ;;  %v941_v58 = vmul.f32 %v4503_v54, %v4408_v47 }
 0x277   :  { %v897_v33 = vsel %vm894_vm5, %v896_v59, %v892_v21  ;;  %v1882_v20 = vsel %vm1626_vm1, %v4140_v41, %v1866_v26  ;;  %v1702_v49 = vmul.f32 1.442695, %v1677_v50  ;;  %v4530_v39 = vadd.f32 1e-06, %v1185_v31  ;;  %v783_v59 = vpop.xlane.xlu2 %782 }
 0x278   :  { %v4523_v37 = vmul.f32 %v897_v33, %v4217_v61  ;;  %v1894_v28 = vmul.f32 0.0, %v1878_v12  ;;  %vm987_vm10 = vweird.f32 %v4345_v38  ;;  %v1392_v36 = vsub.f32 1.0, %v1391_v13 }
 0x279   :  { %v4537_v61 = vsub.f32 0.0, %v4515_v24  ;;  %v986_v30 = vadd.f32 %v4410_v60, %v985_v3  ;;  %v4541_v41 = vsub.f32 0.0, %v4438_v23  ;;  %v970_v14 = vsub.f32 1.0, %v969_v42  ;;  %vm4560_vm6 = vmor %vm987_vm10, %vm988_vm11 }
 0x27a   :  { %v4543_v22 = vpop.eup %2276  ;;  %v942_v43 = vsub.f32 1.0, %v941_v58  ;;  %v1393_v8 = vmul.f32 %v4296_v29, %v1392_v36  ;;  %vm1396_vm13 = vweird.f32 %v4296_v29  ;;  %v1401_v5 = vand.u32 2147483648, %v4205_v52 }
 0x27b   :  { %2280 = vpow2.f32 %v1702_v49  ;;  %v991_v4 = vand.u32 2147483647, %v4345_v38  ;;  %v993_v51 = vand.u32 2147483648, %v4345_v38  ;;  %v1399_v44 = vand.u32 2147483647, %v4205_v52  ;;  %v4589_v11 = vpop.xlane.xlu0 %780 }
 0x27c   :  { %v4551_v9 = vpop.eup %2278  ;;  %v4553_v25 = vmul.f32 0.0, %v1882_v20  ;;  %2282 = vrcp.f32 %v4530_v39  ;;  %v1394_v21 = vadd.f32 %v4296_v29, %v1393_v8  ;;  %vm1395_vm8 = vweird.f32 %v4205_v52 }
 0x27d   :  { %v4567_v48 = vadd.f32 %v4067_v0, %v1894_v28  ;;  %v1655_v57 = vand.u32 2147483647, %v4537_v61  ;;  %v990_v45 = vsel %vm4560_vm6, %v4410_v60, %v986_v30  ;;  %v1664_v62 = vand.u32 2147483647, %v4541_v41  ;;  %vm4576_vm12 = vmor %vm1395_vm8, %vm1396_vm13  ;;  %v1239_v0 = vpop.xlane.xlu1 %1238 }
 0x27e   :  { %v971_v7 = vmul.f32 %v4260_v56, %v970_v14  ;;  %v943_v52 = vmul.f32 %v4503_v54, %v942_v43  ;;  %v1398_v17 = vsel %vm4576_vm12, %v4296_v29, %v1394_v21  ;;  %v1402_v6 = vor.u32 1.1754944e-38, %v1401_v5 }
 0x27f   :  { %vm992_vm15 = vcmp.eq.f32.partialorder %v991_v4, 8.507059e+37  ;;  %v994_v60 = vor.u32 1.1754944e-38, %v993_v51  ;;  %v979_v63 = vand.u32 2147483648, %v4182_v16  ;;  %vm1400_vm7 = vcmp.eq.f32.partialorder %v1399_v44, 8.507059e+37 }
 0x280   :  { %vm973_vm3 = vweird.f32 %v4182_v16  ;;  %vm974_vm14 = vweird.f32 %v4260_v56  ;;  %v977_v26 = vand.u32 2147483647, %v4182_v16  ;;  %v1403_v50 = vsel %vm1400_vm7, %v1402_v6, %v1398_v17  ;;  %v777_v6 = vpop.xlane.xlu2 %776 }
 0x281   :  { %v4591_v33 = vpop.eup %2280  ;;  %v1671_v31 = vsub.f32 0.0, %v1655_v57  ;;  %v995_v29 = vsel %vm992_vm15, %v994_v60, %v990_v45  ;;  %v1680_v13 = vsub.f32 0.0, %v1664_v62  ;;  %v1484_v12 = vmul.f32 %v1403_v50, %v1239_v0  ;;  %vm4616_vm9 = vmor %vm973_vm3, %vm974_vm14 }
 0x282   :  { %v4593_v3 = vpop.eup %2282  ;;  %v4596_v42 = vadd.f32 %v4260_v56, %v971_v7  ;;  %v944_v58 = vadd.f32 %v4503_v54, %v943_v52  ;;  %vm946_vm0 = vweird.f32 %v4503_v54  ;;  %v949_v20 = vand.u32 2147483647, %v4408_v47 }
 0x283   :  { %v4601_v49 = vmul.f32 %v995_v29, %v783_v59  ;;  %v4603_v28 = vor.u32 1.1754944e-38, %v979_v63  ;;  %v4606_v36 = vsub.f32 %v4506_v15, %v1484_v12  ;;  %v1405_v30 = vmul.f32 %v4551_v9, %v4501_v10  ;;  %v1241_v60 = vpop.xlane.xlu0 %1240 }
 0x284   :  { %v1797_v14 = vadd.f32 1.0, %v4591_v33  ;;  %v1800_v43 = vmul.f32 -0.5, %v4591_v33  ;;  %vm945_vm5 = vweird.f32 %v4408_v47  ;;  %v951_v15 = vand.u32 2147483648, %v4408_v47 }
 0x285   :  { %v1690_v5 = vmul.f32 1.442695, %v1671_v31  ;;  %v1708_v4 = vmul.f32 1.442695, %v1680_v13  ;;  %vm4622_vm4 = vmor %vm945_vm5, %vm946_vm0  ;;  %v1406_v44 = vsub.f32 1.0, %v1405_v30  ;;  %v1447_v18 = vmul.f32 %v4352_v1, %v4263_v40 }
 0x286   :  { %v976_v16 = vsel %vm4616_vm9, %v4260_v56, %v4596_v42  ;;  %v948_v21 = vsel %vm4622_vm4, %v4503_v54, %v944_v58  ;;  %vm950_vm1 = vcmp.eq.f32.partialorder %v949_v20, 8.507059e+37  ;;  %v1415_v47 = vand.u32 2147483648, %v4501_v10 }
 0x287   :  { %vm4636_vm10 = vcmp.eq.f32.partialorder %v977_v26, 8.507059e+37  ;;  %v4641_v45 = vsub.f32 0.0, %v4606_v36  ;;  %v1407_v62 = vmul.f32 %v4551_v9, %v1406_v44  ;;  %vm1410_vm11 = vweird.f32 %v4551_v9 }
 0x288   :  { %v1413_v56 = vand.u32 2147483647, %v4501_v10  ;;  %2284 = vlog2.f32 %v1797_v14  ;;  %v1801_v38 = vadd.f32 1.0, %v1800_v43  ;;  %v952_v7 = vor.u32 1.1754944e-38, %v951_v15 }
 0x289   :  { %v1349_v54 = vmul.f32 %v4532_v55, %v4342_v35  ;;  %2286 = vpow2.f32 %v1690_v5  ;;  %v1408_v52 = vadd.f32 %v4551_v9, %v1407_v62  ;;  %vm1409_vm13 = vweird.f32 %v4501_v10 }
 0x28a   :  { %v1448_v0 = vsub.f32 1.0, %v1447_v18  ;;  %v953_v17 = vsel %vm950_vm1, %v952_v7, %v948_v21  ;;  %vm1411_vm6 = vmor %vm1409_vm13, %vm1410_vm11  ;;  %v1416_v63 = vor.u32 1.1754944e-38, %v1415_v47  ;;  %v1433_v26 = vmul.f32 %v4323_v19, %v4223_v34 }
 0x28b   :  { %v1350_v59 = vsub.f32 1.0, %v1349_v54  ;;  %v1662_v50 = vand.u32 2147483647, %v4641_v45  ;;  %v1412_v31 = vsel %vm1411_vm6, %v4551_v9, %v1408_v52  ;;  %vm1414_vm8 = vcmp.eq.f32.partialorder %v1413_v56, 8.507059e+37 }
 0x28c   :  { %v1359_v29 = vand.u32 2147483648, %v4342_v35  ;;  %v1417_v13 = vsel %vm1414_vm8, %v1416_v63, %v1412_v31  ;;  %vm1354_vm12 = vweird.f32 %v4532_v55  ;;  %v1357_v12 = vand.u32 2147483647, %v4342_v35 }
 0x28d   :  { %v1351_v10 = vmul.f32 %v4532_v55, %v1350_v59  ;;  %2288 = vpow2.f32 %v1708_v4  ;;  %v1021_v42 = vmul.f32 %v953_v17, %v777_v6  ;;  %v1485_v58 = vmul.f32 %v1417_v13, %v1241_v60  ;;  %v1233_v4 = vpop.xlane.xlu1 %1232 }
 0x28e   :  { %v1449_v20 = vmul.f32 %v4352_v1, %v1448_v0  ;;  %v2285_v30 = vpop.eup %2284  ;;  %v1591_v14 = vmax.f32 %v4515_v24, 0.0  ;;  %vm1353_vm15 = vweird.f32 %v4342_v35  ;;  %v1434_v43 = vsub.f32 1.0, %v1433_v26 }
 0x28f   :  { %v1352_v9 = vadd.f32 %v4532_v55, %v1351_v10  ;;  %v4662_v8 = vpop.eup %2286  ;;  %v1803_v15 = vand.u32 2147483647, %v4591_v33  ;;  %v1678_v5 = vsub.f32 0.0, %v1662_v50  ;;  %v4665_v51 = vsub.f32 %v1021_v42, %v1485_v58  ;;  %vm1355_vm7 = vmor %vm1353_vm15, %vm1354_vm12 }
 0x290   :  { %v1360_v44 = vor.u32 1.1754944e-38, %v1359_v29  ;;  %v4670_v18 = vmul.f32 %v4591_v33, %v1801_v38  ;;  %v981_v35 = vsel %vm4636_vm10, %v4603_v28, %v976_v16  ;;  %vm1358_vm3 = vcmp.eq.f32.partialorder %v1357_v12, 8.507059e+37 }
 0x291   :  { %v1356_v21 = vsel %vm1355_vm7, %v4532_v55, %v1352_v9  ;;  %v4677_v47 = vsub.f32 0.0, %v4665_v51  ;;  %v1450_v56 = vadd.f32 %v4352_v1, %v1449_v20  ;;  %vm1452_vm14 = vweird.f32 %v4352_v1 }
 0x292   :  { %v1361_v62 = vsel %vm1358_vm3, %v1360_v44, %v1356_v21  ;;  %v1461_v7 = vmul.f32 %v4593_v3, %v4530_v39  ;;  %v1743_v54 = vadd.f32 1.0, %v4662_v8  ;;  %v1435_v57 = vmul.f32 %v4323_v19, %v1434_v43  ;;  %v1247_v44 = vpop.xlane.xlu0 %1246 }
 0x293   :  { %v1481_v38 = vmul.f32 %v1361_v62, %v1233_v4  ;;  %v4685_v28 = vpop.eup %2288  ;;  %v4688_v55 = vmul.f32 %v981_v35, %v4589_v11  ;;  %v1704_v16 = vmul.f32 1.442695, %v1678_v5  ;;  %v1663_v52 = vand.u32 2147483647, %v4677_v47 }
 0x294   :  { %vm1451_vm0 = vweird.f32 %v4263_v40  ;;  %v1746_v17 = vmul.f32 -0.5, %v4662_v8  ;;  %v1455_v6 = vand.u32 2147483647, %v4263_v40  ;;  %v1457_v60 = vand.u32 2147483648, %v4263_v40 }
 0x295   :  { %v4693_v0 = vsub.f32 %v4523_v37, %v1481_v38  ;;  %v4698_v63 = vmul.f32 0.6931472, %v2285_v30  ;;  %v1679_v59 = vsub.f32 0.0, %v1663_v52  ;;  %2290 = vlog2.f32 %v1743_v54  ;;  %vm4702_vm9 = vmor %vm1451_vm0, %vm1452_vm14 }
 0x296   :  { %vm1438_vm5 = vweird.f32 %v4323_v19  ;;  %v1824_v37 = vadd.f32 1.0, %v4685_v28  ;;  %v1462_v26 = vsub.f32 1.0, %v1461_v7  ;;  %v1454_v50 = vsel %vm4702_vm9, %v4352_v1, %v1450_v56 }
 0x297   :  { %v1436_v40 = vadd.f32 %v4323_v19, %v1435_v57  ;;  %2292 = vpow2.f32 %v1704_v16  ;;  %v1706_v31 = vmul.f32 1.442695, %v1679_v59  ;;  %v4713_v29 = vsub.f32 0.0, %v4693_v0  ;;  %v1245_v59 = vpop.xlane.xlu1 %1244 }
 0x298   :  { %v1443_v13 = vand.u32 2147483648, %v4223_v34  ;;  %v1830_v10 = vand.u32 2147483647, %v4685_v28  ;;  %v1747_v12 = vadd.f32 1.0, %v1746_v17  ;;  %v1458_v42 = vor.u32 1.1754944e-38, %v1457_v60 }
 0x299   :  { %vm1437_vm4 = vweird.f32 %v4223_v34  ;;  %2294 = vpow2.f32 %v1706_v31  ;;  %v1659_v58 = vand.u32 2147483647, %v4713_v29  ;;  %v1749_v1 = vand.u32 2147483647, %v4662_v8 }
 0x29a   :  { %vm1456_vm1 = vcmp.eq.f32.partialorder %v1455_v6, 8.507059e+37  ;;  %2296 = vlog2.f32 %v1824_v37  ;;  %v1463_v20 = vmul.f32 %v4593_v3, %v1462_v26  ;;  %vm4723_vm10 = vmor %vm1437_vm4, %vm1438_vm5  ;;  %v997_v43 = vmul.f32 %v4543_v22, %v4487_v53 }
 0x29b   :  { %v1459_v30 = vsel %vm1456_vm1, %v1458_v42, %v1454_v50  ;;  %v2291_v5 = vpop.eup %2290  ;;  %v1675_v4 = vsub.f32 0.0, %v1659_v58  ;;  %v1440_v35 = vsel %vm4723_vm10, %v4323_v19, %v1436_v40  ;;  %v1441_v21 = vand.u32 2147483647, %v4223_v34 }
 0x29c   :  { %v1444_v62 = vor.u32 1.1754944e-38, %v1443_v13  ;;  %v1745_v56 = vmul.f32 0.6931472, %v2291_v5  ;;  %v1748_v7 = vmul.f32 %v4662_v8, %v1747_v12  ;;  %v1488_v38 = vmul.f32 %v1459_v30, %v1247_v44 }
 0x29d   :  { %v998_v54 = vsub.f32 1.0, %v997_v43  ;;  %v4734_v57 = vpop.eup %2292  ;;  %vm1466_vm11 = vweird.f32 %v4593_v3  ;;  %v1469_v16 = vand.u32 2147483647, %v4530_v39  ;;  %v1698_v52 = vmul.f32 1.442695, %v1675_v4 }
 0x29e   :  { %vm1750_vm13 = vcmp.lt.f32.partialorder %v1749_v1, 0.0004427343  ;;  %v1464_v17 = vadd.f32 %v4593_v3, %v1463_v20  ;;  %v1471_v19 = vand.u32 2147483648, %v4530_v39  ;;  %v4741_v34 = vsub.f32 %v4601_v49, %v1488_v38 }
 0x29f   :  { %v1751_v6 = vsel %vm1750_vm13, %v1748_v7, %v1745_v56  ;;  %v4743_v60 = vpop.eup %2294  ;;  %vm1465_vm6 = vweird.f32 %v4530_v39  ;;  %2298 = vpow2.f32 %v1698_v52  ;;  %vm1442_vm8 = vcmp.eq.f32.partialorder %v1441_v21, 8.507059e+37  ;;  %v1249_v21 = vpop.xlane.xlu2 %1248 }
 0x2a0   :  { %v1863_v8 = vadd.f32 %v1751_v6, %v1591_v14  ;;  %v2297_v11 = vpop.eup %2296  ;;  %v1806_v37 = vadd.f32 1.0, %v4734_v57  ;;  %vm1623_vm12 = vcmp.ne.f32.partialorder %v4537_v61, %v4537_v61  ;;  %v1445_v26 = vsel %vm1442_vm8, %v1444_v62, %v1440_v35  ;;  %vm4760_vm7 = vmor %vm1465_vm6, %vm1466_vm11  ;;  %v5223_v62 = vld [vmem:[#allocation14_spill] sm:$0xff] }
 0x2a1   :  { %v999_v49 = vmul.f32 %v4543_v22, %v998_v54  ;;  %vm4754_vm15 = vcmp.lt.f32.partialorder %v1803_v15, 0.0004427343  ;;  %vm4764_vm3 = vcmp.eq.f32.partialorder %v1469_v16, 8.507059e+37  ;;  %v4770_v40 = vsub.f32 0.0, %v4741_v34  ;;  %v785_v16 = vpop.xlane.xlu1 %784 }
 0x2a2   :  { %v1879_v61 = vsel %vm1623_vm12, %v4515_v24, %v1863_v8  ;;  %v1487_v33 = vmul.f32 %v1445_v26, %v1245_v59  ;;  %v1815_v15 = vadd.f32 1.0, %v4743_v60  ;;  %v1468_v31 = vsel %vm4760_vm7, %v4593_v3, %v1464_v17  ;;  %v5224_v17 = vld [vmem:[#allocation16_spill] sm:$0xff] }
 0x2a3   :  { %v1472_v13 = vor.u32 1.1754944e-38, %v1471_v19  ;;  %v1007_v12 = vand.u32 2147483648, %v4487_v53  ;;  %v1809_v42 = vmul.f32 -0.5, %v4734_v57  ;;  %v1895_v58 = vmul.f32 0.0, %v1879_v61 }
 0x2a4   :  { %v1666_v1 = vand.u32 2147483647, %v4770_v40  ;;  %vm1002_vm14 = vweird.f32 %v4543_v22  ;;  %2300 = vlog2.f32 %v1806_v37  ;;  %v4781_v24 = vsub.f32 %v4688_v55, %v1487_v33 }
 0x2a5   :  { %v1000_v20 = vadd.f32 %v4543_v22, %v999_v49  ;;  %v1005_v30 = vand.u32 2147483647, %v4487_v53  ;;  %v2299_v9 = vpop.eup %2298  ;;  %v1473_v3 = vsel %vm4764_vm3, %v1472_v13, %v1468_v31  ;;  %v1910_v43 = vadd.f32 %v4567_v48, %v1895_v58 }
 0x2a6   :  { %v1682_v5 = vsub.f32 0.0, %v1666_v1  ;;  %vm1001_vm0 = vweird.f32 %v4487_v53  ;;  %2302 = vlog2.f32 %v1815_v15  ;;  %v1779_v4 = vadd.f32 1.0, %v2299_v9 }
 0x2a7   :  { %v1782_v44 = vmul.f32 -0.5, %v2299_v9  ;;  %vm4789_vm9 = vmor %vm1001_vm0, %vm1002_vm14  ;;  %v1008_v55 = vor.u32 1.1754944e-38, %v1007_v12  ;;  %v1911_v56 = vadd.f32 %v1910_v43, %v5223_v62  ;;  %v4795_v38 = vsub.f32 0.0, %v4781_v24 }
 0x2a8   :  { %v1712_v7 = vmul.f32 1.442695, %v1682_v5  ;;  %v1004_v48 = vsel %vm4789_vm9, %v4543_v22, %v1000_v20  ;;  %v1827_v53 = vmul.f32 -0.5, %v4685_v28  ;;  %v1812_v54 = vand.u32 2147483647, %v4734_v57 }
 0x2a9   :  { %2304 = vlog2.f32 %v1779_v4  ;;  %vm1006_vm5 = vcmp.eq.f32.partialorder %v1005_v30, 8.507059e+37  ;;  %v1818_v52 = vmul.f32 -0.5, %v4743_v60  ;;  %v1912_v19 = vadd.f32 %v1911_v56, %v5224_v17 }
 0x2aa   :  { %2306 = vpow2.f32 %v1712_v7  ;;  %v1009_v6 = vsel %vm1006_vm5, %v1008_v55, %v1004_v48  ;;  %v2301_v8 = vpop.eup %2300  ;;  %v1805_v59 = vsel %vm4754_vm15, %v4670_v18, %v4698_v63  ;;  %v1489_v22 = vmul.f32 %v1473_v3, %v1249_v21 }
 0x2ab   :  { %v1665_v37 = vand.u32 2147483647, %v4795_v38  ;;  %v1025_v26 = vmul.f32 %v1009_v6, %v785_v16  ;;  %vm4811_vm4 = vcmp.lt.f32.partialorder %v1830_v10, 0.0004427343  ;;  %v1810_v39 = vadd.f32 1.0, %v1809_v42 }
 0x2ac   :  { %v1783_v14 = vadd.f32 1.0, %v1782_v44  ;;  %v1913_v61 = vadd.f32 %v1912_v19, %v4553_v25  ;;  %v2303_v33 = vpop.eup %2302  ;;  %v1826_v15 = vmul.f32 0.6931472, %v2297_v11  ;;  %v1785_v31 = vand.u32 2147483647, %v2299_v9 }
 0x2ad   :  { %v1681_v13 = vsub.f32 0.0, %v1665_v37  ;;  %v4816_v50 = vsub.f32 %v1025_v26, %v1489_v22  ;;  %v1869_v18 = vadd.f32 %v1805_v59, %v1597_v46  ;;  %v1808_v63 = vmul.f32 0.6931472, %v2301_v8 }
 0x2ae   :  { %vm4820_vm1 = vcmp.lt.f32.partialorder %v1812_v54, 0.0004427343  ;;  %v1819_v10 = vadd.f32 1.0, %v1818_v52  ;;  %v1828_v42 = vadd.f32 1.0, %v1827_v53  ;;  %v1821_v1 = vand.u32 2147483647, %v4743_v60 }
 0x2af   :  { %v2305_v58 = vpop.eup %2304  ;;  %v1710_v25 = vmul.f32 1.442695, %v1681_v13  ;;  %v4826_v11 = vsub.f32 0.0, %v4816_v50  ;;  %v1811_v30 = vmul.f32 %v4734_v57, %v1810_v39  ;;  %v1817_v3 = vmul.f32 0.6931472, %v2303_v33 }
 0x2b0   :  { %v4828_v20 = vpop.eup %2306  ;;  %v1781_v46 = vmul.f32 0.6931472, %v2305_v58  ;;  %v1784_v43 = vmul.f32 %v2299_v9, %v1783_v14  ;;  %v1595_v5 = vmax.f32 %v4693_v0, 0.0  ;;  %vm1786_vm10 = vcmp.lt.f32.partialorder %v1785_v31, 0.0004427343 }
 0x2b1   :  { %v1842_v4 = vadd.f32 1.0, %v4828_v20  ;;  %2308 = vpow2.f32 %v1710_v25  ;;  %v1814_v44 = vsel %vm4820_vm1, %v1811_v30, %v1808_v63  ;;  %v1820_v35 = vmul.f32 %v4743_v60, %v1819_v10 }
 0x2b2   :  { %v1787_v55 = vsel %vm1786_vm10, %v1784_v43, %v1781_v46  ;;  %v1667_v21 = vand.u32 2147483647, %v4826_v11  ;;  %v1829_v62 = vmul.f32 %v4685_v28, %v1828_v42  ;;  %v1598_v57 = vmax.f32 %v4606_v36, 0.0 }
 0x2b3   :  { %vm4839_vm11 = vcmp.lt.f32.partialorder %v1821_v1, 0.0004427343  ;;  %v1867_v56 = vadd.f32 %v1787_v55, %v1595_v5  ;;  %vm1627_vm13 = vcmp.ne.f32.partialorder %v4713_v29, %v4713_v29  ;;  %2310 = vlog2.f32 %v1842_v4 }
 0x2b4   :  { %v1823_v7 = vsel %vm4839_vm11, %v1820_v35, %v1817_v3  ;;  %v1683_v60 = vsub.f32 0.0, %v1667_v21  ;;  %v1832_v48 = vsel %vm4811_vm4, %v1829_v62, %v1826_v15  ;;  %v1870_v53 = vadd.f32 %v1814_v44, %v1598_v57 }
 0x2b5   :  { %v1599_v28 = vmax.f32 %v4665_v51, 0.0  ;;  %v1883_v54 = vsel %vm1627_vm13, %v4693_v0, %v1867_v56  ;;  %vm1629_vm6 = vcmp.ne.f32.partialorder %v4427_v2, %v4427_v2  ;;  %v1600_v16 = vmax.f32 %v4438_v23, 0.0 }
 0x2b6   :  { %v1899_v52 = vmul.f32 0.0, %v1883_v54  ;;  %v1714_v17 = vmul.f32 1.442695, %v1683_v60  ;;  %v1900_v29 = vmul.f32 0.0, %v4457_v27  ;;  %v1885_v6 = vsel %vm1629_vm6, %v4368_v32, %v1869_v18 }
 0x2b7   :  { %v2309_v19 = vpop.eup %2308  ;;  %v1871_v8 = vadd.f32 %v1823_v7, %v1599_v28  ;;  %v1845_v59 = vmul.f32 -0.5, %v4828_v20  ;;  %v1872_v22 = vadd.f32 %v1832_v48, %v1600_v16  ;;  %vm1630_vm8 = vcmp.ne.f32.partialorder %v4641_v45, %v4641_v45 }
 0x2b8   :  { %v1914_v0 = vadd.f32 %v1913_v61, %v1899_v52  ;;  %v1833_v37 = vadd.f32 1.0, %v2309_v19  ;;  %v1886_v2 = vsel %vm1630_vm8, %v4606_v36, %v1870_v53  ;;  %v1836_v26 = vmul.f32 -0.5, %v2309_v19 }
 0x2b9   :  { %2312 = vpow2.f32 %v1714_v17  ;;  %v2311_v49 = vpop.eup %2310  ;;  %v1901_v39 = vmul.f32 0.0, %v1885_v6  ;;  %vm1631_vm12 = vcmp.ne.f32.partialorder %v4677_v47, %v4677_v47  ;;  %vm1632_vm15 = vcmp.ne.f32.partialorder %v4541_v41, %v4541_v41 }
 0x2ba   :  { %v1915_v27 = vadd.f32 %v1914_v0, %v1900_v29  ;;  %2314 = vlog2.f32 %v1833_v37  ;;  %v1887_v32 = vsel %vm1631_vm12, %v4665_v51, %v1871_v8  ;;  %v1846_v14 = vadd.f32 1.0, %v1845_v59 }
 0x2bb   :  { %v1888_v45 = vsel %vm1632_vm15, %v4438_v23, %v1872_v22  ;;  %v1902_v61 = vmul.f32 0.0, %v1886_v2  ;;  %v1848_v36 = vand.u32 2147483647, %v4828_v20  ;;  %v1844_v15 = vmul.f32 0.6931472, %v2311_v49 }
 0x2bc   :  { %v1916_v33 = vadd.f32 %v1915_v27, %v1901_v39  ;;  %v1837_v31 = vadd.f32 1.0, %v1836_v26  ;;  %v1903_v13 = vmul.f32 0.0, %v1887_v32  ;;  %v1839_v18 = vand.u32 2147483647, %v2309_v19 }
 0x2bd   :  { %v1904_v12 = vmul.f32 0.0, %v1888_v45  ;;  %v1847_v10 = vmul.f32 %v4828_v20, %v1846_v14  ;;  %v1602_v41 = vmax.f32 %v4741_v34, 0.0  ;;  %vm1849_vm7 = vcmp.lt.f32.partialorder %v1848_v36, 0.0004427343 }
 0x2be   :  { %v1917_v63 = vadd.f32 %v1916_v33, %v1902_v61  ;;  %v1838_v25 = vmul.f32 %v2309_v19, %v1837_v31  ;;  %v1601_v3 = vmax.f32 %v4781_v24, 0.0  ;;  %vm1840_vm3 = vcmp.lt.f32.partialorder %v1839_v18, 0.0004427343  ;;  %v1989_v19 = vld [vmem:[#allocation5] sm:$0x1] }
 0x2bf   :  { %v2313_v47 = vpop.eup %2312  ;;  %v1850_v23 = vsel %vm1849_vm7, %v1847_v10, %v1844_v15  ;;  %vm1633_vm14 = vcmp.ne.f32.partialorder %v4795_v38, %v4795_v38  ;;  %vm1634_vm0 = vcmp.ne.f32.partialorder %v4770_v40, %v4770_v40  ;;  %v1603_v7 = vmax.f32 %v4816_v50, 0.0 }
 0x2c0   :  { %v2315_v58 = vpop.eup %2314  ;;  %v1918_v51 = vadd.f32 %v1917_v63, %v1903_v13  ;;  %v1851_v42 = vadd.f32 1.0, %v2313_v47  ;;  %v1854_v30 = vmul.f32 -0.5, %v2313_v47  ;;  %v1874_v5 = vadd.f32 %v1850_v23, %v1602_v41 }
 0x2c1   :  { %v1835_v1 = vmul.f32 0.6931472, %v2315_v58  ;;  %v1857_v35 = vand.u32 2147483647, %v2313_v47  ;;  %vm1635_vm5 = vcmp.ne.f32.partialorder %v4826_v11, %v4826_v11 }
 0x2c2   :  { %v1919_v46 = vadd.f32 %v1918_v51, %v1904_v12  ;;  %2316 = vlog2.f32 %v1851_v42  ;;  %v1855_v20 = vadd.f32 1.0, %v1854_v30  ;;  %v1890_v62 = vsel %vm1634_vm0, %v4741_v34, %v1874_v5 }
 0x2c3   :  { %v1841_v43 = vsel %vm1840_vm3, %v1838_v25, %v1835_v1  ;;  %vm1858_vm9 = vcmp.lt.f32.partialorder %v1857_v35, 0.0004427343  ;;  %v1906_v60 = vmul.f32 0.0, %v1890_v62 }
 0x2c4   :  { %v1873_v4 = vadd.f32 %v1841_v43, %v1601_v3  ;;  %v1856_v56 = vmul.f32 %v2313_v47, %v1855_v20 }
 0x2c6   :  { %v1889_v44 = vsel %vm1633_vm14, %v4781_v24, %v1873_v4 }
 0x2c7   :  { %v1905_v55 = vmul.f32 0.0, %v1889_v44 }
 0x2c8   :  { %v2317_v21 = vpop.eup %2316 }
 0x2c9   :  { %v1920_v57 = vadd.f32 %v1919_v46, %v1905_v55  ;;  %v1853_v9 = vmul.f32 0.6931472, %v2317_v21 }
 0x2cb   :  { %v1859_v48 = vsel %vm1858_vm9, %v1856_v56, %v1853_v9  ;;  %v1921_v24 = vadd.f32 %v1920_v57, %v1906_v60 }
 0x2cc   :  { %v1875_v38 = vadd.f32 %v1859_v48, %v1603_v7 }
 0x2ce   :  { %v1891_v53 = vsel %vm1635_vm5, %v4816_v50, %v1875_v38 }
 0x2cf   :  { %v1907_v40 = vmul.f32 0.0, %v1891_v53 }
 0x2d1   :  { %v1922_v28 = vadd.f32 %v1921_v24, %v1907_v40 }
 0x2d3   :  { %v1923_v54 = vrot.slane %v1922_v28, 4 }
 0x2d5   :  { %v1924_v16 = vadd.f32 %v1923_v54, %v1922_v28 }
 0x2d7   :  { %v1925_v34 = vrot.slane %v1924_v16, 2 }
 0x2d9   :  { %v1926_v52 = vadd.f32 %v1925_v34, %v1924_v16 }
 0x2db   :  { %v1927_v17 = vrot.slane %v1926_v52, 1 }
 0x2dd   :  { %v1928_v29 = vadd.f32 %v1927_v17, %v1926_v52 }
 0x2df   :  { %v1990_v6 = vadd.f32 %v1989_v19, %v1928_v29 }
 0x2e1   :  { %1992 = vst.msk [vmem:[#allocation5] sm:$0x1] %vm1986_vm2, %v1990_v6 }
 0x2e8   :  { %v1999_v11 = vld [vmem:[#allocation5] sm:$0x1] }
 0x2e9   :  { %v2000_v50 = vmul.f32 0.125, %v1999_v11 }
 0x2eb   :  { %2001 = vst.msk [vmem:[#allocation5] sm:$0x1] %vm1986_vm2, %v2000_v50 }
 0x2ec   :  { %2012 = dma.vmem_to_hbm [thread:$0]  %s2008_s12, 16, %s2010_s15, [#allocation4]  }
 0x2ed   :  { %2392 = dma.done.wait [#allocation4], 16  }
 0x2ee   :  { %2393 = vsyncadd [#allocation4], 4294967280 }
 0x2ef   :  { %2394 = dma.done.wait [#allocation7], 16  }
 0x2f0   :  { %2395 = vsyncadd [#allocation7], 4294967280 }
 0x2f1   :  { %2032 = vsyncpa [#allocation3], 1 }
 0x2f2   :  { %2033 = vsyncpa [#allocation4], 1 }
 0x2f3   :  { %2034 = vsyncpa [#allocation7], 1 }

</bundles_post_ra>
